<compile_context>
chip_gen: v6e
topology: v6e:2x2x1
jax: 0.10.0
libtpu: 0.0.40
codegen_flags: <defaults>
</compile_context>

<pallas_src>
import jax
import jax.numpy as jnp
from jax.experimental import pallas as pl
from jax.experimental.pallas import tpu as pltpu

# Normalize() constants folded into post-pool scalar math (compile-time).
_MEAN = (0.485, 0.456, 0.406)
_STD = (0.229, 0.224, 0.225)
_INV_SCALE = 1.0 / (255.0 * 224.0 * 224.0)   # ToTensor(/255) * global-avg-pool


# ----------------------------------------------------------------------------
# Fused kernel: frame pool/normalize -> stub features -> MLP -> both heads.
# ----------------------------------------------------------------------------
def fused_forward_kernel(frame_ref,                          # (224, 672) uint8, lanes cycle R,G,B
                         g_w, g_b, c_w, c_b,                 # stub extractors (3 -> 512), f32
                         b1, s1, b2, s2,                     # MLP biases + int8 dequant scales
                         b_heads, ba2, bd2, bd3,             # head biases (lane padded where needed)
                         w1a_hbm, w1b_hbm, w2_hbm,           # int8 big weights, HBM (manual DMA)
                         wh_hbm, wa2_hbm, wd2_hbm, wd3_hbm,  # bf16 head weights, HBM (manual DMA)
                         out_ref,                            # (1, 128) f32 packed output
                         w1a_v, w1b_v, w2_v, wh_v,           # VMEM landing buffers
                         wa2_v, wd2_v, wd3_v, sem):          # + DMA semaphores (7,)
    # ---- kick off all weight DMAs up front (earliest-needed first) ----------
    cp_w1a = pltpu.make_async_copy(w1a_hbm, w1a_v, sem.at[0]); cp_w1a.start()
    cp_w1b = pltpu.make_async_copy(w1b_hbm, w1b_v, sem.at[1]); cp_w1b.start()
    cp_w2 = pltpu.make_async_copy(w2_hbm, w2_v, sem.at[2]); cp_w2.start()
    cp_wh = pltpu.make_async_copy(wh_hbm, wh_v, sem.at[3]); cp_wh.start()
    cp_wa2 = pltpu.make_async_copy(wa2_hbm, wa2_v, sem.at[4]); cp_wa2.start()
    cp_wd2 = pltpu.make_async_copy(wd2_hbm, wd2_v, sem.at[5]); cp_wd2.start()
    cp_wd3 = pltpu.make_async_copy(wd3_hbm, wd3_v, sem.at[6]); cp_wd3.start()

    # ---- frame pooling (runs while the weight DMAs are in flight) -----------
    # Sum 224 rows in 32-row strips so at most ~2 strips of f32 are live
    # (no vreg spills), then a single sublane reduction to the column sums.
    col_acc = jnp.zeros((32, 672), jnp.float32)
    for si in range(7):                                      # 7 * 32 = 224 rows
        col_acc = col_acc + frame_ref[si * 32:(si + 1) * 32, :].astype(jnp.float32)
    col_sum = jnp.sum(col_acc, axis=0, keepdims=True)        # (1, 672)

    lane672 = jax.lax.broadcasted_iota(jnp.int32, (1, 672), 1)
    ch = lane672 % 3                                         # channel of each lane
    total = jnp.sum(col_sum, axis=1, keepdims=True)          # (1, 1)
    sum_r = jnp.sum(jnp.where(ch == 0, col_sum, 0.0), axis=1, keepdims=True)
    sum_g = jnp.sum(jnp.where(ch == 1, col_sum, 0.0), axis=1, keepdims=True)
    sum_b = total - sum_r - sum_g                            # third reduce eliminated
    ch_sums = (sum_r, sum_g, sum_b)
    # Fold ToTensor(/255), GAP and Normalize into one scalar per channel.
    pooled = [(ch_sums[c] * _INV_SCALE - _MEAN[c]) * (1.0 / _STD[c]) for c in range(3)]

    # ---- stub feature extractors: pooled(3) -> 512 each, ReLU ---------------
    f1 = g_b[...]
    f2 = c_b[...]
    for c in range(3):
        f1 = f1 + pooled[c] * g_w[c:c + 1, :]                # (1,1)*(1,512) broadcast
        f2 = f2 + pooled[c] * c_w[c:c + 1, :]
    f1 = jnp.maximum(f1, 0.0).astype(jnp.bfloat16)           # (1, 512)
    f2 = jnp.maximum(f2, 0.0).astype(jnp.bfloat16)

    # ---- MLP (concat eliminated): h = [f1|f2] @ W1 + b1 ---------------------
    # W1 stored int8 with a shared per-output-column scale s1 (dequant folded
    # into the bias add); MXU consumes bf16.
    cp_w1a.wait()
    cp_w1b.wait()
    h = (jnp.dot(f1, w1a_v[...].astype(jnp.bfloat16), preferred_element_type=jnp.float32)
         + jnp.dot(f2, w1b_v[...].astype(jnp.bfloat16), preferred_element_type=jnp.float32))
    h = jnp.maximum(h * s1[...] + b1[...], 0.0)

    cp_w2.wait()
    h = jnp.dot(h.astype(jnp.bfloat16), w2_v[...].astype(jnp.bfloat16),
                preferred_element_type=jnp.float32)
    h = jnp.maximum(h * s2[...] + b2[...], 0.0)              # (1, 512)
    hb = h.astype(jnp.bfloat16)

    # ---- fused head first layers: one (512,512) matmul ----------------------
    # lanes 0..255 = action hidden, lanes 256..511 = danger hidden.
    cp_wh.wait()
    ad = jnp.dot(hb, wh_v[...], preferred_element_type=jnp.float32) + b_heads[...]
    ad = jnp.maximum(ad, 0.0)                                # (1, 512)
    a = ad[:, :256].astype(jnp.bfloat16)
    d = ad[:, 256:].astype(jnp.bfloat16)

    lane128 = jax.lax.broadcasted_iota(jnp.int32, (1, 128), 1)

    # ---- action head: 256 -> 5 (lane padded to 128) -> Softmax --------------
    cp_wa2.wait()
    logits = jnp.dot(a, wa2_v[...], preferred_element_type=jnp.float32) + ba2[...]
    masked = jnp.where(lane128 < 5, logits, -1e30)
    m = jnp.max(masked, axis=-1, keepdims=True)
    e = jnp.exp(masked - m)                                  # padded lanes underflow to 0
    probs = e * pl.reciprocal(jnp.sum(e, axis=-1, keepdims=True), approx=True)

    # ---- danger head: 256 -> 128 -> ReLU -> 1 (lane 5) -> Sigmoid -----------
    cp_wd2.wait()
    dh = jnp.maximum(jnp.dot(d, wd2_v[...], preferred_element_type=jnp.float32) + bd2[...], 0.0)
    cp_wd3.wait()
    z = jnp.dot(dh.astype(jnp.bfloat16), wd3_v[...], preferred_element_type=jnp.float32) + bd3[...]
    dng = pl.reciprocal(1.0 + jnp.exp(-z), approx=True)      # (1, 128), real value at lane 5

    # ---- single lane-aligned packed store: action in 0..4, danger in 5 ------
    out_ref[...] = (jnp.where(lane128 < 5, probs, 0.0)
                    + jnp.where(lane128 == 5, dng, 0.0))


# ----------------------------------------------------------------------------
# Parameter init (deterministic) + int8 per-column quantization of big weights.
# ----------------------------------------------------------------------------
def _linear(key, n_in, n_out):
    kw, kb = jax.random.split(key)
    w = jax.random.normal(kw, (n_in, n_out), jnp.float32) * 0.02
    b = jax.random.normal(kb, (1, n_out), jnp.float32) * 0.02
    return w, b


def _quant_int8_percol(w):
    """Symmetric per-output-column int8 quantization, returns (q, scale)."""
    amax = jnp.max(jnp.abs(w), axis=0, keepdims=True)
    scale = jnp.where(amax > 0.0, amax / 127.0, 1.0)
    q = jnp.clip(jnp.round(w / scale), -127.0, 127.0).astype(jnp.int8)
    return q, scale.astype(jnp.float32)


def init_params(seed=0):
    keys = jax.random.split(jax.random.PRNGKey(seed), 10)
    p = {}
    # Stub feature extractors (tiny -> keep f32).
    p["g_w"], p["g_b"] = _linear(keys[0], 3, 512)            # ResnetGCN stand-in
    p["c_w"], p["c_b"] = _linear(keys[1], 3, 512)            # ResnetCNN stand-in

    # MLP layer 1: split into feature1 / feature2 halves (concat folded),
    # int8 with a shared per-column scale.
    w1, p["b1"] = _linear(keys[2], 1024, 512)
    w1_q, p["s1"] = _quant_int8_percol(w1)
    p["w1a"] = w1_q[:512]
    p["w1b"] = w1_q[512:]

    # MLP layer 2: int8 + per-column scale.
    w2, p["b2"] = _linear(keys[3], 512, 512)
    p["w2"], p["s2"] = _quant_int8_percol(w2)

    # Head first layers fused into one (512, 512) bf16 matrix.
    wa1, ba1 = _linear(keys[4], 512, 256)
    wd1, bd1 = _linear(keys[6], 512, 256)
    p["wh"] = jnp.concatenate([wa1, wd1], axis=1).astype(jnp.bfloat16)   # (512, 512)
    p["b_heads"] = jnp.concatenate([ba1, bd1], axis=1)                   # (1, 512)

    # action_classify last layer: lane-padded 5 -> 128 (zero columns).
    wa2, ba2 = _linear(keys[5], 256, 5)
    p["wa2"] = jnp.zeros((256, 128), jnp.float32).at[:, :5].set(wa2).astype(jnp.bfloat16)
    p["ba2"] = jnp.zeros((1, 128), jnp.float32).at[:, :5].set(ba2)

    # danger_recognition tail.
    wd2, p["bd2"] = _linear(keys[7], 256, 128)
    p["wd2"] = wd2.astype(jnp.bfloat16)
    wd3, bd3 = _linear(keys[8], 128, 1)
    p["wd3"] = jnp.zeros((128, 128), jnp.float32).at[:, 5:6].set(wd3).astype(jnp.bfloat16)
    p["bd3"] = jnp.zeros((1, 128), jnp.float32).at[:, 5:6].set(bd3)
    return p


# Order matters: first the small VMEM params, then the HBM (manual-DMA) weights.
_VMEM_PARAMS = ("g_w", "g_b", "c_w", "c_b",
                "b1", "s1", "b2", "s2",
                "b_heads", "ba2", "bd2", "bd3")
_HBM_PARAMS = ("w1a", "w1b", "w2", "wh", "wa2", "wd2", "wd3")


# ----------------------------------------------------------------------------
# End-to-end forward: one pallas_call for the whole network.
# ----------------------------------------------------------------------------
@jax.jit
def simple_model_forward(frame_hwc_u8, params):
    # (224, 224, 3) uint8 -> lane-dense (224, 672) view; channel = lane % 3.
    frame = frame_hwc_u8.reshape(224, 224 * 3)
    args = ((frame,)
            + tuple(params[k] for k in _VMEM_PARAMS)
            + tuple(params[k] for k in _HBM_PARAMS))

    vmem_spec = pl.BlockSpec(memory_space=pltpu.MemorySpace.VMEM)
    hbm_spec = pl.BlockSpec(memory_space=pl.ANY)

    packed = pl.pallas_call(
        fused_forward_kernel,
        out_shape=jax.ShapeDtypeStruct((1, 128), jnp.float32),
        in_specs=[vmem_spec] * (1 + len(_VMEM_PARAMS)) + [hbm_spec] * len(_HBM_PARAMS),
        out_specs=vmem_spec,
        scratch_shapes=[
            pltpu.VMEM((512, 512), jnp.int8),        # w1a landing buffer
            pltpu.VMEM((512, 512), jnp.int8),        # w1b
            pltpu.VMEM((512, 512), jnp.int8),        # w2
            pltpu.VMEM((512, 512), jnp.bfloat16),    # wh (fused head layer 1)
            pltpu.VMEM((256, 128), jnp.bfloat16),    # wa2
            pltpu.VMEM((256, 128), jnp.bfloat16),    # wd2
            pltpu.VMEM((128, 128), jnp.bfloat16),    # wd3
            pltpu.SemaphoreType.DMA((7,)),
        ],
    )(*args)

    # Match PyTorch 1-D output shapes: (5,) and (1,).
    action = packed[0, 0:5]
    danger = packed[0, 5:6]
    return action, danger


if __name__ == "__main__":
    key = jax.random.PRNGKey(0)
    frame = jax.random.randint(key, (224, 224, 3), 0, 256, dtype=jnp.int32).astype(jnp.uint8)
    params = init_params(seed=0)

    action_out, danger_out = simple_model_forward(frame, params)
    jax.block_until_ready((action_out, danger_out))

    assert action_out.shape == (5,)
    assert danger_out.shape == (1,)
    # Softmax output sums to ~1 (approx reciprocal), sigmoid output in (0, 1).
    assert abs(float(jnp.sum(action_out)) - 1.0) < 1e-2
    assert 0.0 < float(danger_out[0]) < 1.0
    print("KERNEL_OK")
</pallas_src>

<mosaic_0001>
module attributes {stable_mosaic.version = 11 : i64} {
  func.func @fused_forward_kernel(%arg0: memref<224x672xi8, #tpu.memory_space<vmem>>, %arg1: memref<3x512xf32, #tpu.memory_space<vmem>>, %arg2: memref<1x512xf32, #tpu.memory_space<vmem>>, %arg3: memref<3x512xf32, #tpu.memory_space<vmem>>, %arg4: memref<1x512xf32, #tpu.memory_space<vmem>>, %arg5: memref<1x512xf32, #tpu.memory_space<vmem>>, %arg6: memref<1x512xf32, #tpu.memory_space<vmem>>, %arg7: memref<1x512xf32, #tpu.memory_space<vmem>>, %arg8: memref<1x512xf32, #tpu.memory_space<vmem>>, %arg9: memref<1x512xf32, #tpu.memory_space<vmem>>, %arg10: memref<1x128xf32, #tpu.memory_space<vmem>>, %arg11: memref<1x128xf32, #tpu.memory_space<vmem>>, %arg12: memref<1x128xf32, #tpu.memory_space<vmem>>, %arg13: memref<512x512xi8, #tpu.memory_space<any>>, %arg14: memref<512x512xi8, #tpu.memory_space<any>>, %arg15: memref<512x512xi8, #tpu.memory_space<any>>, %arg16: memref<512x512xbf16, #tpu.memory_space<any>>, %arg17: memref<256x128xbf16, #tpu.memory_space<any>>, %arg18: memref<256x128xbf16, #tpu.memory_space<any>>, %arg19: memref<128x128xbf16, #tpu.memory_space<any>>, %arg20: memref<1x128xf32, #tpu.memory_space<vmem>>, %arg21: memref<512x512xi8, #tpu.memory_space<vmem>>, %arg22: memref<512x512xi8, #tpu.memory_space<vmem>>, %arg23: memref<512x512xi8, #tpu.memory_space<vmem>>, %arg24: memref<512x512xbf16, #tpu.memory_space<vmem>>, %arg25: memref<256x128xbf16, #tpu.memory_space<vmem>>, %arg26: memref<256x128xbf16, #tpu.memory_space<vmem>>, %arg27: memref<128x128xbf16, #tpu.memory_space<vmem>>, %arg28: memref<7x!tpu.dma_semaphore, #tpu.memory_space<semaphore_mem>>) attributes {dimension_semantics = [], scalar_prefetch = 0 : i64, scratch_operands = 8 : i64, tpu.core_type = #tpu.core_type<tc>} {
    %c0_i32 = arith.constant 0 : i32
    %0 = tpu.memref_slice %arg28[%c0_i32] : memref<7x!tpu.dma_semaphore, #tpu.memory_space<semaphore_mem>> -> memref<1x!tpu.dma_semaphore, #tpu.memory_space<semaphore_mem>>
    %1 = tpu.memref_squeeze %0 : memref<1x!tpu.dma_semaphore, #tpu.memory_space<semaphore_mem>> -> memref<!tpu.dma_semaphore, #tpu.memory_space<semaphore_mem>>
    tpu.enqueue_dma source(%arg13 : memref<512x512xi8, #tpu.memory_space<any>>) target(%arg21 : memref<512x512xi8, #tpu.memory_space<vmem>>) target_semaphore(%1 : memref<!tpu.dma_semaphore, #tpu.memory_space<semaphore_mem>>)
    %c1_i32 = arith.constant 1 : i32
    %2 = tpu.memref_slice %arg28[%c1_i32] : memref<7x!tpu.dma_semaphore, #tpu.memory_space<semaphore_mem>> -> memref<1x!tpu.dma_semaphore, #tpu.memory_space<semaphore_mem>>
    %3 = tpu.memref_squeeze %2 : memref<1x!tpu.dma_semaphore, #tpu.memory_space<semaphore_mem>> -> memref<!tpu.dma_semaphore, #tpu.memory_space<semaphore_mem>>
    tpu.enqueue_dma source(%arg14 : memref<512x512xi8, #tpu.memory_space<any>>) target(%arg22 : memref<512x512xi8, #tpu.memory_space<vmem>>) target_semaphore(%3 : memref<!tpu.dma_semaphore, #tpu.memory_space<semaphore_mem>>)
    %c2_i32 = arith.constant 2 : i32
    %4 = tpu.memref_slice %arg28[%c2_i32] : memref<7x!tpu.dma_semaphore, #tpu.memory_space<semaphore_mem>> -> memref<1x!tpu.dma_semaphore, #tpu.memory_space<semaphore_mem>>
    %5 = tpu.memref_squeeze %4 : memref<1x!tpu.dma_semaphore, #tpu.memory_space<semaphore_mem>> -> memref<!tpu.dma_semaphore, #tpu.memory_space<semaphore_mem>>
    tpu.enqueue_dma source(%arg15 : memref<512x512xi8, #tpu.memory_space<any>>) target(%arg23 : memref<512x512xi8, #tpu.memory_space<vmem>>) target_semaphore(%5 : memref<!tpu.dma_semaphore, #tpu.memory_space<semaphore_mem>>)
    %c3_i32 = arith.constant 3 : i32
    %6 = tpu.memref_slice %arg28[%c3_i32] : memref<7x!tpu.dma_semaphore, #tpu.memory_space<semaphore_mem>> -> memref<1x!tpu.dma_semaphore, #tpu.memory_space<semaphore_mem>>
    %7 = tpu.memref_squeeze %6 : memref<1x!tpu.dma_semaphore, #tpu.memory_space<semaphore_mem>> -> memref<!tpu.dma_semaphore, #tpu.memory_space<semaphore_mem>>
    tpu.enqueue_dma source(%arg16 : memref<512x512xbf16, #tpu.memory_space<any>>) target(%arg24 : memref<512x512xbf16, #tpu.memory_space<vmem>>) target_semaphore(%7 : memref<!tpu.dma_semaphore, #tpu.memory_space<semaphore_mem>>)
    %c4_i32 = arith.constant 4 : i32
    %8 = tpu.memref_slice %arg28[%c4_i32] : memref<7x!tpu.dma_semaphore, #tpu.memory_space<semaphore_mem>> -> memref<1x!tpu.dma_semaphore, #tpu.memory_space<semaphore_mem>>
    %9 = tpu.memref_squeeze %8 : memref<1x!tpu.dma_semaphore, #tpu.memory_space<semaphore_mem>> -> memref<!tpu.dma_semaphore, #tpu.memory_space<semaphore_mem>>
    tpu.enqueue_dma source(%arg17 : memref<256x128xbf16, #tpu.memory_space<any>>) target(%arg25 : memref<256x128xbf16, #tpu.memory_space<vmem>>) target_semaphore(%9 : memref<!tpu.dma_semaphore, #tpu.memory_space<semaphore_mem>>)
    %c5_i32 = arith.constant 5 : i32
    %10 = tpu.memref_slice %arg28[%c5_i32] : memref<7x!tpu.dma_semaphore, #tpu.memory_space<semaphore_mem>> -> memref<1x!tpu.dma_semaphore, #tpu.memory_space<semaphore_mem>>
    %11 = tpu.memref_squeeze %10 : memref<1x!tpu.dma_semaphore, #tpu.memory_space<semaphore_mem>> -> memref<!tpu.dma_semaphore, #tpu.memory_space<semaphore_mem>>
    tpu.enqueue_dma source(%arg18 : memref<256x128xbf16, #tpu.memory_space<any>>) target(%arg26 : memref<256x128xbf16, #tpu.memory_space<vmem>>) target_semaphore(%11 : memref<!tpu.dma_semaphore, #tpu.memory_space<semaphore_mem>>)
    %c6_i32 = arith.constant 6 : i32
    %12 = tpu.memref_slice %arg28[%c6_i32] : memref<7x!tpu.dma_semaphore, #tpu.memory_space<semaphore_mem>> -> memref<1x!tpu.dma_semaphore, #tpu.memory_space<semaphore_mem>>
    %13 = tpu.memref_squeeze %12 : memref<1x!tpu.dma_semaphore, #tpu.memory_space<semaphore_mem>> -> memref<!tpu.dma_semaphore, #tpu.memory_space<semaphore_mem>>
    tpu.enqueue_dma source(%arg19 : memref<128x128xbf16, #tpu.memory_space<any>>) target(%arg27 : memref<128x128xbf16, #tpu.memory_space<vmem>>) target_semaphore(%13 : memref<!tpu.dma_semaphore, #tpu.memory_space<semaphore_mem>>)
    %cst = arith.constant 0.000000e+00 : f32
    %14 = vector.broadcast %cst : f32 to vector<32x672xf32>
    %c0 = arith.constant 0 : index
    %c0_0 = arith.constant 0 : index
    %15 = vector.load %arg0[%c0, %c0_0] : memref<224x672xi8, #tpu.memory_space<vmem>>, vector<32x672xi8>
    %16 = arith.uitofp %15 : vector<32x672xi8> to vector<32x672xf32>
    %17 = arith.addf %14, %16 : vector<32x672xf32>
    %c32 = arith.constant 32 : index
    %c0_1 = arith.constant 0 : index
    %18 = vector.load %arg0[%c32, %c0_1] : memref<224x672xi8, #tpu.memory_space<vmem>>, vector<32x672xi8>
    %19 = arith.uitofp %18 : vector<32x672xi8> to vector<32x672xf32>
    %20 = arith.addf %17, %19 : vector<32x672xf32>
    %c64 = arith.constant 64 : index
    %c0_2 = arith.constant 0 : index
    %21 = vector.load %arg0[%c64, %c0_2] : memref<224x672xi8, #tpu.memory_space<vmem>>, vector<32x672xi8>
    %22 = arith.uitofp %21 : vector<32x672xi8> to vector<32x672xf32>
    %23 = arith.addf %20, %22 : vector<32x672xf32>
    %c96 = arith.constant 96 : index
    %c0_3 = arith.constant 0 : index
    %24 = vector.load %arg0[%c96, %c0_3] : memref<224x672xi8, #tpu.memory_space<vmem>>, vector<32x672xi8>
    %25 = arith.uitofp %24 : vector<32x672xi8> to vector<32x672xf32>
    %26 = arith.addf %23, %25 : vector<32x672xf32>
    %c128 = arith.constant 128 : index
    %c0_4 = arith.constant 0 : index
    %27 = vector.load %arg0[%c128, %c0_4] : memref<224x672xi8, #tpu.memory_space<vmem>>, vector<32x672xi8>
    %28 = arith.uitofp %27 : vector<32x672xi8> to vector<32x672xf32>
    %29 = arith.addf %26, %28 : vector<32x672xf32>
    %c160 = arith.constant 160 : index
    %c0_5 = arith.constant 0 : index
    %30 = vector.load %arg0[%c160, %c0_5] : memref<224x672xi8, #tpu.memory_space<vmem>>, vector<32x672xi8>
    %31 = arith.uitofp %30 : vector<32x672xi8> to vector<32x672xf32>
    %32 = arith.addf %29, %31 : vector<32x672xf32>
    %c192 = arith.constant 192 : index
    %c0_6 = arith.constant 0 : index
    %33 = vector.load %arg0[%c192, %c0_6] : memref<224x672xi8, #tpu.memory_space<vmem>>, vector<32x672xi8>
    %34 = arith.uitofp %33 : vector<32x672xi8> to vector<32x672xf32>
    %35 = arith.addf %32, %34 : vector<32x672xf32>
    %cst_7 = arith.constant dense<0.000000e+00> : vector<672xf32>
    %36 = vector.multi_reduction <add>, %35, %cst_7 [0] : vector<32x672xf32> to vector<672xf32>
    %37 = vector.shape_cast %36 : vector<672xf32> to vector<1x672xf32>
    %38 = tpu.iota {dimensions = array<i32: 1>} : vector<1x672xi32>
    %c3_i32_8 = arith.constant 3 : i32
    %c0_i32_9 = arith.constant 0 : i32
    %39 = arith.cmpi eq, %c3_i32_8, %c0_i32_9 : i32
    %c1_i32_10 = arith.constant 1 : i32
    %40 = arith.select %39, %c1_i32_10, %c3_i32_8 : i32
    %41 = vector.broadcast %40 : i32 to vector<1x672xi32>
    %42 = arith.remsi %38, %41 : vector<1x672xi32>
    %c0_i32_11 = arith.constant 0 : i32
    %43 = vector.broadcast %c0_i32_11 : i32 to vector<1x672xi32>
    %44 = arith.cmpi ne, %42, %43 : vector<1x672xi32>
    %c0_i32_12 = arith.constant 0 : i32
    %45 = vector.broadcast %c0_i32_12 : i32 to vector<1x672xi32>
    %46 = arith.cmpi slt, %42, %45 : vector<1x672xi32>
    %c0_i32_13 = arith.constant 0 : i32
    %47 = arith.cmpi slt, %40, %c0_i32_13 : i32
    %48 = vector.broadcast %47 : i1 to vector<1x672xi1>
    %49 = vector.broadcast %48 : vector<1x672xi1> to vector<1x672xi1>
    %50 = arith.xori %46, %49 : vector<1x672xi1>
    %51 = arith.andi %50, %44 : vector<1x672xi1>
    %52 = vector.broadcast %40 : i32 to vector<1x672xi32>
    %53 = arith.addi %42, %52 : vector<1x672xi32>
    %54 = arith.select %51, %53, %42 : vector<1x672xi1>, vector<1x672xi32>
    %cst_14 = arith.constant dense<0.000000e+00> : vector<1xf32>
    %55 = vector.multi_reduction <add>, %37, %cst_14 [1] : vector<1x672xf32> to vector<1xf32>
    %56 = vector.shape_cast %55 : vector<1xf32> to vector<1x1xf32>
    %c0_i32_15 = arith.constant 0 : i32
    %57 = vector.broadcast %c0_i32_15 : i32 to vector<1x672xi32>
    %58 = arith.cmpi eq, %54, %57 : vector<1x672xi32>
    %cst_16 = arith.constant 0.000000e+00 : f32
    %59 = vector.broadcast %cst_16 : f32 to vector<1x672xf32>
    %60 = arith.select %58, %37, %59 : vector<1x672xi1>, vector<1x672xf32>
    %cst_17 = arith.constant dense<0.000000e+00> : vector<1xf32>
    %61 = vector.multi_reduction <add>, %60, %cst_17 [1] : vector<1x672xf32> to vector<1xf32>
    %62 = vector.shape_cast %61 : vector<1xf32> to vector<1x1xf32>
    %c1_i32_18 = arith.constant 1 : i32
    %63 = vector.broadcast %c1_i32_18 : i32 to vector<1x672xi32>
    %64 = arith.cmpi eq, %54, %63 : vector<1x672xi32>
    %cst_19 = arith.constant 0.000000e+00 : f32
    %65 = vector.broadcast %cst_19 : f32 to vector<1x672xf32>
    %66 = arith.select %64, %37, %65 : vector<1x672xi1>, vector<1x672xf32>
    %cst_20 = arith.constant dense<0.000000e+00> : vector<1xf32>
    %67 = vector.multi_reduction <add>, %66, %cst_20 [1] : vector<1x672xf32> to vector<1xf32>
    %68 = vector.shape_cast %67 : vector<1xf32> to vector<1x1xf32>
    %69 = arith.subf %56, %62 : vector<1x1xf32>
    %70 = arith.subf %69, %68 : vector<1x1xf32>
    %cst_21 = arith.constant 7.81562619E-8 : f32
    %71 = vector.broadcast %cst_21 : f32 to vector<1x1xf32>
    %72 = arith.mulf %62, %71 : vector<1x1xf32>
    %cst_22 = arith.constant 4.850000e-01 : f32
    %73 = vector.broadcast %cst_22 : f32 to vector<1x1xf32>
    %74 = arith.subf %72, %73 : vector<1x1xf32>
    %cst_23 = arith.constant 4.36681223 : f32
    %75 = vector.broadcast %cst_23 : f32 to vector<1x1xf32>
    %76 = arith.mulf %74, %75 : vector<1x1xf32>
    %cst_24 = arith.constant 7.81562619E-8 : f32
    %77 = vector.broadcast %cst_24 : f32 to vector<1x1xf32>
    %78 = arith.mulf %68, %77 : vector<1x1xf32>
    %cst_25 = arith.constant 4.560000e-01 : f32
    %79 = vector.broadcast %cst_25 : f32 to vector<1x1xf32>
    %80 = arith.subf %78, %79 : vector<1x1xf32>
    %cst_26 = arith.constant 4.46428585 : f32
    %81 = vector.broadcast %cst_26 : f32 to vector<1x1xf32>
    %82 = arith.mulf %80, %81 : vector<1x1xf32>
    %cst_27 = arith.constant 7.81562619E-8 : f32
    %83 = vector.broadcast %cst_27 : f32 to vector<1x1xf32>
    %84 = arith.mulf %70, %83 : vector<1x1xf32>
    %cst_28 = arith.constant 4.060000e-01 : f32
    %85 = vector.broadcast %cst_28 : f32 to vector<1x1xf32>
    %86 = arith.subf %84, %85 : vector<1x1xf32>
    %cst_29 = arith.constant 4.44444466 : f32
    %87 = vector.broadcast %cst_29 : f32 to vector<1x1xf32>
    %88 = arith.mulf %86, %87 : vector<1x1xf32>
    %c0_30 = arith.constant 0 : index
    %c0_31 = arith.constant 0 : index
    %89 = vector.load %arg2[%c0_30, %c0_31] : memref<1x512xf32, #tpu.memory_space<vmem>>, vector<1x512xf32>
    %c0_32 = arith.constant 0 : index
    %c0_33 = arith.constant 0 : index
    %90 = vector.load %arg4[%c0_32, %c0_33] : memref<1x512xf32, #tpu.memory_space<vmem>>, vector<1x512xf32>
    %c0_34 = arith.constant 0 : index
    %c0_35 = arith.constant 0 : index
    %91 = vector.load %arg1[%c0_34, %c0_35] : memref<3x512xf32, #tpu.memory_space<vmem>>, vector<1x512xf32>
    %92 = vector.broadcast %76 : vector<1x1xf32> to vector<1x512xf32>
    %93 = arith.mulf %92, %91 : vector<1x512xf32>
    %94 = arith.addf %89, %93 : vector<1x512xf32>
    %c0_36 = arith.constant 0 : index
    %c0_37 = arith.constant 0 : index
    %95 = vector.load %arg3[%c0_36, %c0_37] : memref<3x512xf32, #tpu.memory_space<vmem>>, vector<1x512xf32>
    %96 = vector.broadcast %76 : vector<1x1xf32> to vector<1x512xf32>
    %97 = arith.mulf %96, %95 : vector<1x512xf32>
    %98 = arith.addf %90, %97 : vector<1x512xf32>
    %c1 = arith.constant 1 : index
    %c0_38 = arith.constant 0 : index
    %99 = vector.load %arg1[%c1, %c0_38] : memref<3x512xf32, #tpu.memory_space<vmem>>, vector<1x512xf32>
    %100 = vector.broadcast %82 : vector<1x1xf32> to vector<1x512xf32>
    %101 = arith.mulf %100, %99 : vector<1x512xf32>
    %102 = arith.addf %94, %101 : vector<1x512xf32>
    %c1_39 = arith.constant 1 : index
    %c0_40 = arith.constant 0 : index
    %103 = vector.load %arg3[%c1_39, %c0_40] : memref<3x512xf32, #tpu.memory_space<vmem>>, vector<1x512xf32>
    %104 = vector.broadcast %82 : vector<1x1xf32> to vector<1x512xf32>
    %105 = arith.mulf %104, %103 : vector<1x512xf32>
    %106 = arith.addf %98, %105 : vector<1x512xf32>
    %c2 = arith.constant 2 : index
    %c0_41 = arith.constant 0 : index
    %107 = vector.load %arg1[%c2, %c0_41] : memref<3x512xf32, #tpu.memory_space<vmem>>, vector<1x512xf32>
    %108 = vector.broadcast %88 : vector<1x1xf32> to vector<1x512xf32>
    %109 = arith.mulf %108, %107 : vector<1x512xf32>
    %110 = arith.addf %102, %109 : vector<1x512xf32>
    %c2_42 = arith.constant 2 : index
    %c0_43 = arith.constant 0 : index
    %111 = vector.load %arg3[%c2_42, %c0_43] : memref<3x512xf32, #tpu.memory_space<vmem>>, vector<1x512xf32>
    %112 = vector.broadcast %88 : vector<1x1xf32> to vector<1x512xf32>
    %113 = arith.mulf %112, %111 : vector<1x512xf32>
    %114 = arith.addf %106, %113 : vector<1x512xf32>
    %cst_44 = arith.constant 0.000000e+00 : f32
    %115 = vector.broadcast %cst_44 : f32 to vector<1x512xf32>
    %116 = arith.maximumf %110, %115 : vector<1x512xf32>
    %117 = arith.truncf %116 : vector<1x512xf32> to vector<1x512xbf16>
    %cst_45 = arith.constant 0.000000e+00 : f32
    %118 = vector.broadcast %cst_45 : f32 to vector<1x512xf32>
    %119 = arith.maximumf %114, %118 : vector<1x512xf32>
    %120 = arith.truncf %119 : vector<1x512xf32> to vector<1x512xbf16>
    %c0_i32_46 = arith.constant 0 : i32
    %121 = tpu.memref_slice %arg28[%c0_i32_46] : memref<7x!tpu.dma_semaphore, #tpu.memory_space<semaphore_mem>> -> memref<1x!tpu.dma_semaphore, #tpu.memory_space<semaphore_mem>>
    %122 = tpu.memref_squeeze %121 : memref<1x!tpu.dma_semaphore, #tpu.memory_space<semaphore_mem>> -> memref<!tpu.dma_semaphore, #tpu.memory_space<semaphore_mem>>
    tpu.wait_dma2 semaphore(%122 : memref<!tpu.dma_semaphore, #tpu.memory_space<semaphore_mem>>) src(%arg13 : memref<512x512xi8, #tpu.memory_space<any>>) dst(%arg21 : memref<512x512xi8, #tpu.memory_space<vmem>>)
    %c1_i32_47 = arith.constant 1 : i32
    %123 = tpu.memref_slice %arg28[%c1_i32_47] : memref<7x!tpu.dma_semaphore, #tpu.memory_space<semaphore_mem>> -> memref<1x!tpu.dma_semaphore, #tpu.memory_space<semaphore_mem>>
    %124 = tpu.memref_squeeze %123 : memref<1x!tpu.dma_semaphore, #tpu.memory_space<semaphore_mem>> -> memref<!tpu.dma_semaphore, #tpu.memory_space<semaphore_mem>>
    tpu.wait_dma2 semaphore(%124 : memref<!tpu.dma_semaphore, #tpu.memory_space<semaphore_mem>>) src(%arg14 : memref<512x512xi8, #tpu.memory_space<any>>) dst(%arg22 : memref<512x512xi8, #tpu.memory_space<vmem>>)
    %c0_48 = arith.constant 0 : index
    %c0_49 = arith.constant 0 : index
    %125 = vector.load %arg21[%c0_48, %c0_49] : memref<512x512xi8, #tpu.memory_space<vmem>>, vector<512x512xi8>
    %126 = arith.sitofp %125 : vector<512x512xi8> to vector<512x512xbf16>
    %cst_50 = arith.constant dense<0.000000e+00> : vector<1x512xf32>
    %127 = tpu.matmul %117, %126, %cst_50 {dimension_numbers = #tpu.dot_dimension_numbers<[1], [0], [0], [1], [0, 0, 1, 1], [], []>} : vector<1x512xbf16>, vector<512x512xbf16>, vector<1x512xf32> -> vector<1x512xf32>
    %c0_51 = arith.constant 0 : index
    %c0_52 = arith.constant 0 : index
    %128 = vector.load %arg22[%c0_51, %c0_52] : memref<512x512xi8, #tpu.memory_space<vmem>>, vector<512x512xi8>
    %129 = arith.sitofp %128 : vector<512x512xi8> to vector<512x512xbf16>
    %cst_53 = arith.constant dense<0.000000e+00> : vector<1x512xf32>
    %130 = tpu.matmul %120, %129, %cst_53 {dimension_numbers = #tpu.dot_dimension_numbers<[1], [0], [0], [1], [0, 0, 1, 1], [], []>} : vector<1x512xbf16>, vector<512x512xbf16>, vector<1x512xf32> -> vector<1x512xf32>
    %131 = arith.addf %127, %130 : vector<1x512xf32>
    %c0_54 = arith.constant 0 : index
    %c0_55 = arith.constant 0 : index
    %132 = vector.load %arg6[%c0_54, %c0_55] : memref<1x512xf32, #tpu.memory_space<vmem>>, vector<1x512xf32>
    %133 = arith.mulf %131, %132 : vector<1x512xf32>
    %c0_56 = arith.constant 0 : index
    %c0_57 = arith.constant 0 : index
    %134 = vector.load %arg5[%c0_56, %c0_57] : memref<1x512xf32, #tpu.memory_space<vmem>>, vector<1x512xf32>
    %135 = arith.addf %133, %134 : vector<1x512xf32>
    %cst_58 = arith.constant 0.000000e+00 : f32
    %136 = vector.broadcast %cst_58 : f32 to vector<1x512xf32>
    %137 = arith.maximumf %135, %136 : vector<1x512xf32>
    %c2_i32_59 = arith.constant 2 : i32
    %138 = tpu.memref_slice %arg28[%c2_i32_59] : memref<7x!tpu.dma_semaphore, #tpu.memory_space<semaphore_mem>> -> memref<1x!tpu.dma_semaphore, #tpu.memory_space<semaphore_mem>>
    %139 = tpu.memref_squeeze %138 : memref<1x!tpu.dma_semaphore, #tpu.memory_space<semaphore_mem>> -> memref<!tpu.dma_semaphore, #tpu.memory_space<semaphore_mem>>
    tpu.wait_dma2 semaphore(%139 : memref<!tpu.dma_semaphore, #tpu.memory_space<semaphore_mem>>) src(%arg15 : memref<512x512xi8, #tpu.memory_space<any>>) dst(%arg23 : memref<512x512xi8, #tpu.memory_space<vmem>>)
    %140 = arith.truncf %137 : vector<1x512xf32> to vector<1x512xbf16>
    %c0_60 = arith.constant 0 : index
    %c0_61 = arith.constant 0 : index
    %141 = vector.load %arg23[%c0_60, %c0_61] : memref<512x512xi8, #tpu.memory_space<vmem>>, vector<512x512xi8>
    %142 = arith.sitofp %141 : vector<512x512xi8> to vector<512x512xbf16>
    %cst_62 = arith.constant dense<0.000000e+00> : vector<1x512xf32>
    %143 = tpu.matmul %140, %142, %cst_62 {dimension_numbers = #tpu.dot_dimension_numbers<[1], [0], [0], [1], [0, 0, 1, 1], [], []>} : vector<1x512xbf16>, vector<512x512xbf16>, vector<1x512xf32> -> vector<1x512xf32>
    %c0_63 = arith.constant 0 : index
    %c0_64 = arith.constant 0 : index
    %144 = vector.load %arg8[%c0_63, %c0_64] : memref<1x512xf32, #tpu.memory_space<vmem>>, vector<1x512xf32>
    %145 = arith.mulf %143, %144 : vector<1x512xf32>
    %c0_65 = arith.constant 0 : index
    %c0_66 = arith.constant 0 : index
    %146 = vector.load %arg7[%c0_65, %c0_66] : memref<1x512xf32, #tpu.memory_space<vmem>>, vector<1x512xf32>
    %147 = arith.addf %145, %146 : vector<1x512xf32>
    %cst_67 = arith.constant 0.000000e+00 : f32
    %148 = vector.broadcast %cst_67 : f32 to vector<1x512xf32>
    %149 = arith.maximumf %147, %148 : vector<1x512xf32>
    %150 = arith.truncf %149 : vector<1x512xf32> to vector<1x512xbf16>
    %c3_i32_68 = arith.constant 3 : i32
    %151 = tpu.memref_slice %arg28[%c3_i32_68] : memref<7x!tpu.dma_semaphore, #tpu.memory_space<semaphore_mem>> -> memref<1x!tpu.dma_semaphore, #tpu.memory_space<semaphore_mem>>
    %152 = tpu.memref_squeeze %151 : memref<1x!tpu.dma_semaphore, #tpu.memory_space<semaphore_mem>> -> memref<!tpu.dma_semaphore, #tpu.memory_space<semaphore_mem>>
    tpu.wait_dma2 semaphore(%152 : memref<!tpu.dma_semaphore, #tpu.memory_space<semaphore_mem>>) src(%arg16 : memref<512x512xbf16, #tpu.memory_space<any>>) dst(%arg24 : memref<512x512xbf16, #tpu.memory_space<vmem>>)
    %c0_69 = arith.constant 0 : index
    %c0_70 = arith.constant 0 : index
    %153 = vector.load %arg24[%c0_69, %c0_70] : memref<512x512xbf16, #tpu.memory_space<vmem>>, vector<512x512xbf16>
    %cst_71 = arith.constant dense<0.000000e+00> : vector<1x512xf32>
    %154 = tpu.matmul %150, %153, %cst_71 {dimension_numbers = #tpu.dot_dimension_numbers<[1], [0], [0], [1], [0, 0, 1, 1], [], []>} : vector<1x512xbf16>, vector<512x512xbf16>, vector<1x512xf32> -> vector<1x512xf32>
    %c0_72 = arith.constant 0 : index
    %c0_73 = arith.constant 0 : index
    %155 = vector.load %arg9[%c0_72, %c0_73] : memref<1x512xf32, #tpu.memory_space<vmem>>, vector<1x512xf32>
    %156 = arith.addf %154, %155 : vector<1x512xf32>
    %cst_74 = arith.constant 0.000000e+00 : f32
    %157 = vector.broadcast %cst_74 : f32 to vector<1x512xf32>
    %158 = arith.maximumf %156, %157 : vector<1x512xf32>
    %159 = vector.extract_strided_slice %158 {offsets = [0, 0], sizes = [1, 256], strides = [1, 1]} : vector<1x512xf32> to vector<1x256xf32>
    %160 = arith.truncf %159 : vector<1x256xf32> to vector<1x256xbf16>
    %161 = vector.extract_strided_slice %158 {offsets = [0, 256], sizes = [1, 256], strides = [1, 1]} : vector<1x512xf32> to vector<1x256xf32>
    %162 = arith.truncf %161 : vector<1x256xf32> to vector<1x256xbf16>
    %163 = tpu.iota {dimensions = array<i32: 1>} : vector<1x128xi32>
    %c4_i32_75 = arith.constant 4 : i32
    %164 = tpu.memref_slice %arg28[%c4_i32_75] : memref<7x!tpu.dma_semaphore, #tpu.memory_space<semaphore_mem>> -> memref<1x!tpu.dma_semaphore, #tpu.memory_space<semaphore_mem>>
    %165 = tpu.memref_squeeze %164 : memref<1x!tpu.dma_semaphore, #tpu.memory_space<semaphore_mem>> -> memref<!tpu.dma_semaphore, #tpu.memory_space<semaphore_mem>>
    tpu.wait_dma2 semaphore(%165 : memref<!tpu.dma_semaphore, #tpu.memory_space<semaphore_mem>>) src(%arg17 : memref<256x128xbf16, #tpu.memory_space<any>>) dst(%arg25 : memref<256x128xbf16, #tpu.memory_space<vmem>>)
    %c0_76 = arith.constant 0 : index
    %c0_77 = arith.constant 0 : index
    %166 = vector.load %arg25[%c0_76, %c0_77] : memref<256x128xbf16, #tpu.memory_space<vmem>>, vector<256x128xbf16>
    %cst_78 = arith.constant dense<0.000000e+00> : vector<1x128xf32>
    %167 = tpu.matmul %160, %166, %cst_78 {dimension_numbers = #tpu.dot_dimension_numbers<[1], [0], [0], [1], [0, 0, 1, 1], [], []>} : vector<1x256xbf16>, vector<256x128xbf16>, vector<1x128xf32> -> vector<1x128xf32>
    %c0_79 = arith.constant 0 : index
    %c0_80 = arith.constant 0 : index
    %168 = vector.load %arg10[%c0_79, %c0_80] : memref<1x128xf32, #tpu.memory_space<vmem>>, vector<1x128xf32>
    %169 = arith.addf %167, %168 : vector<1x128xf32>
    %c5_i32_81 = arith.constant 5 : i32
    %170 = vector.broadcast %c5_i32_81 : i32 to vector<1x128xi32>
    %171 = arith.cmpi slt, %163, %170 : vector<1x128xi32>
    %cst_82 = arith.constant -1.000000e+30 : f32
    %172 = vector.broadcast %cst_82 : f32 to vector<1x128xf32>
    %173 = arith.select %171, %169, %172 : vector<1x128xi1>, vector<1x128xf32>
    %cst_83 = arith.constant dense<0xFF800000> : vector<1xf32>
    %174 = vector.multi_reduction <maximumf>, %173, %cst_83 [1] : vector<1x128xf32> to vector<1xf32>
    %175 = vector.shape_cast %174 : vector<1xf32> to vector<1x1xf32>
    %176 = vector.broadcast %175 : vector<1x1xf32> to vector<1x128xf32>
    %177 = arith.subf %173, %176 : vector<1x128xf32>
    %178 = math.exp %177 : vector<1x128xf32>
    %cst_84 = arith.constant dense<0.000000e+00> : vector<1xf32>
    %179 = vector.multi_reduction <add>, %178, %cst_84 [1] : vector<1x128xf32> to vector<1xf32>
    %180 = vector.shape_cast %179 : vector<1xf32> to vector<1x1xf32>
    %181 = tpu.reciprocal %180 {approx = true} : vector<1x1xf32> -> vector<1x1xf32>
    %182 = vector.broadcast %181 : vector<1x1xf32> to vector<1x128xf32>
    %183 = arith.mulf %178, %182 : vector<1x128xf32>
    %c5_i32_85 = arith.constant 5 : i32
    %184 = tpu.memref_slice %arg28[%c5_i32_85] : memref<7x!tpu.dma_semaphore, #tpu.memory_space<semaphore_mem>> -> memref<1x!tpu.dma_semaphore, #tpu.memory_space<semaphore_mem>>
    %185 = tpu.memref_squeeze %184 : memref<1x!tpu.dma_semaphore, #tpu.memory_space<semaphore_mem>> -> memref<!tpu.dma_semaphore, #tpu.memory_space<semaphore_mem>>
    tpu.wait_dma2 semaphore(%185 : memref<!tpu.dma_semaphore, #tpu.memory_space<semaphore_mem>>) src(%arg18 : memref<256x128xbf16, #tpu.memory_space<any>>) dst(%arg26 : memref<256x128xbf16, #tpu.memory_space<vmem>>)
    %c0_86 = arith.constant 0 : index
    %c0_87 = arith.constant 0 : index
    %186 = vector.load %arg26[%c0_86, %c0_87] : memref<256x128xbf16, #tpu.memory_space<vmem>>, vector<256x128xbf16>
    %cst_88 = arith.constant dense<0.000000e+00> : vector<1x128xf32>
    %187 = tpu.matmul %162, %186, %cst_88 {dimension_numbers = #tpu.dot_dimension_numbers<[1], [0], [0], [1], [0, 0, 1, 1], [], []>} : vector<1x256xbf16>, vector<256x128xbf16>, vector<1x128xf32> -> vector<1x128xf32>
    %c0_89 = arith.constant 0 : index
    %c0_90 = arith.constant 0 : index
    %188 = vector.load %arg11[%c0_89, %c0_90] : memref<1x128xf32, #tpu.memory_space<vmem>>, vector<1x128xf32>
    %189 = arith.addf %187, %188 : vector<1x128xf32>
    %cst_91 = arith.constant 0.000000e+00 : f32
    %190 = vector.broadcast %cst_91 : f32 to vector<1x128xf32>
    %191 = arith.maximumf %189, %190 : vector<1x128xf32>
    %c6_i32_92 = arith.constant 6 : i32
    %192 = tpu.memref_slice %arg28[%c6_i32_92] : memref<7x!tpu.dma_semaphore, #tpu.memory_space<semaphore_mem>> -> memref<1x!tpu.dma_semaphore, #tpu.memory_space<semaphore_mem>>
    %193 = tpu.memref_squeeze %192 : memref<1x!tpu.dma_semaphore, #tpu.memory_space<semaphore_mem>> -> memref<!tpu.dma_semaphore, #tpu.memory_space<semaphore_mem>>
    tpu.wait_dma2 semaphore(%193 : memref<!tpu.dma_semaphore, #tpu.memory_space<semaphore_mem>>) src(%arg19 : memref<128x128xbf16, #tpu.memory_space<any>>) dst(%arg27 : memref<128x128xbf16, #tpu.memory_space<vmem>>)
    %194 = arith.truncf %191 : vector<1x128xf32> to vector<1x128xbf16>
    %c0_93 = arith.constant 0 : index
    %c0_94 = arith.constant 0 : index
    %195 = vector.load %arg27[%c0_93, %c0_94] : memref<128x128xbf16, #tpu.memory_space<vmem>>, vector<128x128xbf16>
    %cst_95 = arith.constant dense<0.000000e+00> : vector<1x128xf32>
    %196 = tpu.matmul %194, %195, %cst_95 {dimension_numbers = #tpu.dot_dimension_numbers<[1], [0], [0], [1], [0, 0, 1, 1], [], []>} : vector<1x128xbf16>, vector<128x128xbf16>, vector<1x128xf32> -> vector<1x128xf32>
    %c0_96 = arith.constant 0 : index
    %c0_97 = arith.constant 0 : index
    %197 = vector.load %arg12[%c0_96, %c0_97] : memref<1x128xf32, #tpu.memory_space<vmem>>, vector<1x128xf32>
    %198 = arith.addf %196, %197 : vector<1x128xf32>
    %cst_98 = arith.constant 0.000000e+00 : f32
    %199 = vector.broadcast %cst_98 : f32 to vector<1x128xf32>
    %200 = arith.subf %199, %198 : vector<1x128xf32>
    %201 = math.exp %200 : vector<1x128xf32>
    %cst_99 = arith.constant 1.000000e+00 : f32
    %202 = vector.broadcast %cst_99 : f32 to vector<1x128xf32>
    %203 = arith.addf %202, %201 : vector<1x128xf32>
    %204 = tpu.reciprocal %203 {approx = true} : vector<1x128xf32> -> vector<1x128xf32>
    %c5_i32_100 = arith.constant 5 : i32
    %205 = vector.broadcast %c5_i32_100 : i32 to vector<1x128xi32>
    %206 = arith.cmpi slt, %163, %205 : vector<1x128xi32>
    %cst_101 = arith.constant 0.000000e+00 : f32
    %207 = vector.broadcast %cst_101 : f32 to vector<1x128xf32>
    %208 = arith.select %206, %183, %207 : vector<1x128xi1>, vector<1x128xf32>
    %c5_i32_102 = arith.constant 5 : i32
    %209 = vector.broadcast %c5_i32_102 : i32 to vector<1x128xi32>
    %210 = arith.cmpi eq, %163, %209 : vector<1x128xi32>
    %cst_103 = arith.constant 0.000000e+00 : f32
    %211 = vector.broadcast %cst_103 : f32 to vector<1x128xf32>
    %212 = arith.select %210, %204, %211 : vector<1x128xi1>, vector<1x128xf32>
    %213 = arith.addf %208, %212 : vector<1x128xf32>
    %c0_104 = arith.constant 0 : index
    %c0_105 = arith.constant 0 : index
    %214 = vector.load %arg20[%c0_104, %c0_105] : memref<1x128xf32, #tpu.memory_space<vmem>>, vector<1x128xf32>
    tpu.vector_store %arg20[%c0_104, %c0_105], %213 {strides = array<i32>} : memref<1x128xf32, #tpu.memory_space<vmem>>, vector<1x128xf32>,
    return
  }
}

</mosaic_0001>

<bundles_post_ra>
// kernel: simple_model_forward.1
= control target key start
LH: loop header
LB: loop body
LE: loop exit
PB: predicated region body
PF: predicated region fallthrough
CT: control target
= control target key end

     0   :  { %s8202_s0 = inlined_call_operand.vmem [shape: u8[224,672], index: 0, kind: input, shape index: {}]   ;;  %s8203_s1 = inlined_call_operand.hbm [shape: f32[3,512], index: 1, kind: input, shape index: {}]   ;;  %s8204_s2 = inlined_call_operand.hbm [shape: f32[1,512], index: 2, kind: input, shape index: {}]   ;;  %s8205_s3 = inlined_call_operand.hbm [shape: f32[3,512], index: 3, kind: input, shape index: {}]   ;;  %s8206_s4 = inlined_call_operand.hbm [shape: f32[1,512], index: 4, kind: input, shape index: {}]   ;;  %s8207_s5 = inlined_call_operand.hbm [shape: f32[1,512], index: 5, kind: input, shape index: {}]   ;;  %s8208_s6 = inlined_call_operand.hbm [shape: f32[1,512], index: 6, kind: input, shape index: {}]   ;;  %s8209_s7 = inlined_call_operand.hbm [shape: f32[1,512], index: 7, kind: input, shape index: {}]   ;;  %s8210_s8 = inlined_call_operand.hbm [shape: f32[1,512], index: 8, kind: input, shape index: {}]   ;;  %s8211_s9 = inlined_call_operand.hbm [shape: f32[1,512], index: 9, kind: input, shape index: {}]   ;;  %s8212_s10 = inlined_call_operand.hbm [shape: f32[1,128], index: 10, kind: input, shape index: {}]   ;;  %s8213_s11 = inlined_call_operand.hbm [shape: f32[1,128], index: 11, kind: input, shape index: {}]   ;;  %s8214_s12 = inlined_call_operand.hbm [shape: f32[1,128], index: 12, kind: input, shape index: {}]   ;;  %s8215_s13 = inlined_call_operand.vmem [shape: s8[512,512], index: 13, kind: input, shape index: {}]   ;;  %s8216_s14 = inlined_call_operand.vmem [shape: s8[512,512], index: 14, kind: input, shape index: {}]   ;;  %s8217_s15 = inlined_call_operand.hbm [shape: s8[512,512], index: 15, kind: input, shape index: {}]   ;;  %s8218_s16 = inlined_call_operand.vmem [shape: bf16[512,512], index: 16, kind: input, shape index: {}]   ;;  %s8219_s17 = inlined_call_operand.vmem [shape: bf16[256,128], index: 17, kind: input, shape index: {}]   ;;  %s8220_s18 = inlined_call_operand.hbm [shape: bf16[256,128], index: 18, kind: input, shape index: {}]   ;;  %s8221_s19 = inlined_call_operand.vmem [shape: bf16[128,128], index: 19, kind: input, shape index: {}]   ;;  %s8222_s20 = inlined_call_operand.vmem [shape: f32[1,128], index: 20, kind: output, shape index: {}]  }
   0x1   :  { %8484 = sst [smem:[#allocation314_spill]] %s8202_s0 }
   0x2   :  { %8485 = sst [smem:[#allocation315_spill]] %s8203_s1 }
   0x3   :  { %8486 = sst [smem:[#allocation316_spill]] %s8204_s2 }
   0x4   :  { %8487 = sst [smem:[#allocation317_spill]] %s8205_s3 }
   0x5   :  { %8488 = sst [smem:[#allocation318_spill]] %s8206_s4 }
   0x6   :  { %25 = vsyncpa [#allocation11], 0 }
   0x7   :  { %26 = vsyncpa [#allocation13], 0 }
   0x8   :  { %27 = vsyncpa [#allocation16], 0 }
   0x9   :  { %28 = vsyncpa [#allocation19], 0 }
   0xa   :  { %29 = vsyncpa [#allocation22], 0 }
   0xb   :  { %30 = vsyncpa [#allocation25], 0 }
   0xc   :  { %31 = vsyncpa [#allocation28], 0  ;;  %s5370_s1 = smov [#allocation12]   ;;  %s5371_s23 = smov [#allocation15]  }
   0xd   :  { %s50_s22 = sshll.u32 %s5370_s1, 4  ;;  %s70_s24 = sshll.u32 %s5371_s23, 4  ;;  %s51_s22 = int_to_ptr.vmem [resolvable:$true] %s50_s22  ;;  %s71_s24 = int_to_ptr.vmem [resolvable:$true] %s70_s24 }
   0xe   :  { %s5070_s2 = scalar_lea.vmem %s51_s22, 64  ;;  %p5075_p1 = scmp.lt.s32.totalorder %s51_s22, %s51_s22 }
   0xf   :  { %p5071_p0 = scmp.ne.s32.totalorder %s51_s22, %s5070_s2  ;;  %p5076_p2 = scmp.lt.s32.totalorder %s5070_s2, %s5070_s2 }
  0x11   :  { %p5077_p3 = por %p5076_p2, %p5075_p1 }
  0x13   :  { %p5078_p4 = pnand %p5077_p3, %p5071_p0 }
  0x15   :  { %5081 = shalt.err (!%p5078_p4)
}
  0x16   :  { %s8489_s26 = sld [smem:[#allocation316_spill]]  ;;  %s5090_s27 = scalar_lea.vmem %s71_s24, 64 }
  0x17   :  { %p5091_p5 = scmp.ne.s32.totalorder %s71_s24, %s5090_s27  ;;  %p5095_p6 = scmp.lt.s32.totalorder %s71_s24, %s71_s24 }
  0x18   :  { %p5096_p7 = scmp.lt.s32.totalorder %s5090_s27, %s5090_s27 }
  0x1a   :  { %p5097_p8 = por %p5096_p7, %p5095_p6 }
  0x1c   :  { %53 = dma.hbm_to_vmem [thread:$0]  %s8489_s26, 64, %s51_s22, [#allocation13]  }
  0x1d   :  { %p5098_p9 = pnand %p5097_p8, %p5091_p5 }
  0x1f   :  { %5101 = shalt.err (!%p5098_p9)
}
  0x20   :  { %s8490_s29 = sld [smem:[#allocation318_spill]]  ;;  %s5372_s30 = smov [#allocation18]  }
  0x21   :  { %s90_s0 = sshll.u32 %s5372_s30, 4  ;;  %s5373_s21 = smov [#allocation21]   ;;  %s91_s0 = int_to_ptr.vmem [resolvable:$true] %s90_s0 }
  0x22   :  { %s110_s1 = sshll.u32 %s5373_s21, 4  ;;  %s5110_s23 = scalar_lea.vmem %s91_s0, 64  ;;  %s111_s1 = int_to_ptr.vmem [resolvable:$true] %s110_s1 }
  0x23   :  { %p5111_p10 = scmp.ne.s32.totalorder %s91_s0, %s5110_s23  ;;  %p5115_p11 = scmp.lt.s32.totalorder %s91_s0, %s91_s0 }
  0x24   :  { %p5116_p12 = scmp.lt.s32.totalorder %s5110_s23, %s5110_s23 }
  0x26   :  { %73 = dma.hbm_to_vmem [thread:$0]  %s8490_s29, 64, %s71_s24, [#allocation16]  }
  0x27   :  { %p5117_p13 = por %p5116_p12, %p5115_p11 }
  0x29   :  { %p5118_p0 = pnand %p5117_p13, %p5111_p10 }
  0x2b   :  { %5121 = shalt.err (!%p5118_p0)
}
  0x2c   :  { %93 = dma.hbm_to_vmem [thread:$0]  %s8208_s6, 64, %s91_s0, [#allocation19]  }
  0x2d   :  { %s5130_s25 = scalar_lea.vmem %s111_s1, 64  ;;  %p5135_p2 = scmp.lt.s32.totalorder %s111_s1, %s111_s1 }
  0x2e   :  { %p5131_p1 = scmp.ne.s32.totalorder %s111_s1, %s5130_s25  ;;  %p5136_p3 = scmp.lt.s32.totalorder %s5130_s25, %s5130_s25 }
  0x30   :  { %p5137_p4 = por %p5136_p3, %p5135_p2 }
  0x32   :  { %p5138_p5 = pnand %p5137_p4, %p5131_p1 }
  0x34   :  { %5141 = shalt.err (!%p5138_p5)
}
  0x35   :  { %113 = dma.hbm_to_vmem [thread:$0]  %s8210_s8, 64, %s111_s1, [#allocation22]  }
  0x36   :  { %s5374_s26 = smov [#allocation24]   ;;  %s5375_s28 = smov [#allocation10]  }
  0x37   :  { %s130_s27 = sshll.u32 %s5374_s26, 4  ;;  %s40_s4 = sshll.u32 %s5375_s28, 4  ;;  %s131_s27 = int_to_ptr.vmem [resolvable:$true] %s130_s27  ;;  %s41_s4 = int_to_ptr.vmem [resolvable:$true] %s40_s4 }
  0x38   :  { %s5150_s29 = scalar_lea.vmem %s131_s27, 16  ;;  %s5154_s6 = scalar_lea.vmem %s131_s27, 32 }
  0x39   :  { %p5151_p6 = scmp.ne.s32.totalorder %s131_s27, %s5150_s29  ;;  %p5155_p7 = scmp.lt.s32.totalorder %s131_s27, %s131_s27 }
  0x3a   :  { %p5156_p8 = scmp.lt.s32.totalorder %s5154_s6, %s5150_s29 }
  0x3c   :  { %p5157_p9 = por %p5156_p8, %p5155_p7 }
  0x3e   :  { %p5158_p10 = pnand %p5157_p9, %p5151_p6 }
  0x40   :  { %5161 = shalt.err (!%p5158_p10)
}
  0x41   :  { %133 = dma.hbm_to_vmem [thread:$0]  %s8212_s10, 16, %s131_s27, [#allocation25]  }
  0x42   :  { %s5170_s21 = scalar_lea.vmem %s41_s4, 256  ;;  %p5175_p12 = scmp.lt.s32.totalorder %s41_s4, %s41_s4 }
  0x43   :  { %p5171_p11 = scmp.ne.s32.totalorder %s41_s4, %s5170_s21  ;;  %p5176_p13 = scmp.lt.s32.totalorder %s5170_s21, %s5170_s21 }
  0x45   :  { %p5177_p0 = por %p5176_p13, %p5175_p12 }
  0x47   :  { %p5178_p1 = pnand %p5177_p0, %p5171_p11 }
  0x49   :  { %5181 = shalt.err (!%p5178_p1)
}
  0x4a   :  { %s8491_s23 = sld [smem:[#allocation315_spill]]  ;;  %s5376_s22 = smov [#allocation14]  }
  0x4b   :  { %s60_s2 = sshll.u32 %s5376_s22, 4  ;;  %s5377_s25 = smov [#allocation17]   ;;  %s61_s2 = int_to_ptr.vmem [resolvable:$true] %s60_s2 }
  0x4c   :  { %s80_s24 = sshll.u32 %s5377_s25, 4  ;;  %s5190_s3 = scalar_lea.vmem %s61_s2, 256  ;;  %s81_s24 = int_to_ptr.vmem [resolvable:$true] %s80_s24 }
  0x4d   :  { %p5191_p2 = scmp.ne.s32.totalorder %s61_s2, %s5190_s3  ;;  %p5195_p3 = scmp.lt.s32.totalorder %s61_s2, %s61_s2 }
  0x4e   :  { %p5196_p4 = scmp.lt.s32.totalorder %s5190_s3, %s5190_s3 }
  0x50   :  { %43 = dma.hbm_to_vmem [thread:$0]  %s8491_s23, 256, %s41_s4, [#allocation11]  }
  0x51   :  { %p5197_p5 = por %p5196_p4, %p5195_p3 }
  0x53   :  { %p5198_p6 = pnand %p5197_p5, %p5191_p2 }
  0x55   :  { %5201 = shalt.err (!%p5198_p6)
}
  0x56   :  { %s8492_s27 = sld [smem:[#allocation317_spill]]  ;;  %s5210_s28 = scalar_lea.vmem %s81_s24, 64 }
  0x57   :  { %p5211_p7 = scmp.ne.s32.totalorder %s81_s24, %s5210_s28  ;;  %p5215_p8 = scmp.lt.s32.totalorder %s81_s24, %s81_s24 }
  0x58   :  { %p5216_p9 = scmp.lt.s32.totalorder %s5210_s28, %s5210_s28 }
  0x5a   :  { %p5217_p10 = por %p5216_p9, %p5215_p8 }
  0x5c   :  { %63 = dma.hbm_to_vmem [thread:$0]  %s8492_s27, 256, %s61_s2, [#allocation13]  }
  0x5d   :  { %p5218_p11 = pnand %p5217_p10, %p5211_p7 }
  0x5f   :  { %5221 = shalt.err (!%p5218_p11)
}
  0x60   :  { %83 = dma.hbm_to_vmem [thread:$0]  %s8207_s5, 64, %s81_s24, [#allocation16]  }
  0x61   :  { %s5378_s6 = smov [#allocation20]   ;;  %s5379_s0 = smov [#allocation23]  }
  0x62   :  { %s100_s30 = sshll.u32 %s5378_s6, 4  ;;  %s120_s21 = sshll.u32 %s5379_s0, 4  ;;  %s101_s30 = int_to_ptr.vmem [resolvable:$true] %s100_s30  ;;  %s121_s21 = int_to_ptr.vmem [resolvable:$true] %s120_s21 }
  0x63   :  { %s5230_s8 = scalar_lea.vmem %s101_s30, 64  ;;  %p5235_p13 = scmp.lt.s32.totalorder %s101_s30, %s101_s30 }
  0x64   :  { %p5231_p12 = scmp.ne.s32.totalorder %s101_s30, %s5230_s8  ;;  %p5236_p0 = scmp.lt.s32.totalorder %s5230_s8, %s5230_s8 }
  0x66   :  { %p5237_p1 = por %p5236_p0, %p5235_p13 }
  0x68   :  { %p5238_p2 = pnand %p5237_p1, %p5231_p12 }
  0x6a   :  { %5241 = shalt.err (!%p5238_p2)
}
  0x6b   :  { %103 = dma.hbm_to_vmem [thread:$0]  %s8209_s7, 64, %s101_s30, [#allocation19]  }
  0x6c   :  { %s5250_s22 = scalar_lea.vmem %s121_s21, 64  ;;  %p5255_p4 = scmp.lt.s32.totalorder %s121_s21, %s121_s21 }
  0x6d   :  { %p5251_p3 = scmp.ne.s32.totalorder %s121_s21, %s5250_s22  ;;  %p5256_p5 = scmp.lt.s32.totalorder %s5250_s22, %s5250_s22 }
  0x6f   :  { %p5257_p6 = por %p5256_p5, %p5255_p4 }
  0x71   :  { %p5258_p7 = pnand %p5257_p6, %p5251_p3 }
  0x73   :  { %5261 = shalt.err (!%p5258_p7)
}
  0x74   :  { %123 = dma.hbm_to_vmem [thread:$0]  %s8211_s9, 64, %s121_s21, [#allocation22]  }
  0x75   :  { %s5380_s25 = smov [#allocation26]   ;;  %s5381_s3 = smov [#allocation27]  }
  0x76   :  { %s140_s24 = sshll.u32 %s5380_s25, 4  ;;  %s150_s10 = sshll.u32 %s5381_s3, 4  ;;  %s141_s24 = int_to_ptr.vmem [resolvable:$true] %s140_s24  ;;  %s151_s10 = int_to_ptr.vmem [resolvable:$true] %s150_s10 }
  0x77   :  { %s5270_s26 = scalar_lea.vmem %s141_s24, 16  ;;  %s5274_s7 = scalar_lea.vmem %s141_s24, 32 }
  0x78   :  { %p5271_p8 = scmp.ne.s32.totalorder %s141_s24, %s5270_s26  ;;  %p5275_p9 = scmp.lt.s32.totalorder %s141_s24, %s141_s24 }
  0x79   :  { %p5276_p10 = scmp.lt.s32.totalorder %s5274_s7, %s5270_s26 }
  0x7b   :  { %p5277_p11 = por %p5276_p10, %p5275_p9 }
  0x7d   :  { %p5278_p12 = pnand %p5277_p11, %p5271_p8 }
  0x7f   :  { %5281 = shalt.err (!%p5278_p12)
}
  0x80   :  { %143 = dma.hbm_to_vmem [thread:$0]  %s8213_s11, 16, %s141_s24, [#allocation25]  }
  0x81   :  { %s5290_s4 = scalar_lea.vmem %s151_s10, 16  ;;  %s5294_s9 = scalar_lea.vmem %s151_s10, 32 }
  0x82   :  { %p5291_p13 = scmp.ne.s32.totalorder %s151_s10, %s5290_s4  ;;  %p5295_p0 = scmp.lt.s32.totalorder %s151_s10, %s151_s10 }
  0x83   :  { %p5296_p1 = scmp.lt.s32.totalorder %s5294_s9, %s5290_s4 }
  0x85   :  { %p5297_p2 = por %p5296_p1, %p5295_p0 }
  0x87   :  { %p5298_p3 = pnand %p5297_p2, %p5291_p13 }
  0x89   :  { %5301 = shalt.err (!%p5298_p3)
}
  0x8a   :  { %153 = dma.hbm_to_vmem [thread:$0]  %s8214_s12, 16, %s151_s10, [#allocation28]  }
  0x8b   :  { %5342 = dma.done.wait [#allocation11], 256  }
  0x8c   :  { %5343 = vsyncadd [#allocation11], 4294967040 }
  0x8d   :  { %5344 = dma.done.wait [#allocation13], 320  }
  0x8e   :  { %5345 = vsyncadd [#allocation13], 4294966976 }
  0x8f   :  { %5346 = dma.done.wait [#allocation16], 128  }
  0x90   :  { %5347 = vsyncadd [#allocation16], 4294967168 }
  0x91   :  { %5348 = dma.done.wait [#allocation19], 128  }
  0x92   :  { %5349 = vsyncadd [#allocation19], 4294967168 }
  0x93   :  { %5350 = dma.done.wait [#allocation22], 128  }
  0x94   :  { %5351 = vsyncadd [#allocation22], 4294967168 }
  0x95   :  { %5352 = dma.done.wait [#allocation25], 32  }
  0x96   :  { %5353 = vsyncadd [#allocation25], 4294967264 }
  0x97   :  { %5354 = dma.done.wait [#allocation28], 16  }
  0x98   :  { %5355 = vsyncadd [#allocation28], 4294967280  ;;  %v5530_v0 = vld [vmem:[%s8215_s13] sm:$0xff]  ;;  %v5535_v1 = vld [vmem:[%s8215_s13 + $0x8] sm:$0xff] }
  0x99   :  { %8493 = vst [vmem:[#allocation54_spill] sm:$0xff] %v5530_v0  ;;  %8494 = vst [vmem:[#allocation55_spill] sm:$0xff] %v5535_v1  ;;  %v5540_v2 = vld [vmem:[%s8215_s13 + $0x10] sm:$0xff]  ;;  %v5545_v3 = vld [vmem:[%s8215_s13 + $0x18] sm:$0xff] }
  0x9a   :  { %8495 = vst [vmem:[#allocation56_spill] sm:$0xff] %v5540_v2  ;;  %8496 = vst [vmem:[#allocation57_spill] sm:$0xff] %v5545_v3  ;;  %v5550_v4 = vld [vmem:[%s8215_s13 + $0x20] sm:$0xff]  ;;  %v5555_v5 = vld [vmem:[%s8215_s13 + $0x28] sm:$0xff] }
  0x9b   :  { %8497 = vst [vmem:[#allocation58_spill] sm:$0xff] %v5550_v4  ;;  %8498 = vst [vmem:[#allocation59_spill] sm:$0xff] %v5555_v5  ;;  %v5560_v6 = vld [vmem:[%s8215_s13 + $0x30] sm:$0xff]  ;;  %v5565_v7 = vld [vmem:[%s8215_s13 + $0x38] sm:$0xff] }
  0x9c   :  { %8499 = vst [vmem:[#allocation60_spill] sm:$0xff] %v5560_v6  ;;  %8500 = vst [vmem:[#allocation61_spill] sm:$0xff] %v5565_v7  ;;  %v5570_v8 = vld [vmem:[%s8215_s13 + $0x40] sm:$0xff]  ;;  %v5575_v9 = vld [vmem:[%s8215_s13 + $0x48] sm:$0xff] }
  0x9d   :  { %8501 = vst [vmem:[#allocation62_spill] sm:$0xff] %v5570_v8  ;;  %8502 = vst [vmem:[#allocation63_spill] sm:$0xff] %v5575_v9  ;;  %v5580_v10 = vld [vmem:[%s8215_s13 + $0x50] sm:$0xff]  ;;  %v5585_v11 = vld [vmem:[%s8215_s13 + $0x58] sm:$0xff] }
  0x9e   :  { %8503 = vst [vmem:[#allocation64_spill] sm:$0xff] %v5580_v10  ;;  %8504 = vst [vmem:[#allocation65_spill] sm:$0xff] %v5585_v11  ;;  %v5590_v12 = vld [vmem:[%s8215_s13 + $0x60] sm:$0xff]  ;;  %v5595_v13 = vld [vmem:[%s8215_s13 + $0x68] sm:$0xff] }
  0x9f   :  { %8505 = vst [vmem:[#allocation66_spill] sm:$0xff] %v5590_v12  ;;  %8506 = vst [vmem:[#allocation67_spill] sm:$0xff] %v5595_v13  ;;  %v5600_v14 = vld [vmem:[%s8215_s13 + $0x70] sm:$0xff]  ;;  %v5605_v15 = vld [vmem:[%s8215_s13 + $0x78] sm:$0xff] }
  0xa0   :  { %8507 = vst [vmem:[#allocation68_spill] sm:$0xff] %v5600_v14  ;;  %8508 = vst [vmem:[#allocation69_spill] sm:$0xff] %v5605_v15  ;;  %v5610_v16 = vld [vmem:[%s8215_s13 + $0x80] sm:$0xff]  ;;  %v5615_v17 = vld [vmem:[%s8215_s13 + $0x88] sm:$0xff] }
  0xa1   :  { %8509 = vst [vmem:[#allocation70_spill] sm:$0xff] %v5610_v16  ;;  %8510 = vst [vmem:[#allocation71_spill] sm:$0xff] %v5615_v17  ;;  %v5620_v18 = vld [vmem:[%s8215_s13 + $0x90] sm:$0xff]  ;;  %v5625_v19 = vld [vmem:[%s8215_s13 + $0x98] sm:$0xff] }
  0xa2   :  { %8511 = vst [vmem:[#allocation72_spill] sm:$0xff] %v5620_v18  ;;  %8512 = vst [vmem:[#allocation73_spill] sm:$0xff] %v5625_v19  ;;  %v5630_v20 = vld [vmem:[%s8215_s13 + $0xa0] sm:$0xff]  ;;  %v5635_v21 = vld [vmem:[%s8215_s13 + $0xa8] sm:$0xff] }
  0xa3   :  { %8513 = vst [vmem:[#allocation74_spill] sm:$0xff] %v5630_v20  ;;  %8514 = vst [vmem:[#allocation75_spill] sm:$0xff] %v5635_v21  ;;  %v5640_v22 = vld [vmem:[%s8215_s13 + $0xb0] sm:$0xff]  ;;  %v5645_v23 = vld [vmem:[%s8215_s13 + $0xb8] sm:$0xff] }
  0xa4   :  { %8515 = vst [vmem:[#allocation76_spill] sm:$0xff] %v5640_v22  ;;  %8516 = vst [vmem:[#allocation77_spill] sm:$0xff] %v5645_v23  ;;  %v5650_v24 = vld [vmem:[%s8215_s13 + $0xc0] sm:$0xff]  ;;  %v5655_v25 = vld [vmem:[%s8215_s13 + $0xc8] sm:$0xff] }
  0xa5   :  { %8517 = vst [vmem:[#allocation78_spill] sm:$0xff] %v5650_v24  ;;  %8518 = vst [vmem:[#allocation79_spill] sm:$0xff] %v5655_v25  ;;  %v5660_v26 = vld [vmem:[%s8215_s13 + $0xd0] sm:$0xff]  ;;  %v5665_v27 = vld [vmem:[%s8215_s13 + $0xd8] sm:$0xff] }
  0xa6   :  { %8519 = vst [vmem:[#allocation80_spill] sm:$0xff] %v5660_v26  ;;  %8520 = vst [vmem:[#allocation81_spill] sm:$0xff] %v5665_v27  ;;  %v5670_v28 = vld [vmem:[%s8215_s13 + $0xe0] sm:$0xff]  ;;  %v5675_v29 = vld [vmem:[%s8215_s13 + $0xe8] sm:$0xff] }
  0xa7   :  { %8521 = vst [vmem:[#allocation82_spill] sm:$0xff] %v5670_v28  ;;  %8522 = vst [vmem:[#allocation83_spill] sm:$0xff] %v5675_v29  ;;  %v5680_v30 = vld [vmem:[%s8215_s13 + $0xf0] sm:$0xff]  ;;  %v5685_v31 = vld [vmem:[%s8215_s13 + $0xf8] sm:$0xff] }
  0xa8   :  { %8523 = vst [vmem:[#allocation84_spill] sm:$0xff] %v5680_v30  ;;  %8524 = vst [vmem:[#allocation85_spill] sm:$0xff] %v5685_v31  ;;  %v5690_v32 = vld [vmem:[%s8215_s13 + $0x100] sm:$0xff]  ;;  %v5695_v33 = vld [vmem:[%s8215_s13 + $0x108] sm:$0xff] }
  0xa9   :  { %8525 = vst [vmem:[#allocation86_spill] sm:$0xff] %v5690_v32  ;;  %8526 = vst [vmem:[#allocation87_spill] sm:$0xff] %v5695_v33  ;;  %v5700_v34 = vld [vmem:[%s8215_s13 + $0x110] sm:$0xff]  ;;  %v5705_v35 = vld [vmem:[%s8215_s13 + $0x118] sm:$0xff] }
  0xaa   :  { %8527 = vst [vmem:[#allocation88_spill] sm:$0xff] %v5700_v34  ;;  %8528 = vst [vmem:[#allocation89_spill] sm:$0xff] %v5705_v35  ;;  %v5710_v36 = vld [vmem:[%s8215_s13 + $0x120] sm:$0xff]  ;;  %v5715_v37 = vld [vmem:[%s8215_s13 + $0x128] sm:$0xff] }
  0xab   :  { %8529 = vst [vmem:[#allocation90_spill] sm:$0xff] %v5710_v36  ;;  %8530 = vst [vmem:[#allocation91_spill] sm:$0xff] %v5715_v37  ;;  %v5720_v38 = vld [vmem:[%s8215_s13 + $0x130] sm:$0xff]  ;;  %v5725_v39 = vld [vmem:[%s8215_s13 + $0x138] sm:$0xff] }
  0xac   :  { %8531 = vst [vmem:[#allocation92_spill] sm:$0xff] %v5720_v38  ;;  %8532 = vst [vmem:[#allocation93_spill] sm:$0xff] %v5725_v39  ;;  %v5730_v40 = vld [vmem:[%s8215_s13 + $0x140] sm:$0xff]  ;;  %v5735_v41 = vld [vmem:[%s8215_s13 + $0x148] sm:$0xff] }
  0xad   :  { %8533 = vst [vmem:[#allocation94_spill] sm:$0xff] %v5730_v40  ;;  %8534 = vst [vmem:[#allocation95_spill] sm:$0xff] %v5735_v41  ;;  %v5740_v42 = vld [vmem:[%s8215_s13 + $0x150] sm:$0xff]  ;;  %v5745_v43 = vld [vmem:[%s8215_s13 + $0x158] sm:$0xff] }
  0xae   :  { %8535 = vst [vmem:[#allocation96_spill] sm:$0xff] %v5740_v42  ;;  %8536 = vst [vmem:[#allocation97_spill] sm:$0xff] %v5745_v43  ;;  %v5750_v44 = vld [vmem:[%s8215_s13 + $0x160] sm:$0xff]  ;;  %v5755_v45 = vld [vmem:[%s8215_s13 + $0x168] sm:$0xff] }
  0xaf   :  { %8537 = vst [vmem:[#allocation98_spill] sm:$0xff] %v5750_v44  ;;  %8538 = vst [vmem:[#allocation99_spill] sm:$0xff] %v5755_v45  ;;  %v5760_v46 = vld [vmem:[%s8215_s13 + $0x170] sm:$0xff]  ;;  %v5765_v47 = vld [vmem:[%s8215_s13 + $0x178] sm:$0xff] }
  0xb0   :  { %8539 = vst [vmem:[#allocation100_spill] sm:$0xff] %v5760_v46  ;;  %8540 = vst [vmem:[#allocation101_spill] sm:$0xff] %v5765_v47  ;;  %v5770_v48 = vld [vmem:[%s8215_s13 + $0x180] sm:$0xff]  ;;  %v5775_v49 = vld [vmem:[%s8215_s13 + $0x188] sm:$0xff] }
  0xb1   :  { %8541 = vst [vmem:[#allocation102_spill] sm:$0xff] %v5770_v48  ;;  %8542 = vst [vmem:[#allocation103_spill] sm:$0xff] %v5775_v49  ;;  %v5780_v50 = vld [vmem:[%s8215_s13 + $0x190] sm:$0xff]  ;;  %v5785_v51 = vld [vmem:[%s8215_s13 + $0x198] sm:$0xff] }
  0xb2   :  { %8543 = vst [vmem:[#allocation104_spill] sm:$0xff] %v5780_v50  ;;  %8544 = vst [vmem:[#allocation105_spill] sm:$0xff] %v5785_v51  ;;  %v5790_v52 = vld [vmem:[%s8215_s13 + $0x1a0] sm:$0xff]  ;;  %v5795_v53 = vld [vmem:[%s8215_s13 + $0x1a8] sm:$0xff] }
  0xb3   :  { %8545 = vst [vmem:[#allocation106_spill] sm:$0xff] %v5790_v52  ;;  %8546 = vst [vmem:[#allocation107_spill] sm:$0xff] %v5795_v53  ;;  %v5800_v54 = vld [vmem:[%s8215_s13 + $0x1b0] sm:$0xff]  ;;  %v5805_v55 = vld [vmem:[%s8215_s13 + $0x1b8] sm:$0xff] }
  0xb4   :  { %8547 = vst [vmem:[#allocation108_spill] sm:$0xff] %v5800_v54  ;;  %8548 = vst [vmem:[#allocation109_spill] sm:$0xff] %v5805_v55  ;;  %v5810_v56 = vld [vmem:[%s8215_s13 + $0x1c0] sm:$0xff]  ;;  %v5815_v57 = vld [vmem:[%s8215_s13 + $0x1c8] sm:$0xff] }
  0xb5   :  { %8549 = vst [vmem:[#allocation110_spill] sm:$0xff] %v5810_v56  ;;  %8550 = vst [vmem:[#allocation111_spill] sm:$0xff] %v5815_v57  ;;  %v5820_v58 = vld [vmem:[%s8215_s13 + $0x1d0] sm:$0xff]  ;;  %v5825_v59 = vld [vmem:[%s8215_s13 + $0x1d8] sm:$0xff] }
  0xb6   :  { %8551 = vst [vmem:[#allocation112_spill] sm:$0xff] %v5820_v58  ;;  %8552 = vst [vmem:[#allocation113_spill] sm:$0xff] %v5825_v59  ;;  %v5830_v60 = vld [vmem:[%s8215_s13 + $0x1e0] sm:$0xff]  ;;  %v5835_v61 = vld [vmem:[%s8215_s13 + $0x1e8] sm:$0xff] }
  0xb7   :  { %8553 = vst [vmem:[#allocation114_spill] sm:$0xff] %v5830_v60  ;;  %8554 = vst [vmem:[#allocation115_spill] sm:$0xff] %v5835_v61  ;;  %v5840_v62 = vld [vmem:[%s8215_s13 + $0x1f0] sm:$0xff]  ;;  %v5845_v63 = vld [vmem:[%s8215_s13 + $0x1f8] sm:$0xff] }
  0xb8   :  { %8555 = vst [vmem:[#allocation116_spill] sm:$0xff] %v5840_v62  ;;  %8556 = vst [vmem:[#allocation117_spill] sm:$0xff] %v5845_v63 }
  0xb9   :  { %359 = vsyncadd [#allocation9], 8192  ;;  %v5850_v50 = vld [vmem:[%s8216_s14] sm:$0xff]  ;;  %v5855_v18 = vld [vmem:[%s8216_s14 + $0x8] sm:$0xff] }
  0xba   :  { %8557 = vst [vmem:[#allocation118_spill] sm:$0xff] %v5850_v50  ;;  %8558 = vst [vmem:[#allocation119_spill] sm:$0xff] %v5855_v18  ;;  %v5860_v51 = vld [vmem:[%s8216_s14 + $0x10] sm:$0xff]  ;;  %v5865_v19 = vld [vmem:[%s8216_s14 + $0x18] sm:$0xff] }
  0xbb   :  { %8559 = vst [vmem:[#allocation120_spill] sm:$0xff] %v5860_v51  ;;  %8560 = vst [vmem:[#allocation121_spill] sm:$0xff] %v5865_v19  ;;  %v5870_v54 = vld [vmem:[%s8216_s14 + $0x20] sm:$0xff]  ;;  %v5875_v22 = vld [vmem:[%s8216_s14 + $0x28] sm:$0xff] }
  0xbc   :  { %8561 = vst [vmem:[#allocation122_spill] sm:$0xff] %v5870_v54  ;;  %8562 = vst [vmem:[#allocation123_spill] sm:$0xff] %v5875_v22  ;;  %v5880_v55 = vld [vmem:[%s8216_s14 + $0x30] sm:$0xff]  ;;  %v5885_v23 = vld [vmem:[%s8216_s14 + $0x38] sm:$0xff] }
  0xbd   :  { %8563 = vst [vmem:[#allocation124_spill] sm:$0xff] %v5880_v55  ;;  %8564 = vst [vmem:[#allocation125_spill] sm:$0xff] %v5885_v23  ;;  %v5890_v58 = vld [vmem:[%s8216_s14 + $0x40] sm:$0xff]  ;;  %v5895_v26 = vld [vmem:[%s8216_s14 + $0x48] sm:$0xff] }
  0xbe   :  { %8565 = vst [vmem:[#allocation126_spill] sm:$0xff] %v5890_v58  ;;  %8566 = vst [vmem:[#allocation127_spill] sm:$0xff] %v5895_v26  ;;  %v5900_v59 = vld [vmem:[%s8216_s14 + $0x50] sm:$0xff]  ;;  %v5905_v27 = vld [vmem:[%s8216_s14 + $0x58] sm:$0xff] }
  0xbf   :  { %8567 = vst [vmem:[#allocation128_spill] sm:$0xff] %v5900_v59  ;;  %8568 = vst [vmem:[#allocation129_spill] sm:$0xff] %v5905_v27  ;;  %v5910_v62 = vld [vmem:[%s8216_s14 + $0x60] sm:$0xff]  ;;  %v5915_v30 = vld [vmem:[%s8216_s14 + $0x68] sm:$0xff] }
  0xc0   :  { %8569 = vst [vmem:[#allocation130_spill] sm:$0xff] %v5910_v62  ;;  %8570 = vst [vmem:[#allocation131_spill] sm:$0xff] %v5915_v30  ;;  %v5920_v63 = vld [vmem:[%s8216_s14 + $0x70] sm:$0xff]  ;;  %v5925_v31 = vld [vmem:[%s8216_s14 + $0x78] sm:$0xff] }
  0xc1   :  { %8571 = vst [vmem:[#allocation132_spill] sm:$0xff] %v5920_v63  ;;  %8572 = vst [vmem:[#allocation133_spill] sm:$0xff] %v5925_v31  ;;  %v5930_v34 = vld [vmem:[%s8216_s14 + $0x80] sm:$0xff]  ;;  %v5935_v2 = vld [vmem:[%s8216_s14 + $0x88] sm:$0xff] }
  0xc2   :  { %8573 = vst [vmem:[#allocation134_spill] sm:$0xff] %v5930_v34  ;;  %8574 = vst [vmem:[#allocation135_spill] sm:$0xff] %v5935_v2  ;;  %v5940_v35 = vld [vmem:[%s8216_s14 + $0x90] sm:$0xff]  ;;  %v5945_v3 = vld [vmem:[%s8216_s14 + $0x98] sm:$0xff] }
  0xc3   :  { %8575 = vst [vmem:[#allocation136_spill] sm:$0xff] %v5940_v35  ;;  %8576 = vst [vmem:[#allocation137_spill] sm:$0xff] %v5945_v3  ;;  %v5950_v38 = vld [vmem:[%s8216_s14 + $0xa0] sm:$0xff]  ;;  %v5955_v6 = vld [vmem:[%s8216_s14 + $0xa8] sm:$0xff] }
  0xc4   :  { %8577 = vst [vmem:[#allocation138_spill] sm:$0xff] %v5950_v38  ;;  %8578 = vst [vmem:[#allocation139_spill] sm:$0xff] %v5955_v6  ;;  %v5960_v39 = vld [vmem:[%s8216_s14 + $0xb0] sm:$0xff]  ;;  %v5965_v7 = vld [vmem:[%s8216_s14 + $0xb8] sm:$0xff] }
  0xc5   :  { %8579 = vst [vmem:[#allocation140_spill] sm:$0xff] %v5960_v39  ;;  %8580 = vst [vmem:[#allocation141_spill] sm:$0xff] %v5965_v7  ;;  %v5970_v42 = vld [vmem:[%s8216_s14 + $0xc0] sm:$0xff]  ;;  %v5975_v10 = vld [vmem:[%s8216_s14 + $0xc8] sm:$0xff] }
  0xc6   :  { %8581 = vst [vmem:[#allocation142_spill] sm:$0xff] %v5970_v42  ;;  %8582 = vst [vmem:[#allocation143_spill] sm:$0xff] %v5975_v10  ;;  %v5980_v43 = vld [vmem:[%s8216_s14 + $0xd0] sm:$0xff]  ;;  %v5985_v11 = vld [vmem:[%s8216_s14 + $0xd8] sm:$0xff] }
  0xc7   :  { %8583 = vst [vmem:[#allocation144_spill] sm:$0xff] %v5980_v43  ;;  %8584 = vst [vmem:[#allocation145_spill] sm:$0xff] %v5985_v11  ;;  %v5990_v46 = vld [vmem:[%s8216_s14 + $0xe0] sm:$0xff]  ;;  %v5995_v14 = vld [vmem:[%s8216_s14 + $0xe8] sm:$0xff] }
  0xc8   :  { %8585 = vst [vmem:[#allocation146_spill] sm:$0xff] %v5990_v46  ;;  %8586 = vst [vmem:[#allocation147_spill] sm:$0xff] %v5995_v14  ;;  %v6000_v47 = vld [vmem:[%s8216_s14 + $0xf0] sm:$0xff]  ;;  %v6005_v15 = vld [vmem:[%s8216_s14 + $0xf8] sm:$0xff] }
  0xc9   :  { %8587 = vst [vmem:[#allocation148_spill] sm:$0xff] %v6000_v47  ;;  %8588 = vst [vmem:[#allocation149_spill] sm:$0xff] %v6005_v15  ;;  %v6010_v48 = vld [vmem:[%s8216_s14 + $0x100] sm:$0xff]  ;;  %v6015_v16 = vld [vmem:[%s8216_s14 + $0x108] sm:$0xff] }
  0xca   :  { %8589 = vst [vmem:[#allocation150_spill] sm:$0xff] %v6010_v48  ;;  %8590 = vst [vmem:[#allocation151_spill] sm:$0xff] %v6015_v16  ;;  %v6020_v49 = vld [vmem:[%s8216_s14 + $0x110] sm:$0xff]  ;;  %v6025_v17 = vld [vmem:[%s8216_s14 + $0x118] sm:$0xff] }
  0xcb   :  { %8591 = vst [vmem:[#allocation152_spill] sm:$0xff] %v6020_v49  ;;  %8592 = vst [vmem:[#allocation153_spill] sm:$0xff] %v6025_v17  ;;  %v6030_v52 = vld [vmem:[%s8216_s14 + $0x120] sm:$0xff]  ;;  %v6035_v20 = vld [vmem:[%s8216_s14 + $0x128] sm:$0xff] }
  0xcc   :  { %8593 = vst [vmem:[#allocation154_spill] sm:$0xff] %v6030_v52  ;;  %8594 = vst [vmem:[#allocation155_spill] sm:$0xff] %v6035_v20  ;;  %v6040_v53 = vld [vmem:[%s8216_s14 + $0x130] sm:$0xff]  ;;  %v6045_v21 = vld [vmem:[%s8216_s14 + $0x138] sm:$0xff] }
  0xcd   :  { %8595 = vst [vmem:[#allocation156_spill] sm:$0xff] %v6040_v53  ;;  %8596 = vst [vmem:[#allocation157_spill] sm:$0xff] %v6045_v21  ;;  %v6050_v56 = vld [vmem:[%s8216_s14 + $0x140] sm:$0xff]  ;;  %v6055_v24 = vld [vmem:[%s8216_s14 + $0x148] sm:$0xff] }
  0xce   :  { %8597 = vst [vmem:[#allocation158_spill] sm:$0xff] %v6050_v56  ;;  %8598 = vst [vmem:[#allocation159_spill] sm:$0xff] %v6055_v24  ;;  %v6060_v57 = vld [vmem:[%s8216_s14 + $0x150] sm:$0xff]  ;;  %v6065_v25 = vld [vmem:[%s8216_s14 + $0x158] sm:$0xff] }
  0xcf   :  { %8599 = vst [vmem:[#allocation160_spill] sm:$0xff] %v6060_v57  ;;  %8600 = vst [vmem:[#allocation161_spill] sm:$0xff] %v6065_v25  ;;  %v6070_v60 = vld [vmem:[%s8216_s14 + $0x160] sm:$0xff]  ;;  %v6075_v28 = vld [vmem:[%s8216_s14 + $0x168] sm:$0xff] }
  0xd0   :  { %8601 = vst [vmem:[#allocation162_spill] sm:$0xff] %v6070_v60  ;;  %8602 = vst [vmem:[#allocation163_spill] sm:$0xff] %v6075_v28  ;;  %v6080_v61 = vld [vmem:[%s8216_s14 + $0x170] sm:$0xff]  ;;  %v6085_v29 = vld [vmem:[%s8216_s14 + $0x178] sm:$0xff] }
  0xd1   :  { %8603 = vst [vmem:[#allocation164_spill] sm:$0xff] %v6080_v61  ;;  %8604 = vst [vmem:[#allocation165_spill] sm:$0xff] %v6085_v29  ;;  %v6090_v32 = vld [vmem:[%s8216_s14 + $0x180] sm:$0xff]  ;;  %v6095_v0 = vld [vmem:[%s8216_s14 + $0x188] sm:$0xff] }
  0xd2   :  { %8605 = vst [vmem:[#allocation166_spill] sm:$0xff] %v6090_v32  ;;  %8606 = vst [vmem:[#allocation167_spill] sm:$0xff] %v6095_v0  ;;  %v6100_v33 = vld [vmem:[%s8216_s14 + $0x190] sm:$0xff]  ;;  %v6105_v1 = vld [vmem:[%s8216_s14 + $0x198] sm:$0xff] }
  0xd3   :  { %8607 = vst [vmem:[#allocation168_spill] sm:$0xff] %v6100_v33  ;;  %8608 = vst [vmem:[#allocation169_spill] sm:$0xff] %v6105_v1  ;;  %v6110_v36 = vld [vmem:[%s8216_s14 + $0x1a0] sm:$0xff]  ;;  %v6115_v4 = vld [vmem:[%s8216_s14 + $0x1a8] sm:$0xff] }
  0xd4   :  { %8609 = vst [vmem:[#allocation170_spill] sm:$0xff] %v6110_v36  ;;  %8610 = vst [vmem:[#allocation171_spill] sm:$0xff] %v6115_v4  ;;  %v6120_v37 = vld [vmem:[%s8216_s14 + $0x1b0] sm:$0xff]  ;;  %v6125_v5 = vld [vmem:[%s8216_s14 + $0x1b8] sm:$0xff] }
  0xd5   :  { %8611 = vst [vmem:[#allocation172_spill] sm:$0xff] %v6120_v37  ;;  %8612 = vst [vmem:[#allocation173_spill] sm:$0xff] %v6125_v5  ;;  %v6130_v40 = vld [vmem:[%s8216_s14 + $0x1c0] sm:$0xff]  ;;  %v6135_v8 = vld [vmem:[%s8216_s14 + $0x1c8] sm:$0xff] }
  0xd6   :  { %8613 = vst [vmem:[#allocation174_spill] sm:$0xff] %v6130_v40  ;;  %8614 = vst [vmem:[#allocation175_spill] sm:$0xff] %v6135_v8  ;;  %v6140_v41 = vld [vmem:[%s8216_s14 + $0x1d0] sm:$0xff]  ;;  %v6145_v9 = vld [vmem:[%s8216_s14 + $0x1d8] sm:$0xff] }
  0xd7   :  { %8615 = vst [vmem:[#allocation176_spill] sm:$0xff] %v6140_v41  ;;  %8616 = vst [vmem:[#allocation177_spill] sm:$0xff] %v6145_v9  ;;  %v6150_v44 = vld [vmem:[%s8216_s14 + $0x1e0] sm:$0xff]  ;;  %v6155_v12 = vld [vmem:[%s8216_s14 + $0x1e8] sm:$0xff] }
  0xd8   :  { %8617 = vst [vmem:[#allocation178_spill] sm:$0xff] %v6150_v44  ;;  %8618 = vst [vmem:[#allocation179_spill] sm:$0xff] %v6155_v12  ;;  %v6160_v45 = vld [vmem:[%s8216_s14 + $0x1f0] sm:$0xff]  ;;  %v6165_v13 = vld [vmem:[%s8216_s14 + $0x1f8] sm:$0xff] }
  0xd9   :  { %8619 = vst [vmem:[#allocation180_spill] sm:$0xff] %v6160_v45  ;;  %8620 = vst [vmem:[#allocation181_spill] sm:$0xff] %v6165_v13 }
  0xda   :  { %529 = vsyncadd [#allocation9 + $0x1], 8192  ;;  %v6170_v33 = vld [vmem:[%s8218_s16] sm:$0xff]  ;;  %v6175_v35 = vld [vmem:[%s8218_s16 + $0x8] sm:$0xff]  ;;  %s5382_s30 = smov [#allocation4]  }
  0xdb   :  { %8621 = vst [vmem:[#allocation182_spill] sm:$0xff] %v6170_v33  ;;  %8622 = vst [vmem:[#allocation183_spill] sm:$0xff] %v6175_v35  ;;  %s538_s12 = sshll.u32 %s5382_s30, 4  ;;  %v6180_v1 = vld [vmem:[%s8218_s16 + $0x10] sm:$0xff]  ;;  %v6185_v3 = vld [vmem:[%s8218_s16 + $0x18] sm:$0xff]  ;;  %s539_s12 = int_to_ptr.vmem [resolvable:$true] %s538_s12 }
  0xdc   :  { %8623 = vst [vmem:[#allocation184_spill] sm:$0xff] %v6180_v1  ;;  %8624 = vst [vmem:[#allocation185_spill] sm:$0xff] %v6185_v3  ;;  %v6190_v33 = vld [vmem:[%s8218_s16 + $0x20] sm:$0xff]  ;;  %v6195_v35 = vld [vmem:[%s8218_s16 + $0x28] sm:$0xff]  ;;  %s5310_s10 = scalar_lea.vmem %s539_s12, 8192  ;;  %p5315_p5 = scmp.lt.s32.totalorder %s539_s12, %s539_s12 }
  0xdd   :  { %8625 = vst [vmem:[#allocation186_spill] sm:$0xff] %v6190_v33  ;;  %8626 = vst [vmem:[#allocation187_spill] sm:$0xff] %v6195_v35  ;;  %v6200_v1 = vld [vmem:[%s8218_s16 + $0x30] sm:$0xff]  ;;  %v6205_v3 = vld [vmem:[%s8218_s16 + $0x38] sm:$0xff]  ;;  %p5311_p4 = scmp.ne.s32.totalorder %s539_s12, %s5310_s10  ;;  %p5316_p6 = scmp.lt.s32.totalorder %s5310_s10, %s5310_s10 }
  0xde   :  { %8627 = vst [vmem:[#allocation188_spill] sm:$0xff] %v6200_v1  ;;  %8628 = vst [vmem:[#allocation189_spill] sm:$0xff] %v6205_v3 }
  0xdf   :  { %p5317_p7 = por %p5316_p6, %p5315_p5 }
  0xe1   :  { %p5318_p8 = pnand %p5317_p7, %p5311_p4 }
  0xe3   :  { %5321 = shalt.err (!%p5318_p8)  }
  0xe4   :  { %541 = dma.hbm_to_vmem [thread:$0]  %s8217_s15, 8192, %s539_s12, [#allocation9 + $0x2]  ;;  %v6213_v35 = vld [vmem:[%s8218_s16 + $0x40] sm:$0xff]  ;;  %v6218_v3 = vld [vmem:[%s8218_s16 + $0x48] sm:$0xff]  ;;  %v6223_v33 = vld [vmem:[%s8218_s16 + $0x50] sm:$0xff] }
  0xe5   :  { %8629 = vst [vmem:[#allocation190_spill] sm:$0xff] %v6213_v35  ;;  %8630 = vst [vmem:[#allocation191_spill] sm:$0xff] %v6218_v3  ;;  %v6228_v1 = vld [vmem:[%s8218_s16 + $0x58] sm:$0xff]  ;;  %v6233_v37 = vld [vmem:[%s8218_s16 + $0x60] sm:$0xff] }
  0xe6   :  { %8631 = vst [vmem:[#allocation192_spill] sm:$0xff] %v6223_v33  ;;  %8632 = vst [vmem:[#allocation193_spill] sm:$0xff] %v6228_v1  ;;  %v6238_v35 = vld [vmem:[%s8218_s16 + $0x68] sm:$0xff]  ;;  %v6243_v3 = vld [vmem:[%s8218_s16 + $0x70] sm:$0xff] }
  0xe7   :  { %8633 = vst [vmem:[#allocation194_spill] sm:$0xff] %v6233_v37  ;;  %8634 = vst [vmem:[#allocation195_spill] sm:$0xff] %v6238_v35  ;;  %v6248_v33 = vld [vmem:[%s8218_s16 + $0x78] sm:$0xff]  ;;  %v6253_v1 = vld [vmem:[%s8218_s16 + $0x80] sm:$0xff] }
  0xe8   :  { %8635 = vst [vmem:[#allocation196_spill] sm:$0xff] %v6243_v3  ;;  %8636 = vst [vmem:[#allocation197_spill] sm:$0xff] %v6248_v33  ;;  %v6258_v37 = vld [vmem:[%s8218_s16 + $0x88] sm:$0xff]  ;;  %v6263_v35 = vld [vmem:[%s8218_s16 + $0x90] sm:$0xff] }
  0xe9   :  { %8637 = vst [vmem:[#allocation198_spill] sm:$0xff] %v6253_v1  ;;  %8638 = vst [vmem:[#allocation199_spill] sm:$0xff] %v6258_v37  ;;  %v6268_v3 = vld [vmem:[%s8218_s16 + $0x98] sm:$0xff]  ;;  %v6273_v33 = vld [vmem:[%s8218_s16 + $0xa0] sm:$0xff] }
  0xea   :  { %8639 = vst [vmem:[#allocation200_spill] sm:$0xff] %v6263_v35  ;;  %8640 = vst [vmem:[#allocation201_spill] sm:$0xff] %v6268_v3  ;;  %v6278_v1 = vld [vmem:[%s8218_s16 + $0xa8] sm:$0xff]  ;;  %v6283_v37 = vld [vmem:[%s8218_s16 + $0xb0] sm:$0xff] }
  0xeb   :  { %8641 = vst [vmem:[#allocation202_spill] sm:$0xff] %v6273_v33  ;;  %8642 = vst [vmem:[#allocation203_spill] sm:$0xff] %v6278_v1  ;;  %v6288_v35 = vld [vmem:[%s8218_s16 + $0xb8] sm:$0xff]  ;;  %v6293_v3 = vld [vmem:[%s8218_s16 + $0xc0] sm:$0xff] }
  0xec   :  { %8643 = vst [vmem:[#allocation204_spill] sm:$0xff] %v6283_v37  ;;  %8644 = vst [vmem:[#allocation205_spill] sm:$0xff] %v6288_v35  ;;  %v6298_v33 = vld [vmem:[%s8218_s16 + $0xc8] sm:$0xff]  ;;  %v6303_v1 = vld [vmem:[%s8218_s16 + $0xd0] sm:$0xff] }
  0xed   :  { %8645 = vst [vmem:[#allocation206_spill] sm:$0xff] %v6293_v3  ;;  %8646 = vst [vmem:[#allocation207_spill] sm:$0xff] %v6298_v33  ;;  %v6308_v37 = vld [vmem:[%s8218_s16 + $0xd8] sm:$0xff]  ;;  %v6313_v35 = vld [vmem:[%s8218_s16 + $0xe0] sm:$0xff] }
  0xee   :  { %8647 = vst [vmem:[#allocation208_spill] sm:$0xff] %v6303_v1  ;;  %8648 = vst [vmem:[#allocation209_spill] sm:$0xff] %v6308_v37  ;;  %v6318_v3 = vld [vmem:[%s8218_s16 + $0xe8] sm:$0xff]  ;;  %v6323_v33 = vld [vmem:[%s8218_s16 + $0xf0] sm:$0xff] }
  0xef   :  { %8649 = vst [vmem:[#allocation210_spill] sm:$0xff] %v6313_v35  ;;  %8650 = vst [vmem:[#allocation211_spill] sm:$0xff] %v6318_v3  ;;  %v6328_v1 = vld [vmem:[%s8218_s16 + $0xf8] sm:$0xff]  ;;  %v6333_v37 = vld [vmem:[%s8218_s16 + $0x100] sm:$0xff] }
  0xf0   :  { %8651 = vst [vmem:[#allocation212_spill] sm:$0xff] %v6323_v33  ;;  %8652 = vst [vmem:[#allocation213_spill] sm:$0xff] %v6328_v1  ;;  %v6338_v35 = vld [vmem:[%s8218_s16 + $0x108] sm:$0xff]  ;;  %v6343_v3 = vld [vmem:[%s8218_s16 + $0x110] sm:$0xff] }
  0xf1   :  { %8653 = vst [vmem:[#allocation214_spill] sm:$0xff] %v6333_v37  ;;  %8654 = vst [vmem:[#allocation215_spill] sm:$0xff] %v6338_v35  ;;  %v6348_v33 = vld [vmem:[%s8218_s16 + $0x118] sm:$0xff]  ;;  %v6353_v1 = vld [vmem:[%s8218_s16 + $0x120] sm:$0xff] }
  0xf2   :  { %8655 = vst [vmem:[#allocation216_spill] sm:$0xff] %v6343_v3  ;;  %8656 = vst [vmem:[#allocation217_spill] sm:$0xff] %v6348_v33  ;;  %v6358_v37 = vld [vmem:[%s8218_s16 + $0x128] sm:$0xff]  ;;  %v6363_v35 = vld [vmem:[%s8218_s16 + $0x130] sm:$0xff] }
  0xf3   :  { %8657 = vst [vmem:[#allocation218_spill] sm:$0xff] %v6353_v1  ;;  %8658 = vst [vmem:[#allocation219_spill] sm:$0xff] %v6358_v37  ;;  %v6368_v3 = vld [vmem:[%s8218_s16 + $0x138] sm:$0xff]  ;;  %v6373_v33 = vld [vmem:[%s8218_s16 + $0x140] sm:$0xff] }
  0xf4   :  { %8659 = vst [vmem:[#allocation220_spill] sm:$0xff] %v6363_v35  ;;  %8660 = vst [vmem:[#allocation221_spill] sm:$0xff] %v6368_v3  ;;  %v6378_v1 = vld [vmem:[%s8218_s16 + $0x148] sm:$0xff]  ;;  %v6383_v37 = vld [vmem:[%s8218_s16 + $0x150] sm:$0xff] }
  0xf5   :  { %8661 = vst [vmem:[#allocation222_spill] sm:$0xff] %v6373_v33  ;;  %8662 = vst [vmem:[#allocation223_spill] sm:$0xff] %v6378_v1  ;;  %v6388_v35 = vld [vmem:[%s8218_s16 + $0x158] sm:$0xff]  ;;  %v6393_v3 = vld [vmem:[%s8218_s16 + $0x160] sm:$0xff] }
  0xf6   :  { %8663 = vst [vmem:[#allocation224_spill] sm:$0xff] %v6383_v37  ;;  %8664 = vst [vmem:[#allocation225_spill] sm:$0xff] %v6388_v35  ;;  %v6398_v33 = vld [vmem:[%s8218_s16 + $0x168] sm:$0xff]  ;;  %v6403_v1 = vld [vmem:[%s8218_s16 + $0x170] sm:$0xff] }
  0xf7   :  { %8665 = vst [vmem:[#allocation226_spill] sm:$0xff] %v6393_v3  ;;  %8666 = vst [vmem:[#allocation227_spill] sm:$0xff] %v6398_v33  ;;  %v6408_v37 = vld [vmem:[%s8218_s16 + $0x178] sm:$0xff]  ;;  %v6413_v35 = vld [vmem:[%s8218_s16 + $0x180] sm:$0xff] }
  0xf8   :  { %8667 = vst [vmem:[#allocation228_spill] sm:$0xff] %v6403_v1  ;;  %8668 = vst [vmem:[#allocation229_spill] sm:$0xff] %v6408_v37  ;;  %v6418_v3 = vld [vmem:[%s8218_s16 + $0x188] sm:$0xff]  ;;  %v6423_v33 = vld [vmem:[%s8218_s16 + $0x190] sm:$0xff] }
  0xf9   :  { %8669 = vst [vmem:[#allocation230_spill] sm:$0xff] %v6413_v35  ;;  %8670 = vst [vmem:[#allocation231_spill] sm:$0xff] %v6418_v3  ;;  %v6428_v1 = vld [vmem:[%s8218_s16 + $0x198] sm:$0xff]  ;;  %v6433_v37 = vld [vmem:[%s8218_s16 + $0x1a0] sm:$0xff] }
  0xfa   :  { %8671 = vst [vmem:[#allocation232_spill] sm:$0xff] %v6423_v33  ;;  %8672 = vst [vmem:[#allocation233_spill] sm:$0xff] %v6428_v1  ;;  %v6438_v35 = vld [vmem:[%s8218_s16 + $0x1a8] sm:$0xff]  ;;  %v6443_v3 = vld [vmem:[%s8218_s16 + $0x1b0] sm:$0xff] }
  0xfb   :  { %8673 = vst [vmem:[#allocation234_spill] sm:$0xff] %v6433_v37  ;;  %8674 = vst [vmem:[#allocation235_spill] sm:$0xff] %v6438_v35  ;;  %v6448_v33 = vld [vmem:[%s8218_s16 + $0x1b8] sm:$0xff]  ;;  %v6453_v1 = vld [vmem:[%s8218_s16 + $0x1c0] sm:$0xff] }
  0xfc   :  { %8675 = vst [vmem:[#allocation236_spill] sm:$0xff] %v6443_v3  ;;  %8676 = vst [vmem:[#allocation237_spill] sm:$0xff] %v6448_v33  ;;  %v6458_v37 = vld [vmem:[%s8218_s16 + $0x1c8] sm:$0xff]  ;;  %v6463_v35 = vld [vmem:[%s8218_s16 + $0x1d0] sm:$0xff] }
  0xfd   :  { %8677 = vst [vmem:[#allocation238_spill] sm:$0xff] %v6453_v1  ;;  %8678 = vst [vmem:[#allocation239_spill] sm:$0xff] %v6458_v37  ;;  %v6468_v3 = vld [vmem:[%s8218_s16 + $0x1d8] sm:$0xff]  ;;  %v6473_v33 = vld [vmem:[%s8218_s16 + $0x1e0] sm:$0xff] }
  0xfe   :  { %8679 = vst [vmem:[#allocation240_spill] sm:$0xff] %v6463_v35  ;;  %8680 = vst [vmem:[#allocation241_spill] sm:$0xff] %v6468_v3  ;;  %v6478_v1 = vld [vmem:[%s8218_s16 + $0x1e8] sm:$0xff]  ;;  %v6483_v37 = vld [vmem:[%s8218_s16 + $0x1f0] sm:$0xff] }
  0xff   :  { %8681 = vst [vmem:[#allocation242_spill] sm:$0xff] %v6473_v33  ;;  %8682 = vst [vmem:[#allocation243_spill] sm:$0xff] %v6478_v1  ;;  %v6488_v35 = vld [vmem:[%s8218_s16 + $0x1f8] sm:$0xff]  ;;  %v6493_v3 = vld [vmem:[%s8218_s16 + $0x200] sm:$0xff] }
 0x100   :  { %8683 = vst [vmem:[#allocation244_spill] sm:$0xff] %v6483_v37  ;;  %8684 = vst [vmem:[#allocation245_spill] sm:$0xff] %v6488_v35  ;;  %v6498_v33 = vld [vmem:[%s8218_s16 + $0x208] sm:$0xff]  ;;  %v6503_v1 = vld [vmem:[%s8218_s16 + $0x210] sm:$0xff] }
 0x101   :  { %8685 = vst [vmem:[#allocation246_spill] sm:$0xff] %v6493_v3  ;;  %8686 = vst [vmem:[#allocation247_spill] sm:$0xff] %v6498_v33  ;;  %v6508_v37 = vld [vmem:[%s8218_s16 + $0x218] sm:$0xff]  ;;  %v6513_v35 = vld [vmem:[%s8218_s16 + $0x220] sm:$0xff] }
 0x102   :  { %8687 = vst [vmem:[#allocation248_spill] sm:$0xff] %v6503_v1  ;;  %8688 = vst [vmem:[#allocation249_spill] sm:$0xff] %v6508_v37  ;;  %v6518_v3 = vld [vmem:[%s8218_s16 + $0x228] sm:$0xff]  ;;  %v6523_v33 = vld [vmem:[%s8218_s16 + $0x230] sm:$0xff] }
 0x103   :  { %8689 = vst [vmem:[#allocation250_spill] sm:$0xff] %v6513_v35  ;;  %8690 = vst [vmem:[#allocation251_spill] sm:$0xff] %v6518_v3  ;;  %v6528_v1 = vld [vmem:[%s8218_s16 + $0x238] sm:$0xff]  ;;  %v6533_v37 = vld [vmem:[%s8218_s16 + $0x240] sm:$0xff] }
 0x104   :  { %8691 = vst [vmem:[#allocation252_spill] sm:$0xff] %v6523_v33  ;;  %8692 = vst [vmem:[#allocation253_spill] sm:$0xff] %v6528_v1  ;;  %v6538_v35 = vld [vmem:[%s8218_s16 + $0x248] sm:$0xff]  ;;  %v6543_v3 = vld [vmem:[%s8218_s16 + $0x250] sm:$0xff] }
 0x105   :  { %8693 = vst [vmem:[#allocation254_spill] sm:$0xff] %v6533_v37  ;;  %8694 = vst [vmem:[#allocation255_spill] sm:$0xff] %v6538_v35  ;;  %v6548_v33 = vld [vmem:[%s8218_s16 + $0x258] sm:$0xff]  ;;  %v6553_v1 = vld [vmem:[%s8218_s16 + $0x260] sm:$0xff] }
 0x106   :  { %8695 = vst [vmem:[#allocation256_spill] sm:$0xff] %v6543_v3  ;;  %8696 = vst [vmem:[#allocation257_spill] sm:$0xff] %v6548_v33  ;;  %v6558_v37 = vld [vmem:[%s8218_s16 + $0x268] sm:$0xff]  ;;  %v6563_v35 = vld [vmem:[%s8218_s16 + $0x270] sm:$0xff] }
 0x107   :  { %8697 = vst [vmem:[#allocation258_spill] sm:$0xff] %v6553_v1  ;;  %8698 = vst [vmem:[#allocation259_spill] sm:$0xff] %v6558_v37  ;;  %v6568_v3 = vld [vmem:[%s8218_s16 + $0x278] sm:$0xff]  ;;  %v6573_v33 = vld [vmem:[%s8218_s16 + $0x280] sm:$0xff] }
 0x108   :  { %8699 = vst [vmem:[#allocation260_spill] sm:$0xff] %v6563_v35  ;;  %8700 = vst [vmem:[#allocation261_spill] sm:$0xff] %v6568_v3  ;;  %v6578_v1 = vld [vmem:[%s8218_s16 + $0x288] sm:$0xff]  ;;  %v6583_v37 = vld [vmem:[%s8218_s16 + $0x290] sm:$0xff] }
 0x109   :  { %8701 = vst [vmem:[#allocation262_spill] sm:$0xff] %v6573_v33  ;;  %8702 = vst [vmem:[#allocation263_spill] sm:$0xff] %v6578_v1  ;;  %v6588_v35 = vld [vmem:[%s8218_s16 + $0x298] sm:$0xff]  ;;  %v6593_v3 = vld [vmem:[%s8218_s16 + $0x2a0] sm:$0xff] }
 0x10a   :  { %8703 = vst [vmem:[#allocation264_spill] sm:$0xff] %v6583_v37  ;;  %8704 = vst [vmem:[#allocation265_spill] sm:$0xff] %v6588_v35  ;;  %v6598_v33 = vld [vmem:[%s8218_s16 + $0x2a8] sm:$0xff]  ;;  %v6603_v1 = vld [vmem:[%s8218_s16 + $0x2b0] sm:$0xff] }
 0x10b   :  { %8705 = vst [vmem:[#allocation266_spill] sm:$0xff] %v6593_v3  ;;  %8706 = vst [vmem:[#allocation267_spill] sm:$0xff] %v6598_v33  ;;  %v6608_v37 = vld [vmem:[%s8218_s16 + $0x2b8] sm:$0xff]  ;;  %v6613_v35 = vld [vmem:[%s8218_s16 + $0x2c0] sm:$0xff] }
 0x10c   :  { %8707 = vst [vmem:[#allocation268_spill] sm:$0xff] %v6603_v1  ;;  %8708 = vst [vmem:[#allocation269_spill] sm:$0xff] %v6608_v37  ;;  %v6618_v3 = vld [vmem:[%s8218_s16 + $0x2c8] sm:$0xff]  ;;  %v6623_v33 = vld [vmem:[%s8218_s16 + $0x2d0] sm:$0xff] }
 0x10d   :  { %8709 = vst [vmem:[#allocation270_spill] sm:$0xff] %v6613_v35  ;;  %8710 = vst [vmem:[#allocation271_spill] sm:$0xff] %v6618_v3  ;;  %v6628_v1 = vld [vmem:[%s8218_s16 + $0x2d8] sm:$0xff]  ;;  %v6633_v37 = vld [vmem:[%s8218_s16 + $0x2e0] sm:$0xff] }
 0x10e   :  { %8711 = vst [vmem:[#allocation272_spill] sm:$0xff] %v6623_v33  ;;  %8712 = vst [vmem:[#allocation273_spill] sm:$0xff] %v6628_v1  ;;  %v6638_v35 = vld [vmem:[%s8218_s16 + $0x2e8] sm:$0xff]  ;;  %v6643_v3 = vld [vmem:[%s8218_s16 + $0x2f0] sm:$0xff] }
 0x10f   :  { %8713 = vst [vmem:[#allocation274_spill] sm:$0xff] %v6633_v37  ;;  %8714 = vst [vmem:[#allocation275_spill] sm:$0xff] %v6638_v35  ;;  %v6648_v33 = vld [vmem:[%s8218_s16 + $0x2f8] sm:$0xff]  ;;  %v6653_v1 = vld [vmem:[%s8218_s16 + $0x300] sm:$0xff] }
 0x110   :  { %8715 = vst [vmem:[#allocation276_spill] sm:$0xff] %v6643_v3  ;;  %8716 = vst [vmem:[#allocation277_spill] sm:$0xff] %v6648_v33  ;;  %v6658_v37 = vld [vmem:[%s8218_s16 + $0x308] sm:$0xff]  ;;  %v6663_v35 = vld [vmem:[%s8218_s16 + $0x310] sm:$0xff] }
 0x111   :  { %8717 = vst [vmem:[#allocation278_spill] sm:$0xff] %v6653_v1  ;;  %8718 = vst [vmem:[#allocation279_spill] sm:$0xff] %v6658_v37  ;;  %v6668_v3 = vld [vmem:[%s8218_s16 + $0x318] sm:$0xff]  ;;  %v6673_v33 = vld [vmem:[%s8218_s16 + $0x320] sm:$0xff] }
 0x112   :  { %8719 = vst [vmem:[#allocation280_spill] sm:$0xff] %v6663_v35  ;;  %8720 = vst [vmem:[#allocation281_spill] sm:$0xff] %v6668_v3  ;;  %v6678_v1 = vld [vmem:[%s8218_s16 + $0x328] sm:$0xff]  ;;  %v6683_v37 = vld [vmem:[%s8218_s16 + $0x330] sm:$0xff] }
 0x113   :  { %8721 = vst [vmem:[#allocation282_spill] sm:$0xff] %v6673_v33  ;;  %8722 = vst [vmem:[#allocation283_spill] sm:$0xff] %v6678_v1  ;;  %v6688_v35 = vld [vmem:[%s8218_s16 + $0x338] sm:$0xff]  ;;  %v6693_v3 = vld [vmem:[%s8218_s16 + $0x340] sm:$0xff] }
 0x114   :  { %8723 = vst [vmem:[#allocation284_spill] sm:$0xff] %v6683_v37  ;;  %8724 = vst [vmem:[#allocation285_spill] sm:$0xff] %v6688_v35  ;;  %v6698_v33 = vld [vmem:[%s8218_s16 + $0x348] sm:$0xff]  ;;  %v6703_v1 = vld [vmem:[%s8218_s16 + $0x350] sm:$0xff] }
 0x115   :  { %8725 = vst [vmem:[#allocation286_spill] sm:$0xff] %v6693_v3  ;;  %8726 = vst [vmem:[#allocation287_spill] sm:$0xff] %v6698_v33  ;;  %v6708_v37 = vld [vmem:[%s8218_s16 + $0x358] sm:$0xff]  ;;  %v6713_v35 = vld [vmem:[%s8218_s16 + $0x360] sm:$0xff] }
 0x116   :  { %8727 = vst [vmem:[#allocation288_spill] sm:$0xff] %v6703_v1  ;;  %8728 = vst [vmem:[#allocation289_spill] sm:$0xff] %v6708_v37  ;;  %v6718_v3 = vld [vmem:[%s8218_s16 + $0x368] sm:$0xff]  ;;  %v6723_v33 = vld [vmem:[%s8218_s16 + $0x370] sm:$0xff] }
 0x117   :  { %8729 = vst [vmem:[#allocation290_spill] sm:$0xff] %v6713_v35  ;;  %8730 = vst [vmem:[#allocation291_spill] sm:$0xff] %v6718_v3  ;;  %v6728_v1 = vld [vmem:[%s8218_s16 + $0x378] sm:$0xff]  ;;  %v6733_v37 = vld [vmem:[%s8218_s16 + $0x380] sm:$0xff] }
 0x118   :  { %8731 = vst [vmem:[#allocation292_spill] sm:$0xff] %v6723_v33  ;;  %8732 = vst [vmem:[#allocation293_spill] sm:$0xff] %v6728_v1  ;;  %v6738_v35 = vld [vmem:[%s8218_s16 + $0x388] sm:$0xff]  ;;  %v6743_v3 = vld [vmem:[%s8218_s16 + $0x390] sm:$0xff] }
 0x119   :  { %8733 = vst [vmem:[#allocation294_spill] sm:$0xff] %v6733_v37  ;;  %8734 = vst [vmem:[#allocation295_spill] sm:$0xff] %v6738_v35  ;;  %v6748_v33 = vld [vmem:[%s8218_s16 + $0x398] sm:$0xff]  ;;  %v6753_v1 = vld [vmem:[%s8218_s16 + $0x3a0] sm:$0xff] }
 0x11a   :  { %8735 = vst [vmem:[#allocation296_spill] sm:$0xff] %v6743_v3  ;;  %8736 = vst [vmem:[#allocation297_spill] sm:$0xff] %v6748_v33  ;;  %v6758_v37 = vld [vmem:[%s8218_s16 + $0x3a8] sm:$0xff]  ;;  %v6763_v35 = vld [vmem:[%s8218_s16 + $0x3b0] sm:$0xff] }
 0x11b   :  { %8737 = vst [vmem:[#allocation298_spill] sm:$0xff] %v6753_v1  ;;  %8738 = vst [vmem:[#allocation299_spill] sm:$0xff] %v6758_v37  ;;  %v6768_v3 = vld [vmem:[%s8218_s16 + $0x3b8] sm:$0xff]  ;;  %v6773_v33 = vld [vmem:[%s8218_s16 + $0x3c0] sm:$0xff] }
 0x11c   :  { %8739 = vst [vmem:[#allocation300_spill] sm:$0xff] %v6763_v35  ;;  %8740 = vst [vmem:[#allocation301_spill] sm:$0xff] %v6768_v3  ;;  %v6778_v1 = vld [vmem:[%s8218_s16 + $0x3c8] sm:$0xff]  ;;  %v6783_v37 = vld [vmem:[%s8218_s16 + $0x3d0] sm:$0xff] }
 0x11d   :  { %8741 = vst [vmem:[#allocation302_spill] sm:$0xff] %v6773_v33  ;;  %8742 = vst [vmem:[#allocation303_spill] sm:$0xff] %v6778_v1  ;;  %v6788_v35 = vld [vmem:[%s8218_s16 + $0x3d8] sm:$0xff]  ;;  %v6793_v3 = vld [vmem:[%s8218_s16 + $0x3e0] sm:$0xff] }
 0x11e   :  { %8743 = vst [vmem:[#allocation304_spill] sm:$0xff] %v6783_v37  ;;  %8744 = vst [vmem:[#allocation305_spill] sm:$0xff] %v6788_v35  ;;  %v6798_v33 = vld [vmem:[%s8218_s16 + $0x3e8] sm:$0xff]  ;;  %v6803_v1 = vld [vmem:[%s8218_s16 + $0x3f0] sm:$0xff] }
 0x11f   :  { %8745 = vst [vmem:[#allocation306_spill] sm:$0xff] %v6793_v3  ;;  %8746 = vst [vmem:[#allocation307_spill] sm:$0xff] %v6798_v33  ;;  %v6808_v37 = vld [vmem:[%s8218_s16 + $0x3f8] sm:$0xff] }
 0x120   :  { %8747 = vst [vmem:[#allocation308_spill] sm:$0xff] %v6803_v1  ;;  %8748 = vst [vmem:[#allocation309_spill] sm:$0xff] %v6808_v37 }
 0x121   :  { %839 = vsyncadd [#allocation9 + $0x3], 16384  ;;  %v874_v35 = vld [vmem:[%s8219_s17] sm:$0xff]  ;;  %v876_v3 = vld [vmem:[%s8219_s17 + $0x8] sm:$0xff] }
 0x122   :  { %875 = vst [vmem:[#allocation6] sm:$0xff] %v874_v35  ;;  %877 = vst [vmem:[#allocation6 + $0x8] sm:$0xff] %v876_v3  ;;  %v878_v33 = vld [vmem:[%s8219_s17 + $0x10] sm:$0xff]  ;;  %v880_v1 = vld [vmem:[%s8219_s17 + $0x18] sm:$0xff] }
 0x123   :  { %v882_v37 = vld [vmem:[%s8219_s17 + $0x20] sm:$0xff]  ;;  %879 = vst [vmem:[#allocation6 + $0x10] sm:$0xff] %v878_v33  ;;  %881 = vst [vmem:[#allocation6 + $0x18] sm:$0xff] %v880_v1  ;;  %v884_v35 = vld [vmem:[%s8219_s17 + $0x28] sm:$0xff] }
 0x124   :  { %883 = vst [vmem:[#allocation6 + $0x20] sm:$0xff] %v882_v37  ;;  %v886_v3 = vld [vmem:[%s8219_s17 + $0x30] sm:$0xff]  ;;  %v888_v39 = vld [vmem:[%s8219_s17 + $0x38] sm:$0xff]  ;;  %885 = vst [vmem:[#allocation6 + $0x28] sm:$0xff] %v884_v35 }
 0x125   :  { %887 = vst [vmem:[#allocation6 + $0x30] sm:$0xff] %v886_v3  ;;  %889 = vst [vmem:[#allocation6 + $0x38] sm:$0xff] %v888_v39  ;;  %v890_v1 = vld [vmem:[%s8219_s17 + $0x40] sm:$0xff]  ;;  %v892_v33 = vld [vmem:[%s8219_s17 + $0x48] sm:$0xff] }
 0x126   :  { %v894_v37 = vld [vmem:[%s8219_s17 + $0x50] sm:$0xff]  ;;  %891 = vst [vmem:[#allocation6 + $0x40] sm:$0xff] %v890_v1  ;;  %893 = vst [vmem:[#allocation6 + $0x48] sm:$0xff] %v892_v33  ;;  %v896_v35 = vld [vmem:[%s8219_s17 + $0x58] sm:$0xff] }
 0x127   :  { %895 = vst [vmem:[#allocation6 + $0x50] sm:$0xff] %v894_v37  ;;  %v898_v39 = vld [vmem:[%s8219_s17 + $0x60] sm:$0xff]  ;;  %v900_v3 = vld [vmem:[%s8219_s17 + $0x68] sm:$0xff]  ;;  %897 = vst [vmem:[#allocation6 + $0x58] sm:$0xff] %v896_v35 }
 0x128   :  { %899 = vst [vmem:[#allocation6 + $0x60] sm:$0xff] %v898_v39  ;;  %901 = vst [vmem:[#allocation6 + $0x68] sm:$0xff] %v900_v3  ;;  %v902_v1 = vld [vmem:[%s8219_s17 + $0x70] sm:$0xff]  ;;  %v904_v33 = vld [vmem:[%s8219_s17 + $0x78] sm:$0xff] }
 0x129   :  { %903 = vst [vmem:[#allocation6 + $0x70] sm:$0xff] %v902_v1  ;;  %905 = vst [vmem:[#allocation6 + $0x78] sm:$0xff] %v904_v33 }
 0x12a   :  { %913 = vsyncadd [#allocation9 + $0x4], 2048  ;;  %v960_v37 = vld [vmem:[%s8221_s19] sm:$0xff]  ;;  %v962_v35 = vld [vmem:[%s8221_s19 + $0x8] sm:$0xff]  ;;  %s5383_s8 = smov [#allocation7]  }
 0x12b   :  { %s922_s1 = sshll.u32 %s5383_s8, 4  ;;  %961 = vst [vmem:[#allocation8] sm:$0xff] %v960_v37  ;;  %963 = vst [vmem:[#allocation8 + $0x8] sm:$0xff] %v962_v35  ;;  %v964_v39 = vld [vmem:[%s8221_s19 + $0x10] sm:$0xff]  ;;  %v966_v3 = vld [vmem:[%s8221_s19 + $0x18] sm:$0xff]  ;;  %s923_s1 = int_to_ptr.vmem [resolvable:$true] %s922_s1 }
 0x12c   :  { %v968_v1 = vld [vmem:[%s8221_s19 + $0x20] sm:$0xff]  ;;  %965 = vst [vmem:[#allocation8 + $0x10] sm:$0xff] %v964_v39  ;;  %967 = vst [vmem:[#allocation8 + $0x18] sm:$0xff] %v966_v3  ;;  %v970_v33 = vld [vmem:[%s8221_s19 + $0x28] sm:$0xff]  ;;  %s5330_s28 = scalar_lea.vmem %s923_s1, 2048  ;;  %p5335_p10 = scmp.lt.s32.totalorder %s923_s1, %s923_s1 }
 0x12d   :  { %969 = vst [vmem:[#allocation8 + $0x20] sm:$0xff] %v968_v1  ;;  %v972_v37 = vld [vmem:[%s8221_s19 + $0x30] sm:$0xff]  ;;  %v974_v35 = vld [vmem:[%s8221_s19 + $0x38] sm:$0xff]  ;;  %p5331_p9 = scmp.ne.s32.totalorder %s923_s1, %s5330_s28  ;;  %p5336_p11 = scmp.lt.s32.totalorder %s5330_s28, %s5330_s28 }
 0x12f   :  { %p5337_p12 = por %p5336_p11, %p5335_p10 }
 0x131   :  { %p5338_p13 = pnand %p5337_p12, %p5331_p9 }
 0x133   :  { %5341 = shalt.err (!%p5338_p13)  }
 0x134   :  { %925 = dma.hbm_to_vmem [thread:$0]  %s8220_s18, 2048, %s923_s1, [#allocation9 + $0x5]  ;;  %971 = vst [vmem:[#allocation8 + $0x28] sm:$0xff] %v970_v33  ;;  %973 = vst [vmem:[#allocation8 + $0x30] sm:$0xff] %v972_v37 }
 0x135   :  { %975 = vst [vmem:[#allocation8 + $0x38] sm:$0xff] %v974_v35  ;;  %s8749_s6 = sld [smem:[#allocation314_spill]] }
 0x13b   :  { %v984_v39 = vld [vmem:[%s8749_s6] sm:$0xff]  ;;  %v985_v3 = vld [vmem:[%s8749_s6 + $0x8] sm:$0xff]  ;;  %v986_v1 = vld [vmem:[%s8749_s6 + $0x10] sm:$0xff] }
 0x13c   :  { %v987_v5 = vld [vmem:[%s8749_s6 + $0x18] sm:$0xff]  ;;  %v988_v33 = vld [vmem:[%s8749_s6 + $0x20] sm:$0xff]  ;;  %v989_v37 = vld [vmem:[%s8749_s6 + $0x28] sm:$0xff]  ;;  %v990_v35 = vunpack.c.0.s8 %v984_v39  ;;  %v991_v7 = vunpack.c.0.s8 %v985_v3  ;;  %v992_v41 = vunpack.c.0.s8 %v986_v1  ;;  %v996_v45 = vunpack.c.1.s8 %v984_v39 }
 0x13d   :  { %v993_v43 = vunpack.c.0.s8 %v987_v5  ;;  %v994_v9 = vunpack.c.0.s8 %v988_v33  ;;  %v995_v11 = vunpack.c.0.s8 %v989_v37  ;;  %v997_v47 = vunpack.c.1.s8 %v985_v3 }
 0x13e   :  { %v998_v13 = vunpack.c.1.s8 %v986_v1  ;;  %v999_v15 = vunpack.c.1.s8 %v987_v5  ;;  %v1000_v49 = vunpack.c.1.s8 %v988_v33  ;;  %v1001_v51 = vunpack.c.1.s8 %v989_v37 }
 0x13f   :  { %v1002_v17 = vunpack.c.2.s8 %v984_v39  ;;  %v1003_v19 = vunpack.c.2.s8 %v985_v3  ;;  %v1004_v53 = vunpack.c.2.s8 %v986_v1  ;;  %v1005_v55 = vunpack.c.2.s8 %v987_v5 }
 0x140   :  { %v1006_v21 = vunpack.c.2.s8 %v988_v33  ;;  %v1007_v23 = vunpack.c.2.s8 %v989_v37  ;;  %v1008_v57 = vunpack.c.3.s8 %v984_v39  ;;  %v1009_v59 = vunpack.c.3.s8 %v985_v3 }
 0x141   :  { %v1010_v25 = vunpack.c.3.s8 %v986_v1  ;;  %v1011_v27 = vunpack.c.3.s8 %v987_v5  ;;  %v1012_v61 = vunpack.c.3.s8 %v988_v33  ;;  %v1013_v63 = vunpack.c.3.s8 %v989_v37  ;;  %v1086_v37 = vld [vmem:[%s8749_s6 + $0x30] sm:$0xff]  ;;  %v1088_v33 = vld [vmem:[%s8749_s6 + $0x40] sm:$0xff] }
 0x142   :  { %v6903_v29 = vand.u32 255, %v990_v35  ;;  %v6905_v31 = vand.u32 255, %v991_v7  ;;  %v6907_v32 = vand.u32 255, %v992_v41  ;;  %v6909_v34 = vand.u32 255, %v993_v43 }
 0x143   :  { %v6911_v0 = vand.u32 255, %v994_v9  ;;  %v6913_v2 = vand.u32 255, %v995_v11  ;;  %v6915_v36 = vand.u32 255, %v996_v45  ;;  %v6917_v39 = vand.u32 255, %v997_v47 }
 0x144   :  { %v6919_v3 = vand.u32 255, %v998_v13  ;;  %v6921_v5 = vand.u32 255, %v999_v15  ;;  %v6923_v1 = vand.u32 255, %v1000_v49  ;;  %v6925_v7 = vand.u32 255, %v1001_v51 }
 0x145   :  { %v6927_v41 = vand.u32 255, %v1002_v17  ;;  %v6929_v43 = vand.u32 255, %v1003_v19  ;;  %v6931_v9 = vand.u32 255, %v1004_v53  ;;  %v6933_v11 = vand.u32 255, %v1005_v55 }
 0x146   :  { %v6935_v45 = vand.u32 255, %v1006_v21  ;;  %v6937_v47 = vand.u32 255, %v1007_v23  ;;  %v6939_v13 = vand.u32 255, %v1008_v57  ;;  %v6941_v15 = vand.u32 255, %v1009_v59 }
 0x147   :  { %v6943_v49 = vand.u32 255, %v1010_v25  ;;  %v6945_v51 = vand.u32 255, %v1011_v27  ;;  %v6947_v17 = vand.u32 255, %v1012_v61  ;;  %v6949_v19 = vand.u32 255, %v1013_v63  ;;  %v1087_v61 = vld [vmem:[%s8749_s6 + $0x38] sm:$0xff] }
 0x149   :  { %8750 = vst [vmem:[#allocation310_spill] sm:$0xff] %v6943_v49  ;;  %8751 = vst [vmem:[#allocation311_spill] sm:$0xff] %v6945_v51 }
 0x14a   :  { %8752 = vst [vmem:[#allocation312_spill] sm:$0xff] %v6947_v17  ;;  %8753 = vst [vmem:[#allocation313_spill] sm:$0xff] %v6949_v19 }
 0x14b   :  { %983 = vsyncadd [#allocation9 + $0x6], 1024  ;;  %v1089_v25 = vld [vmem:[%s8749_s6 + $0x48] sm:$0xff]  ;;  %v1090_v59 = vld [vmem:[%s8749_s6 + $0x50] sm:$0xff]  ;;  %v1092_v55 = vunpack.c.0.s8 %v1086_v37  ;;  %v1093_v53 = vunpack.c.0.s8 %v1087_v61  ;;  %v1094_v38 = vunpack.c.0.s8 %v1088_v33  ;;  %v1098_v42 = vunpack.c.1.s8 %v1086_v37 }
 0x14c   :  { %v1091_v23 = vld [vmem:[%s8749_s6 + $0x58] sm:$0xff]  ;;  %v1095_v4 = vunpack.c.0.s8 %v1089_v25  ;;  %v1096_v6 = vunpack.c.0.s8 %v1090_v59  ;;  %v1099_v8 = vunpack.c.1.s8 %v1087_v61  ;;  %v1100_v10 = vunpack.c.1.s8 %v1088_v33 }
 0x14d   :  { %v1097_v40 = vunpack.c.0.s8 %v1091_v23  ;;  %v1101_v44 = vunpack.c.1.s8 %v1089_v25  ;;  %v1102_v46 = vunpack.c.1.s8 %v1090_v59  ;;  %v1103_v63 = vunpack.c.1.s8 %v1091_v23 }
 0x14e   :  { %v1104_v12 = vunpack.c.2.s8 %v1086_v37  ;;  %v1105_v27 = vunpack.c.2.s8 %v1087_v61  ;;  %v1106_v14 = vunpack.c.2.s8 %v1088_v33  ;;  %v1107_v35 = vunpack.c.2.s8 %v1089_v25 }
 0x14f   :  { %v1108_v48 = vunpack.c.2.s8 %v1090_v59  ;;  %v1109_v57 = vunpack.c.2.s8 %v1091_v23  ;;  %v1110_v50 = vunpack.c.3.s8 %v1086_v37  ;;  %v1111_v21 = vunpack.c.3.s8 %v1087_v61 }
 0x150   :  { %v1112_v16 = vunpack.c.3.s8 %v1088_v33  ;;  %v1113_v18 = vunpack.c.3.s8 %v1089_v25  ;;  %v1114_v52 = vunpack.c.3.s8 %v1090_v59  ;;  %v1115_v54 = vunpack.c.3.s8 %v1091_v23 }
 0x151   :  { %v1116_v20 = vand.u32 255, %v1092_v55  ;;  %v1117_v22 = vand.u32 255, %v1093_v53  ;;  %v1118_v56 = vand.u32 255, %v1094_v38  ;;  %v1119_v58 = vand.u32 255, %v1095_v4 }
 0x152   :  { %v1120_v24 = vand.u32 255, %v1096_v6  ;;  %v1121_v26 = vand.u32 255, %v1097_v40  ;;  %v1122_v60 = vand.u32 255, %v1098_v42  ;;  %v1123_v62 = vand.u32 255, %v1099_v8 }
 0x153   :  { %v1124_v28 = vand.u32 255, %v1100_v10  ;;  %v1125_v30 = vand.u32 255, %v1101_v44  ;;  %v1126_v19 = vand.u32 255, %v1102_v46  ;;  %v1127_v17 = vand.u32 255, %v1103_v63 }
 0x154   :  { %v1128_v51 = vand.u32 255, %v1104_v12  ;;  %v1129_v49 = vand.u32 255, %v1105_v27  ;;  %v1130_v37 = vand.u32 255, %v1106_v14  ;;  %v1131_v61 = vand.u32 255, %v1107_v35 }
 0x155   :  { %v1132_v33 = vand.u32 255, %v1108_v48  ;;  %v1133_v25 = vand.u32 255, %v1109_v57  ;;  %v1134_v59 = vand.u32 255, %v1110_v50  ;;  %v1135_v23 = vand.u32 255, %v1111_v21 }
 0x156   :  { %v1136_v55 = vand.u32 255, %v1112_v16  ;;  %v1137_v53 = vand.u32 255, %v1113_v18  ;;  %v1138_v38 = vand.u32 255, %v1114_v52  ;;  %v1139_v4 = vand.u32 255, %v1115_v54 }
 0x157   :  { %v1140_v6 = vcvt.s32.f32 %v1116_v20  ;;  %v1141_v40 = vcvt.s32.f32 %v1117_v22  ;;  %v1142_v42 = vcvt.s32.f32 %v1118_v56  ;;  %v1143_v8 = vcvt.s32.f32 %v1119_v58 }
 0x158   :  { %v1144_v10 = vcvt.s32.f32 %v1120_v24  ;;  %v1145_v44 = vcvt.s32.f32 %v1121_v26  ;;  %v1146_v46 = vcvt.s32.f32 %v1122_v60  ;;  %v1147_v63 = vcvt.s32.f32 %v1123_v62 }
 0x159   :  { %v1148_v12 = vcvt.s32.f32 %v1124_v28  ;;  %v1149_v27 = vcvt.s32.f32 %v1125_v30  ;;  %v1150_v14 = vcvt.s32.f32 %v1126_v19  ;;  %v1151_v35 = vcvt.s32.f32 %v1127_v17 }
 0x15a   :  { %v1152_v48 = vcvt.s32.f32 %v1128_v51  ;;  %v1153_v57 = vcvt.s32.f32 %v1129_v49  ;;  %v1154_v50 = vcvt.s32.f32 %v1130_v37  ;;  %v1155_v21 = vcvt.s32.f32 %v1131_v61 }
 0x15b   :  { %v1156_v16 = vcvt.s32.f32 %v1132_v33  ;;  %v1157_v18 = vcvt.s32.f32 %v1133_v25  ;;  %v1158_v52 = vcvt.s32.f32 %v1134_v59  ;;  %v1159_v54 = vcvt.s32.f32 %v1135_v23 }
 0x15c   :  { %v1160_v20 = vcvt.s32.f32 %v1136_v55  ;;  %v1161_v22 = vcvt.s32.f32 %v1137_v53  ;;  %v1162_v56 = vcvt.s32.f32 %v1138_v38  ;;  %v1163_v58 = vcvt.s32.f32 %v1139_v4 }
 0x15d   :  { %v8754_v24 = vcvt.s32.f32 %v6903_v29  ;;  %v8755_v28 = vcvt.s32.f32 %v6905_v31  ;;  %v8756_v60 = vcvt.s32.f32 %v6907_v32  ;;  %v8757_v49 = vcvt.s32.f32 %v6909_v34 }
 0x15e   :  { %v8758_v17 = vcvt.s32.f32 %v6911_v0  ;;  %v8759_v29 = vcvt.s32.f32 %v6913_v2  ;;  %v8760_v31 = vcvt.s32.f32 %v6915_v36  ;;  %v8761_v32 = vcvt.s32.f32 %v6917_v39 }
 0x15f   :  { %v6995_v26 = vadd.f32 %v1140_v6, %v8754_v24  ;;  %v6999_v30 = vadd.f32 %v1141_v40, %v8755_v28  ;;  %v7003_v62 = vadd.f32 %v1142_v42, %v8756_v60  ;;  %v7007_v51 = vadd.f32 %v1143_v8, %v8757_v49 }
 0x160   :  { %v7011_v19 = vadd.f32 %v1144_v10, %v8758_v17  ;;  %v7015_v37 = vadd.f32 %v1145_v44, %v8759_v29  ;;  %v7019_v61 = vadd.f32 %v1146_v46, %v8760_v31  ;;  %v7023_v33 = vadd.f32 %v1147_v63, %v8761_v32  ;;  %v1191_v46 = vld [vmem:[%s8749_s6 + $0x78] sm:$0xff] }
 0x161   :  { %v8762_v34 = vcvt.s32.f32 %v6919_v3  ;;  %v8763_v0 = vcvt.s32.f32 %v6921_v5  ;;  %v8764_v2 = vcvt.s32.f32 %v6923_v1  ;;  %v8765_v36 = vcvt.s32.f32 %v6925_v7  ;;  %v1188_v1 = vld [vmem:[%s8749_s6 + $0x60] sm:$0xff]  ;;  %v1189_v7 = vld [vmem:[%s8749_s6 + $0x68] sm:$0xff] }
 0x162   :  { %v8766_v39 = vcvt.s32.f32 %v6927_v41  ;;  %v8767_v3 = vcvt.s32.f32 %v6929_v43  ;;  %v8768_v5 = vcvt.s32.f32 %v6931_v9  ;;  %v1190_v41 = vld [vmem:[%s8749_s6 + $0x70] sm:$0xff]  ;;  %v8769_v43 = vcvt.s32.f32 %v6933_v11  ;;  %v1192_v11 = vld [vmem:[%s8749_s6 + $0x80] sm:$0xff] }
 0x163   :  { %v7027_v25 = vadd.f32 %v1148_v12, %v8762_v34  ;;  %v7031_v59 = vadd.f32 %v1149_v27, %v8763_v0  ;;  %v7035_v23 = vadd.f32 %v1150_v14, %v8764_v2  ;;  %v7039_v55 = vadd.f32 %v1151_v35, %v8765_v36  ;;  %v8774_v12 = vld [vmem:[#allocation310_spill] sm:$0xff]  ;;  %v8777_v14 = vld [vmem:[#allocation311_spill] sm:$0xff] }
 0x164   :  { %v7043_v53 = vadd.f32 %v1152_v48, %v8766_v39  ;;  %v7047_v38 = vadd.f32 %v1153_v57, %v8767_v3  ;;  %v7051_v4 = vadd.f32 %v1154_v50, %v8768_v5  ;;  %v7064_v6 = vadd.f32 %v1155_v21, %v8769_v43  ;;  %v8780_v57 = vld [vmem:[#allocation312_spill] sm:$0xff] }
 0x165   :  { %v8770_v9 = vcvt.s32.f32 %v6935_v45  ;;  %v8771_v42 = vcvt.s32.f32 %v6937_v47  ;;  %v8772_v10 = vcvt.s32.f32 %v6939_v13  ;;  %v1193_v45 = vld [vmem:[%s8749_s6 + $0x88] sm:$0xff]  ;;  %v8773_v47 = vcvt.s32.f32 %v6941_v15 }
 0x166   :  { %v8775_v13 = vcvt.s32.f32 %v8774_v12  ;;  %v8778_v35 = vcvt.s32.f32 %v8777_v14  ;;  %v8781_v50 = vcvt.s32.f32 %v8780_v57  ;;  %v1194_v24 = vunpack.c.0.s8 %v1188_v1 }
 0x167   :  { %v7068_v40 = vadd.f32 %v1156_v16, %v8770_v9  ;;  %v7072_v8 = vadd.f32 %v1157_v18, %v8771_v42  ;;  %v7076_v44 = vadd.f32 %v1158_v52, %v8772_v10  ;;  %v7089_v63 = vadd.f32 %v1159_v54, %v8773_v47  ;;  %v8783_v16 = vld [vmem:[#allocation313_spill] sm:$0xff] }
 0x168   :  { %v7093_v27 = vadd.f32 %v1160_v20, %v8775_v13  ;;  %v7097_v48 = vadd.f32 %v1161_v22, %v8778_v35  ;;  %v7101_v21 = vadd.f32 %v1162_v56, %v8781_v50  ;;  %v8784_v18 = vcvt.s32.f32 %v8783_v16 }
 0x169   :  { %v1195_v15 = vunpack.c.0.s8 %v1189_v7  ;;  %v1196_v54 = vunpack.c.0.s8 %v1190_v41  ;;  %v1197_v28 = vunpack.c.0.s8 %v1191_v46  ;;  %v1198_v60 = vunpack.c.0.s8 %v1192_v11 }
 0x16a   :  { %8776 = vst [vmem:[#allocation310_spill] sm:$0xff] %v7093_v27  ;;  %8779 = vst [vmem:[#allocation311_spill] sm:$0xff] %v7097_v48  ;;  %v7105_v52 = vadd.f32 %v1163_v58, %v8784_v18  ;;  %v1199_v49 = vunpack.c.0.s8 %v1193_v45  ;;  %v1200_v20 = vunpack.c.1.s8 %v1188_v1  ;;  %v1201_v17 = vunpack.c.1.s8 %v1189_v7 }
 0x16b   :  { %8782 = vst [vmem:[#allocation312_spill] sm:$0xff] %v7101_v21  ;;  %v1202_v29 = vunpack.c.1.s8 %v1190_v41  ;;  %v1203_v31 = vunpack.c.1.s8 %v1191_v46  ;;  %v1204_v22 = vunpack.c.1.s8 %v1192_v11  ;;  %v1205_v32 = vunpack.c.1.s8 %v1193_v45 }
 0x16c   :  { %8785 = vst [vmem:[#allocation313_spill] sm:$0xff] %v7105_v52  ;;  %v1206_v34 = vunpack.c.2.s8 %v1188_v1  ;;  %v1207_v0 = vunpack.c.2.s8 %v1189_v7  ;;  %v1208_v56 = vunpack.c.2.s8 %v1190_v41  ;;  %v1209_v2 = vunpack.c.2.s8 %v1191_v46 }
 0x16d   :  { %v1210_v36 = vunpack.c.2.s8 %v1192_v11  ;;  %v1211_v39 = vunpack.c.2.s8 %v1193_v45  ;;  %v1212_v58 = vunpack.c.3.s8 %v1188_v1  ;;  %v1213_v3 = vunpack.c.3.s8 %v1189_v7 }
 0x16e   :  { %v1214_v5 = vunpack.c.3.s8 %v1190_v41  ;;  %v1215_v43 = vunpack.c.3.s8 %v1191_v46  ;;  %v1216_v9 = vunpack.c.3.s8 %v1192_v11  ;;  %v1217_v42 = vunpack.c.3.s8 %v1193_v45 }
 0x16f   :  { %v1218_v10 = vand.u32 255, %v1194_v24  ;;  %v1219_v47 = vand.u32 255, %v1195_v15  ;;  %v1220_v12 = vand.u32 255, %v1196_v54  ;;  %v1221_v13 = vand.u32 255, %v1197_v28 }
 0x170   :  { %v1222_v14 = vand.u32 255, %v1198_v60  ;;  %v1223_v35 = vand.u32 255, %v1199_v49  ;;  %v1224_v57 = vand.u32 255, %v1200_v20  ;;  %v1225_v50 = vand.u32 255, %v1201_v17 }
 0x171   :  { %v1226_v16 = vand.u32 255, %v1202_v29  ;;  %v1227_v18 = vand.u32 255, %v1203_v31  ;;  %v1228_v52 = vand.u32 255, %v1204_v22  ;;  %v1229_v21 = vand.u32 255, %v1205_v32 }
 0x172   :  { %v1230_v48 = vand.u32 255, %v1206_v34  ;;  %v1231_v27 = vand.u32 255, %v1207_v0  ;;  %v1232_v1 = vand.u32 255, %v1208_v56  ;;  %v1233_v7 = vand.u32 255, %v1209_v2 }
 0x173   :  { %v1234_v41 = vand.u32 255, %v1210_v36  ;;  %v1235_v46 = vand.u32 255, %v1211_v39  ;;  %v1236_v11 = vand.u32 255, %v1212_v58  ;;  %v1237_v45 = vand.u32 255, %v1213_v3 }
 0x174   :  { %v1238_v24 = vand.u32 255, %v1214_v5  ;;  %v1239_v15 = vand.u32 255, %v1215_v43  ;;  %v1240_v54 = vand.u32 255, %v1216_v9  ;;  %v1241_v28 = vand.u32 255, %v1217_v42 }
 0x175   :  { %v1242_v60 = vcvt.s32.f32 %v1218_v10  ;;  %v1243_v49 = vcvt.s32.f32 %v1219_v47  ;;  %v1244_v20 = vcvt.s32.f32 %v1220_v12  ;;  %v1245_v17 = vcvt.s32.f32 %v1221_v13 }
 0x176   :  { %v1246_v29 = vcvt.s32.f32 %v1222_v14  ;;  %v1247_v31 = vcvt.s32.f32 %v1223_v35  ;;  %v1248_v22 = vcvt.s32.f32 %v1224_v57  ;;  %v1249_v32 = vcvt.s32.f32 %v1225_v50  ;;  %v1293_v50 = vld [vmem:[%s8749_s6 + $0xa8] sm:$0xff] }
 0x177   :  { %v1250_v34 = vcvt.s32.f32 %v1226_v16  ;;  %v1251_v0 = vcvt.s32.f32 %v1227_v18  ;;  %v1252_v56 = vcvt.s32.f32 %v1228_v52  ;;  %v1253_v2 = vcvt.s32.f32 %v1229_v21  ;;  %v1294_v16 = vld [vmem:[%s8749_s6 + $0xb0] sm:$0xff] }
 0x178   :  { %v1254_v36 = vcvt.s32.f32 %v1230_v48  ;;  %v1255_v39 = vcvt.s32.f32 %v1231_v27  ;;  %v1256_v58 = vcvt.s32.f32 %v1232_v1  ;;  %v1257_v3 = vcvt.s32.f32 %v1233_v7  ;;  %v8790_v7 = vld [vmem:[#allocation312_spill] sm:$0xff] }
 0x179   :  { %v1258_v5 = vcvt.s32.f32 %v1234_v41  ;;  %v1259_v43 = vcvt.s32.f32 %v1235_v46  ;;  %v1260_v9 = vcvt.s32.f32 %v1236_v11  ;;  %v1261_v42 = vcvt.s32.f32 %v1237_v45  ;;  %v8792_v46 = vld [vmem:[#allocation313_spill] sm:$0xff] }
 0x17a   :  { %v1262_v10 = vcvt.s32.f32 %v1238_v24  ;;  %v1263_v47 = vcvt.s32.f32 %v1239_v15  ;;  %v1264_v12 = vcvt.s32.f32 %v1240_v54  ;;  %v1265_v13 = vcvt.s32.f32 %v1241_v28 }
 0x17b   :  { %v7108_v14 = vadd.f32 %v1242_v60, %v6995_v26  ;;  %v7111_v35 = vadd.f32 %v1243_v49, %v6999_v30  ;;  %v7114_v21 = vadd.f32 %v1244_v20, %v7003_v62  ;;  %v7117_v27 = vadd.f32 %v1245_v17, %v7007_v51 }
 0x17c   :  { %v7120_v48 = vadd.f32 %v1246_v29, %v7011_v19  ;;  %v7123_v52 = vadd.f32 %v1247_v31, %v7015_v37  ;;  %v7126_v57 = vadd.f32 %v1248_v22, %v7019_v61  ;;  %v7129_v26 = vadd.f32 %v1249_v32, %v7023_v33 }
 0x17d   :  { %v7132_v30 = vadd.f32 %v1250_v34, %v7027_v25  ;;  %v7135_v62 = vadd.f32 %v1251_v0, %v7031_v59  ;;  %v7138_v51 = vadd.f32 %v1252_v56, %v7035_v23  ;;  %v7141_v19 = vadd.f32 %v1253_v2, %v7039_v55  ;;  %v1290_v25 = vld [vmem:[%s8749_s6 + $0x90] sm:$0xff]  ;;  %v1291_v59 = vld [vmem:[%s8749_s6 + $0x98] sm:$0xff]  ;;  %v1292_v23 = vld [vmem:[%s8749_s6 + $0xa0] sm:$0xff] }
 0x17e   :  { %v7144_v37 = vadd.f32 %v1254_v36, %v7043_v53  ;;  %v7147_v61 = vadd.f32 %v1255_v39, %v7047_v38  ;;  %v7150_v33 = vadd.f32 %v1256_v58, %v7051_v4  ;;  %v7162_v55 = vadd.f32 %v1257_v3, %v7064_v6  ;;  %v1295_v6 = vld [vmem:[%s8749_s6 + $0xb8] sm:$0xff] }
 0x17f   :  { %v7165_v53 = vadd.f32 %v1258_v5, %v7068_v40  ;;  %v7168_v38 = vadd.f32 %v1259_v43, %v7072_v8  ;;  %v7171_v4 = vadd.f32 %v1260_v9, %v7076_v44  ;;  %v7183_v40 = vadd.f32 %v1261_v42, %v7089_v63  ;;  %v8786_v8 = vld [vmem:[#allocation310_spill] sm:$0xff]  ;;  %v8788_v44 = vld [vmem:[#allocation311_spill] sm:$0xff] }
 0x180   :  { %v7186_v18 = vadd.f32 %v1262_v10, %v8786_v8  ;;  %v7189_v1 = vadd.f32 %v1263_v47, %v8788_v44  ;;  %v7192_v41 = vadd.f32 %v1264_v12, %v8790_v7  ;;  %v7195_v11 = vadd.f32 %v1265_v13, %v8792_v46 }
 0x181   :  { %v1296_v45 = vunpack.c.0.s8 %v1290_v25  ;;  %v1297_v24 = vunpack.c.0.s8 %v1291_v59  ;;  %v1298_v15 = vunpack.c.0.s8 %v1292_v23  ;;  %v1299_v54 = vunpack.c.0.s8 %v1293_v50 }
 0x182   :  { %8787 = vst [vmem:[#allocation310_spill] sm:$0xff] %v7186_v18  ;;  %8789 = vst [vmem:[#allocation311_spill] sm:$0xff] %v7189_v1  ;;  %v1300_v28 = vunpack.c.0.s8 %v1294_v16  ;;  %v1301_v60 = vunpack.c.0.s8 %v1295_v6  ;;  %v1302_v63 = vunpack.c.1.s8 %v1290_v25  ;;  %v1303_v49 = vunpack.c.1.s8 %v1291_v59 }
 0x183   :  { %8791 = vst [vmem:[#allocation312_spill] sm:$0xff] %v7192_v41  ;;  %8793 = vst [vmem:[#allocation313_spill] sm:$0xff] %v7195_v11  ;;  %v1304_v20 = vunpack.c.1.s8 %v1292_v23  ;;  %v1305_v17 = vunpack.c.1.s8 %v1293_v50  ;;  %v1306_v29 = vunpack.c.1.s8 %v1294_v16  ;;  %v1307_v31 = vunpack.c.1.s8 %v1295_v6 }
 0x184   :  { %v1308_v22 = vunpack.c.2.s8 %v1290_v25  ;;  %v1309_v32 = vunpack.c.2.s8 %v1291_v59  ;;  %v1310_v34 = vunpack.c.2.s8 %v1292_v23  ;;  %v1311_v0 = vunpack.c.2.s8 %v1293_v50 }
 0x185   :  { %v1312_v56 = vunpack.c.2.s8 %v1294_v16  ;;  %v1313_v2 = vunpack.c.2.s8 %v1295_v6  ;;  %v1314_v36 = vunpack.c.3.s8 %v1290_v25  ;;  %v1315_v39 = vunpack.c.3.s8 %v1291_v59 }
 0x186   :  { %v1316_v58 = vunpack.c.3.s8 %v1292_v23  ;;  %v1317_v3 = vunpack.c.3.s8 %v1293_v50  ;;  %v1318_v5 = vunpack.c.3.s8 %v1294_v16  ;;  %v1319_v43 = vunpack.c.3.s8 %v1295_v6 }
 0x187   :  { %v1320_v9 = vand.u32 255, %v1296_v45  ;;  %v1321_v42 = vand.u32 255, %v1297_v24  ;;  %v1322_v10 = vand.u32 255, %v1298_v15  ;;  %v1323_v47 = vand.u32 255, %v1299_v54 }
 0x188   :  { %v1324_v12 = vand.u32 255, %v1300_v28  ;;  %v1325_v13 = vand.u32 255, %v1301_v60  ;;  %v1326_v8 = vand.u32 255, %v1302_v63  ;;  %v1327_v44 = vand.u32 255, %v1303_v49 }
 0x189   :  { %v1328_v7 = vand.u32 255, %v1304_v20  ;;  %v1329_v46 = vand.u32 255, %v1305_v17  ;;  %v1330_v11 = vand.u32 255, %v1306_v29  ;;  %v1331_v41 = vand.u32 255, %v1307_v31 }
 0x18a   :  { %v1332_v1 = vand.u32 255, %v1308_v22  ;;  %v1333_v18 = vand.u32 255, %v1309_v32  ;;  %v1334_v25 = vand.u32 255, %v1310_v34  ;;  %v1335_v59 = vand.u32 255, %v1311_v0 }
 0x18b   :  { %v1336_v23 = vand.u32 255, %v1312_v56  ;;  %v1337_v50 = vand.u32 255, %v1313_v2  ;;  %v1338_v16 = vand.u32 255, %v1314_v36  ;;  %v1339_v6 = vand.u32 255, %v1315_v39 }
 0x18c   :  { %v1340_v45 = vand.u32 255, %v1316_v58  ;;  %v1341_v24 = vand.u32 255, %v1317_v3  ;;  %v1342_v15 = vand.u32 255, %v1318_v5  ;;  %v1343_v54 = vand.u32 255, %v1319_v43 }
 0x18d   :  { %v1344_v28 = vcvt.s32.f32 %v1320_v9  ;;  %v1345_v60 = vcvt.s32.f32 %v1321_v42  ;;  %v1346_v63 = vcvt.s32.f32 %v1322_v10  ;;  %v1347_v49 = vcvt.s32.f32 %v1323_v47 }
 0x18e   :  { %v1348_v20 = vcvt.s32.f32 %v1324_v12  ;;  %v1349_v17 = vcvt.s32.f32 %v1325_v13  ;;  %v1350_v29 = vcvt.s32.f32 %v1326_v8  ;;  %v1351_v31 = vcvt.s32.f32 %v1327_v44  ;;  %v1395_v44 = vld [vmem:[%s8749_s6 + $0xd8] sm:$0xff] }
 0x18f   :  { %v1352_v22 = vcvt.s32.f32 %v1328_v7  ;;  %v1353_v32 = vcvt.s32.f32 %v1329_v46  ;;  %v1354_v34 = vcvt.s32.f32 %v1330_v11  ;;  %v1355_v0 = vcvt.s32.f32 %v1331_v41  ;;  %v1396_v7 = vld [vmem:[%s8749_s6 + $0xe0] sm:$0xff] }
 0x190   :  { %v1356_v56 = vcvt.s32.f32 %v1332_v1  ;;  %v1357_v2 = vcvt.s32.f32 %v1333_v18  ;;  %v1358_v36 = vcvt.s32.f32 %v1334_v25  ;;  %v1359_v39 = vcvt.s32.f32 %v1335_v59  ;;  %v8798_v59 = vld [vmem:[#allocation312_spill] sm:$0xff] }
 0x191   :  { %v1360_v58 = vcvt.s32.f32 %v1336_v23  ;;  %v1361_v3 = vcvt.s32.f32 %v1337_v50  ;;  %v1362_v5 = vcvt.s32.f32 %v1338_v16  ;;  %v1363_v43 = vcvt.s32.f32 %v1339_v6  ;;  %v8800_v50 = vld [vmem:[#allocation313_spill] sm:$0xff] }
 0x192   :  { %v1364_v9 = vcvt.s32.f32 %v1340_v45  ;;  %v1365_v42 = vcvt.s32.f32 %v1341_v24  ;;  %v1366_v10 = vcvt.s32.f32 %v1342_v15  ;;  %v1367_v47 = vcvt.s32.f32 %v1343_v54 }
 0x193   :  { %v7198_v12 = vadd.f32 %v1344_v28, %v7108_v14  ;;  %v7201_v13 = vadd.f32 %v1345_v60, %v7111_v35  ;;  %v7204_v41 = vadd.f32 %v1346_v63, %v7114_v21  ;;  %v7207_v18 = vadd.f32 %v1347_v49, %v7117_v27 }
 0x194   :  { %v7210_v1 = vadd.f32 %v1348_v20, %v7120_v48  ;;  %v7213_v11 = vadd.f32 %v1349_v17, %v7123_v52  ;;  %v7216_v8 = vadd.f32 %v1350_v29, %v7126_v57  ;;  %v7219_v14 = vadd.f32 %v1351_v31, %v7129_v26 }
 0x195   :  { %v7222_v35 = vadd.f32 %v1352_v22, %v7132_v30  ;;  %v7225_v21 = vadd.f32 %v1353_v32, %v7135_v62  ;;  %v7228_v27 = vadd.f32 %v1354_v34, %v7138_v51  ;;  %v7231_v48 = vadd.f32 %v1355_v0, %v7141_v19  ;;  %v1392_v30 = vld [vmem:[%s8749_s6 + $0xc0] sm:$0xff]  ;;  %v1393_v62 = vld [vmem:[%s8749_s6 + $0xc8] sm:$0xff]  ;;  %v1394_v51 = vld [vmem:[%s8749_s6 + $0xd0] sm:$0xff] }
 0x196   :  { %v7234_v52 = vadd.f32 %v1356_v56, %v7144_v37  ;;  %v7237_v57 = vadd.f32 %v1357_v2, %v7147_v61  ;;  %v7240_v26 = vadd.f32 %v1358_v36, %v7150_v33  ;;  %v7252_v19 = vadd.f32 %v1359_v39, %v7162_v55  ;;  %v1397_v55 = vld [vmem:[%s8749_s6 + $0xe8] sm:$0xff] }
 0x197   :  { %v7255_v37 = vadd.f32 %v1360_v58, %v7165_v53  ;;  %v7258_v61 = vadd.f32 %v1361_v3, %v7168_v38  ;;  %v7261_v33 = vadd.f32 %v1362_v5, %v7171_v4  ;;  %v7273_v53 = vadd.f32 %v1363_v43, %v7183_v40  ;;  %v8794_v38 = vld [vmem:[#allocation310_spill] sm:$0xff]  ;;  %v8796_v4 = vld [vmem:[#allocation311_spill] sm:$0xff] }
 0x198   :  { %v7276_v46 = vadd.f32 %v1364_v9, %v8794_v38  ;;  %v7279_v25 = vadd.f32 %v1365_v42, %v8796_v4  ;;  %v7282_v23 = vadd.f32 %v1366_v10, %v8798_v59  ;;  %v7285_v16 = vadd.f32 %v1367_v47, %v8800_v50 }
 0x199   :  { %v1398_v6 = vunpack.c.0.s8 %v1392_v30  ;;  %v1399_v45 = vunpack.c.0.s8 %v1393_v62  ;;  %v1400_v24 = vunpack.c.0.s8 %v1394_v51  ;;  %v1401_v15 = vunpack.c.0.s8 %v1395_v44 }
 0x19a   :  { %8795 = vst [vmem:[#allocation310_spill] sm:$0xff] %v7276_v46  ;;  %8797 = vst [vmem:[#allocation311_spill] sm:$0xff] %v7279_v25  ;;  %v1402_v54 = vunpack.c.0.s8 %v1396_v7  ;;  %v1403_v28 = vunpack.c.0.s8 %v1397_v55  ;;  %v1404_v40 = vunpack.c.1.s8 %v1392_v30  ;;  %v1405_v60 = vunpack.c.1.s8 %v1393_v62 }
 0x19b   :  { %8799 = vst [vmem:[#allocation312_spill] sm:$0xff] %v7282_v23  ;;  %8801 = vst [vmem:[#allocation313_spill] sm:$0xff] %v7285_v16  ;;  %v1406_v63 = vunpack.c.1.s8 %v1394_v51  ;;  %v1407_v49 = vunpack.c.1.s8 %v1395_v44  ;;  %v1408_v20 = vunpack.c.1.s8 %v1396_v7  ;;  %v1409_v17 = vunpack.c.1.s8 %v1397_v55 }
 0x19c   :  { %v1410_v29 = vunpack.c.2.s8 %v1392_v30  ;;  %v1411_v31 = vunpack.c.2.s8 %v1393_v62  ;;  %v1412_v22 = vunpack.c.2.s8 %v1394_v51  ;;  %v1413_v32 = vunpack.c.2.s8 %v1395_v44 }
 0x19d   :  { %v1414_v34 = vunpack.c.2.s8 %v1396_v7  ;;  %v1415_v0 = vunpack.c.2.s8 %v1397_v55  ;;  %v1416_v56 = vunpack.c.3.s8 %v1392_v30  ;;  %v1417_v2 = vunpack.c.3.s8 %v1393_v62 }
 0x19e   :  { %v1418_v36 = vunpack.c.3.s8 %v1394_v51  ;;  %v1419_v39 = vunpack.c.3.s8 %v1395_v44  ;;  %v1420_v58 = vunpack.c.3.s8 %v1396_v7  ;;  %v1421_v3 = vunpack.c.3.s8 %v1397_v55 }
 0x19f   :  { %v1422_v5 = vand.u32 255, %v1398_v6  ;;  %v1423_v43 = vand.u32 255, %v1399_v45  ;;  %v1424_v9 = vand.u32 255, %v1400_v24  ;;  %v1425_v42 = vand.u32 255, %v1401_v15 }
 0x1a0   :  { %v1426_v10 = vand.u32 255, %v1402_v54  ;;  %v1427_v47 = vand.u32 255, %v1403_v28  ;;  %v1428_v38 = vand.u32 255, %v1404_v40  ;;  %v1429_v4 = vand.u32 255, %v1405_v60 }
 0x1a1   :  { %v1430_v59 = vand.u32 255, %v1406_v63  ;;  %v1431_v50 = vand.u32 255, %v1407_v49  ;;  %v1432_v16 = vand.u32 255, %v1408_v20  ;;  %v1433_v23 = vand.u32 255, %v1409_v17 }
 0x1a2   :  { %v1434_v25 = vand.u32 255, %v1410_v29  ;;  %v1435_v46 = vand.u32 255, %v1411_v31  ;;  %v1436_v30 = vand.u32 255, %v1412_v22  ;;  %v1437_v62 = vand.u32 255, %v1413_v32 }
 0x1a3   :  { %v1438_v51 = vand.u32 255, %v1414_v34  ;;  %v1439_v44 = vand.u32 255, %v1415_v0  ;;  %v1440_v7 = vand.u32 255, %v1416_v56  ;;  %v1441_v55 = vand.u32 255, %v1417_v2 }
 0x1a4   :  { %v1442_v6 = vand.u32 255, %v1418_v36  ;;  %v1443_v45 = vand.u32 255, %v1419_v39  ;;  %v1444_v24 = vand.u32 255, %v1420_v58  ;;  %v1445_v15 = vand.u32 255, %v1421_v3 }
 0x1a5   :  { %v1446_v54 = vcvt.s32.f32 %v1422_v5  ;;  %v1447_v28 = vcvt.s32.f32 %v1423_v43  ;;  %v1448_v40 = vcvt.s32.f32 %v1424_v9  ;;  %v1449_v60 = vcvt.s32.f32 %v1425_v42 }
 0x1a6   :  { %v1450_v63 = vcvt.s32.f32 %v1426_v10  ;;  %v1451_v49 = vcvt.s32.f32 %v1427_v47  ;;  %v1452_v20 = vcvt.s32.f32 %v1428_v38  ;;  %v1453_v17 = vcvt.s32.f32 %v1429_v4  ;;  %v1497_v4 = vld [vmem:[%s8749_s6 + $0x108] sm:$0xff] }
 0x1a7   :  { %v1454_v29 = vcvt.s32.f32 %v1430_v59  ;;  %v1455_v31 = vcvt.s32.f32 %v1431_v50  ;;  %v1456_v22 = vcvt.s32.f32 %v1432_v16  ;;  %v1457_v32 = vcvt.s32.f32 %v1433_v23  ;;  %v1498_v59 = vld [vmem:[%s8749_s6 + $0x110] sm:$0xff] }
 0x1a8   :  { %v1458_v34 = vcvt.s32.f32 %v1434_v25  ;;  %v1459_v0 = vcvt.s32.f32 %v1435_v46  ;;  %v1460_v56 = vcvt.s32.f32 %v1436_v30  ;;  %v1461_v2 = vcvt.s32.f32 %v1437_v62  ;;  %v8806_v62 = vld [vmem:[#allocation312_spill] sm:$0xff] }
 0x1a9   :  { %v1462_v36 = vcvt.s32.f32 %v1438_v51  ;;  %v1463_v39 = vcvt.s32.f32 %v1439_v44  ;;  %v1464_v58 = vcvt.s32.f32 %v1440_v7  ;;  %v1465_v3 = vcvt.s32.f32 %v1441_v55  ;;  %v8808_v44 = vld [vmem:[#allocation313_spill] sm:$0xff] }
 0x1aa   :  { %v1466_v5 = vcvt.s32.f32 %v1442_v6  ;;  %v1467_v43 = vcvt.s32.f32 %v1443_v45  ;;  %v1468_v9 = vcvt.s32.f32 %v1444_v24  ;;  %v1469_v42 = vcvt.s32.f32 %v1445_v15 }
 0x1ab   :  { %v7288_v10 = vadd.f32 %v1446_v54, %v7198_v12  ;;  %v7291_v47 = vadd.f32 %v1447_v28, %v7201_v13  ;;  %v7294_v23 = vadd.f32 %v1448_v40, %v7204_v41  ;;  %v7297_v46 = vadd.f32 %v1449_v60, %v7207_v18 }
 0x1ac   :  { %v7300_v25 = vadd.f32 %v1450_v63, %v7210_v1  ;;  %v7303_v16 = vadd.f32 %v1451_v49, %v7213_v11  ;;  %v7306_v38 = vadd.f32 %v1452_v20, %v7216_v8  ;;  %v7309_v12 = vadd.f32 %v1453_v17, %v7219_v14 }
 0x1ad   :  { %v7312_v13 = vadd.f32 %v1454_v29, %v7222_v35  ;;  %v7315_v41 = vadd.f32 %v1455_v31, %v7225_v21  ;;  %v7318_v18 = vadd.f32 %v1456_v22, %v7228_v27  ;;  %v7321_v1 = vadd.f32 %v1457_v32, %v7231_v48  ;;  %v1494_v35 = vld [vmem:[%s8749_s6 + $0xf0] sm:$0xff]  ;;  %v1495_v21 = vld [vmem:[%s8749_s6 + $0xf8] sm:$0xff]  ;;  %v1496_v27 = vld [vmem:[%s8749_s6 + $0x100] sm:$0xff] }
 0x1ae   :  { %v7324_v11 = vadd.f32 %v1458_v34, %v7234_v52  ;;  %v7327_v8 = vadd.f32 %v1459_v0, %v7237_v57  ;;  %v7330_v14 = vadd.f32 %v1460_v56, %v7240_v26  ;;  %v7342_v48 = vadd.f32 %v1461_v2, %v7252_v19  ;;  %v1499_v19 = vld [vmem:[%s8749_s6 + $0x118] sm:$0xff] }
 0x1af   :  { %v7345_v52 = vadd.f32 %v1462_v36, %v7255_v37  ;;  %v7348_v57 = vadd.f32 %v1463_v39, %v7258_v61  ;;  %v7351_v26 = vadd.f32 %v1464_v58, %v7261_v33  ;;  %v7363_v37 = vadd.f32 %v1465_v3, %v7273_v53  ;;  %v8802_v61 = vld [vmem:[#allocation310_spill] sm:$0xff]  ;;  %v8804_v33 = vld [vmem:[#allocation311_spill] sm:$0xff] }
 0x1b0   :  { %v7366_v50 = vadd.f32 %v1466_v5, %v8802_v61  ;;  %v7369_v30 = vadd.f32 %v1467_v43, %v8804_v33  ;;  %v7372_v51 = vadd.f32 %v1468_v9, %v8806_v62  ;;  %v7375_v7 = vadd.f32 %v1469_v42, %v8808_v44 }
 0x1b1   :  { %v1500_v55 = vunpack.c.0.s8 %v1494_v35  ;;  %v1501_v6 = vunpack.c.0.s8 %v1495_v21  ;;  %v1502_v45 = vunpack.c.0.s8 %v1496_v27  ;;  %v1503_v24 = vunpack.c.0.s8 %v1497_v4 }
 0x1b2   :  { %8803 = vst [vmem:[#allocation310_spill] sm:$0xff] %v7366_v50  ;;  %8805 = vst [vmem:[#allocation311_spill] sm:$0xff] %v7369_v30  ;;  %v1504_v15 = vunpack.c.0.s8 %v1498_v59  ;;  %v1505_v54 = vunpack.c.0.s8 %v1499_v19  ;;  %v1506_v53 = vunpack.c.1.s8 %v1494_v35  ;;  %v1507_v28 = vunpack.c.1.s8 %v1495_v21 }
 0x1b3   :  { %8807 = vst [vmem:[#allocation312_spill] sm:$0xff] %v7372_v51  ;;  %8809 = vst [vmem:[#allocation313_spill] sm:$0xff] %v7375_v7  ;;  %v1508_v40 = vunpack.c.1.s8 %v1496_v27  ;;  %v1509_v60 = vunpack.c.1.s8 %v1497_v4  ;;  %v1510_v63 = vunpack.c.1.s8 %v1498_v59  ;;  %v1511_v49 = vunpack.c.1.s8 %v1499_v19 }
 0x1b4   :  { %v1512_v20 = vunpack.c.2.s8 %v1494_v35  ;;  %v1513_v17 = vunpack.c.2.s8 %v1495_v21  ;;  %v1514_v29 = vunpack.c.2.s8 %v1496_v27  ;;  %v1515_v31 = vunpack.c.2.s8 %v1497_v4 }
 0x1b5   :  { %v1516_v22 = vunpack.c.2.s8 %v1498_v59  ;;  %v1517_v32 = vunpack.c.2.s8 %v1499_v19  ;;  %v1518_v34 = vunpack.c.3.s8 %v1494_v35  ;;  %v1519_v0 = vunpack.c.3.s8 %v1495_v21 }
 0x1b6   :  { %v1520_v56 = vunpack.c.3.s8 %v1496_v27  ;;  %v1521_v2 = vunpack.c.3.s8 %v1497_v4  ;;  %v1522_v36 = vunpack.c.3.s8 %v1498_v59  ;;  %v1523_v39 = vunpack.c.3.s8 %v1499_v19 }
 0x1b7   :  { %v1524_v58 = vand.u32 255, %v1500_v55  ;;  %v1525_v3 = vand.u32 255, %v1501_v6  ;;  %v1526_v5 = vand.u32 255, %v1502_v45  ;;  %v1527_v43 = vand.u32 255, %v1503_v24 }
 0x1b8   :  { %v1528_v9 = vand.u32 255, %v1504_v15  ;;  %v1529_v42 = vand.u32 255, %v1505_v54  ;;  %v1530_v61 = vand.u32 255, %v1506_v53  ;;  %v1531_v33 = vand.u32 255, %v1507_v28 }
 0x1b9   :  { %v1532_v62 = vand.u32 255, %v1508_v40  ;;  %v1533_v44 = vand.u32 255, %v1509_v60  ;;  %v1534_v7 = vand.u32 255, %v1510_v63  ;;  %v1535_v51 = vand.u32 255, %v1511_v49 }
 0x1ba   :  { %v1536_v30 = vand.u32 255, %v1512_v20  ;;  %v1537_v50 = vand.u32 255, %v1513_v17  ;;  %v1538_v35 = vand.u32 255, %v1514_v29  ;;  %v1539_v21 = vand.u32 255, %v1515_v31 }
 0x1bb   :  { %v1540_v27 = vand.u32 255, %v1516_v22  ;;  %v1541_v4 = vand.u32 255, %v1517_v32  ;;  %v1542_v59 = vand.u32 255, %v1518_v34  ;;  %v1543_v19 = vand.u32 255, %v1519_v0 }
 0x1bc   :  { %v1544_v55 = vand.u32 255, %v1520_v56  ;;  %v1545_v6 = vand.u32 255, %v1521_v2  ;;  %v1546_v45 = vand.u32 255, %v1522_v36  ;;  %v1547_v24 = vand.u32 255, %v1523_v39 }
 0x1bd   :  { %v1548_v15 = vcvt.s32.f32 %v1524_v58  ;;  %v1549_v54 = vcvt.s32.f32 %v1525_v3  ;;  %v1550_v53 = vcvt.s32.f32 %v1526_v5  ;;  %v1551_v28 = vcvt.s32.f32 %v1527_v43 }
 0x1be   :  { %v1552_v40 = vcvt.s32.f32 %v1528_v9  ;;  %v1553_v60 = vcvt.s32.f32 %v1529_v42  ;;  %v1554_v63 = vcvt.s32.f32 %v1530_v61  ;;  %v1555_v49 = vcvt.s32.f32 %v1531_v33  ;;  %v1599_v33 = vld [vmem:[%s8749_s6 + $0x138] sm:$0xff] }
 0x1bf   :  { %v1556_v20 = vcvt.s32.f32 %v1532_v62  ;;  %v1557_v17 = vcvt.s32.f32 %v1533_v44  ;;  %v1558_v29 = vcvt.s32.f32 %v1534_v7  ;;  %v1559_v31 = vcvt.s32.f32 %v1535_v51  ;;  %v1600_v62 = vld [vmem:[%s8749_s6 + $0x140] sm:$0xff] }
 0x1c0   :  { %v1560_v22 = vcvt.s32.f32 %v1536_v30  ;;  %v1561_v32 = vcvt.s32.f32 %v1537_v50  ;;  %v1562_v34 = vcvt.s32.f32 %v1538_v35  ;;  %v1563_v0 = vcvt.s32.f32 %v1539_v21  ;;  %v8814_v21 = vld [vmem:[#allocation312_spill] sm:$0xff] }
 0x1c1   :  { %v1564_v56 = vcvt.s32.f32 %v1540_v27  ;;  %v1565_v2 = vcvt.s32.f32 %v1541_v4  ;;  %v1566_v36 = vcvt.s32.f32 %v1542_v59  ;;  %v1567_v39 = vcvt.s32.f32 %v1543_v19  ;;  %v8816_v4 = vld [vmem:[#allocation313_spill] sm:$0xff] }
 0x1c2   :  { %v1568_v58 = vcvt.s32.f32 %v1544_v55  ;;  %v1569_v3 = vcvt.s32.f32 %v1545_v6  ;;  %v1570_v5 = vcvt.s32.f32 %v1546_v45  ;;  %v1571_v43 = vcvt.s32.f32 %v1547_v24 }
 0x1c3   :  { %v7378_v9 = vadd.f32 %v1548_v15, %v7288_v10  ;;  %v7381_v42 = vadd.f32 %v1549_v54, %v7291_v47  ;;  %v7384_v51 = vadd.f32 %v1550_v53, %v7294_v23  ;;  %v7387_v50 = vadd.f32 %v1551_v28, %v7297_v46 }
 0x1c4   :  { %v7390_v30 = vadd.f32 %v1552_v40, %v7300_v25  ;;  %v7393_v7 = vadd.f32 %v1553_v60, %v7303_v16  ;;  %v7396_v61 = vadd.f32 %v1554_v63, %v7306_v38  ;;  %v7399_v10 = vadd.f32 %v1555_v49, %v7309_v12 }
 0x1c5   :  { %v7402_v47 = vadd.f32 %v1556_v20, %v7312_v13  ;;  %v7405_v23 = vadd.f32 %v1557_v17, %v7315_v41  ;;  %v7408_v46 = vadd.f32 %v1558_v29, %v7318_v18  ;;  %v7411_v25 = vadd.f32 %v1559_v31, %v7321_v1  ;;  %v1596_v13 = vld [vmem:[%s8749_s6 + $0x120] sm:$0xff]  ;;  %v1597_v41 = vld [vmem:[%s8749_s6 + $0x128] sm:$0xff]  ;;  %v1598_v18 = vld [vmem:[%s8749_s6 + $0x130] sm:$0xff] }
 0x1c6   :  { %v7414_v16 = vadd.f32 %v1560_v22, %v7324_v11  ;;  %v7417_v38 = vadd.f32 %v1561_v32, %v7327_v8  ;;  %v7420_v12 = vadd.f32 %v1562_v34, %v7330_v14  ;;  %v7432_v1 = vadd.f32 %v1563_v0, %v7342_v48  ;;  %v1601_v48 = vld [vmem:[%s8749_s6 + $0x148] sm:$0xff] }
 0x1c7   :  { %v7435_v11 = vadd.f32 %v1564_v56, %v7345_v52  ;;  %v7438_v8 = vadd.f32 %v1565_v2, %v7348_v57  ;;  %v7441_v14 = vadd.f32 %v1566_v36, %v7351_v26  ;;  %v7453_v52 = vadd.f32 %v1567_v39, %v7363_v37  ;;  %v8810_v57 = vld [vmem:[#allocation310_spill] sm:$0xff]  ;;  %v8812_v26 = vld [vmem:[#allocation311_spill] sm:$0xff] }
 0x1c8   :  { %v7456_v44 = vadd.f32 %v1568_v58, %v8810_v57  ;;  %v7459_v35 = vadd.f32 %v1569_v3, %v8812_v26  ;;  %v7462_v27 = vadd.f32 %v1570_v5, %v8814_v21  ;;  %v7465_v59 = vadd.f32 %v1571_v43, %v8816_v4 }
 0x1c9   :  { %v1602_v19 = vunpack.c.0.s8 %v1596_v13  ;;  %v1603_v55 = vunpack.c.0.s8 %v1597_v41  ;;  %v1604_v6 = vunpack.c.0.s8 %v1598_v18  ;;  %v1605_v45 = vunpack.c.0.s8 %v1599_v33 }
 0x1ca   :  { %8811 = vst [vmem:[#allocation310_spill] sm:$0xff] %v7456_v44  ;;  %8813 = vst [vmem:[#allocation311_spill] sm:$0xff] %v7459_v35  ;;  %v1606_v24 = vunpack.c.0.s8 %v1600_v62  ;;  %v1607_v15 = vunpack.c.0.s8 %v1601_v48  ;;  %v1608_v37 = vunpack.c.1.s8 %v1596_v13  ;;  %v1609_v54 = vunpack.c.1.s8 %v1597_v41 }
 0x1cb   :  { %8815 = vst [vmem:[#allocation312_spill] sm:$0xff] %v7462_v27  ;;  %8817 = vst [vmem:[#allocation313_spill] sm:$0xff] %v7465_v59  ;;  %v1610_v53 = vunpack.c.1.s8 %v1598_v18  ;;  %v1611_v28 = vunpack.c.1.s8 %v1599_v33  ;;  %v1612_v40 = vunpack.c.1.s8 %v1600_v62  ;;  %v1613_v60 = vunpack.c.1.s8 %v1601_v48 }
 0x1cc   :  { %v1614_v63 = vunpack.c.2.s8 %v1596_v13  ;;  %v1615_v49 = vunpack.c.2.s8 %v1597_v41  ;;  %v1616_v20 = vunpack.c.2.s8 %v1598_v18  ;;  %v1617_v17 = vunpack.c.2.s8 %v1599_v33 }
 0x1cd   :  { %v1618_v29 = vunpack.c.2.s8 %v1600_v62  ;;  %v1619_v31 = vunpack.c.2.s8 %v1601_v48  ;;  %v1620_v22 = vunpack.c.3.s8 %v1596_v13  ;;  %v1621_v32 = vunpack.c.3.s8 %v1597_v41 }
 0x1ce   :  { %v1622_v34 = vunpack.c.3.s8 %v1598_v18  ;;  %v1623_v0 = vunpack.c.3.s8 %v1599_v33  ;;  %v1624_v56 = vunpack.c.3.s8 %v1600_v62  ;;  %v1625_v2 = vunpack.c.3.s8 %v1601_v48 }
 0x1cf   :  { %v1626_v36 = vand.u32 255, %v1602_v19  ;;  %v1627_v39 = vand.u32 255, %v1603_v55  ;;  %v1628_v58 = vand.u32 255, %v1604_v6  ;;  %v1629_v3 = vand.u32 255, %v1605_v45 }
 0x1d0   :  { %v1630_v5 = vand.u32 255, %v1606_v24  ;;  %v1631_v43 = vand.u32 255, %v1607_v15  ;;  %v1632_v57 = vand.u32 255, %v1608_v37  ;;  %v1633_v26 = vand.u32 255, %v1609_v54 }
 0x1d1   :  { %v1634_v21 = vand.u32 255, %v1610_v53  ;;  %v1635_v4 = vand.u32 255, %v1611_v28  ;;  %v1636_v59 = vand.u32 255, %v1612_v40  ;;  %v1637_v27 = vand.u32 255, %v1613_v60 }
 0x1d2   :  { %v1638_v35 = vand.u32 255, %v1614_v63  ;;  %v1639_v44 = vand.u32 255, %v1615_v49  ;;  %v1640_v13 = vand.u32 255, %v1616_v20  ;;  %v1641_v41 = vand.u32 255, %v1617_v17 }
 0x1d3   :  { %v1642_v18 = vand.u32 255, %v1618_v29  ;;  %v1643_v33 = vand.u32 255, %v1619_v31  ;;  %v1644_v62 = vand.u32 255, %v1620_v22  ;;  %v1645_v48 = vand.u32 255, %v1621_v32 }
 0x1d4   :  { %v1646_v19 = vand.u32 255, %v1622_v34  ;;  %v1647_v55 = vand.u32 255, %v1623_v0  ;;  %v1648_v6 = vand.u32 255, %v1624_v56  ;;  %v1649_v45 = vand.u32 255, %v1625_v2 }
 0x1d5   :  { %v1650_v24 = vcvt.s32.f32 %v1626_v36  ;;  %v1651_v15 = vcvt.s32.f32 %v1627_v39  ;;  %v1652_v37 = vcvt.s32.f32 %v1628_v58  ;;  %v1653_v54 = vcvt.s32.f32 %v1629_v3 }
 0x1d6   :  { %v1654_v53 = vcvt.s32.f32 %v1630_v5  ;;  %v1655_v28 = vcvt.s32.f32 %v1631_v43  ;;  %v1656_v40 = vcvt.s32.f32 %v1632_v57  ;;  %v1657_v60 = vcvt.s32.f32 %v1633_v26 }
 0x1d7   :  { %v1658_v63 = vcvt.s32.f32 %v1634_v21  ;;  %v1659_v49 = vcvt.s32.f32 %v1635_v4  ;;  %v1660_v20 = vcvt.s32.f32 %v1636_v59  ;;  %v1661_v17 = vcvt.s32.f32 %v1637_v27 }
 0x1d8   :  { %v1662_v29 = vcvt.s32.f32 %v1638_v35  ;;  %v1663_v31 = vcvt.s32.f32 %v1639_v44  ;;  %v1664_v22 = vcvt.s32.f32 %v1640_v13  ;;  %v1665_v32 = vcvt.s32.f32 %v1641_v41  ;;  %v8818_v13 = vld [vmem:[#allocation310_spill] sm:$0xff]  ;;  %v8819_v41 = vld [vmem:[#allocation311_spill] sm:$0xff] }
 0x1d9   :  { %v1666_v34 = vcvt.s32.f32 %v1642_v18  ;;  %v1667_v0 = vcvt.s32.f32 %v1643_v33  ;;  %v1668_v56 = vcvt.s32.f32 %v1644_v62  ;;  %v1669_v2 = vcvt.s32.f32 %v1645_v48  ;;  %v8820_v18 = vld [vmem:[#allocation312_spill] sm:$0xff]  ;;  %v8821_v48 = vld [vmem:[#allocation313_spill] sm:$0xff] }
 0x1da   :  { %v1670_v36 = vcvt.s32.f32 %v1646_v19  ;;  %v1671_v39 = vcvt.s32.f32 %v1647_v55  ;;  %v1672_v58 = vcvt.s32.f32 %v1648_v6  ;;  %v1673_v3 = vcvt.s32.f32 %v1649_v45 }
 0x1db   :  { %v1674_v5 = vadd.f32 %v1650_v24, %v7378_v9  ;;  %v1675_v43 = vadd.f32 %v1651_v15, %v7381_v42  ;;  %v1676_v57 = vadd.f32 %v1652_v37, %v7384_v51  ;;  %v1677_v27 = vadd.f32 %v1653_v54, %v7387_v50 }
 0x1dc   :  { %v1678_v44 = vadd.f32 %v1654_v53, %v7390_v30  ;;  %v1679_v35 = vadd.f32 %v1655_v28, %v7393_v7  ;;  %v1680_v59 = vadd.f32 %v1656_v40, %v7396_v61  ;;  %v1681_v26 = vadd.f32 %v1657_v60, %v7399_v10 }
 0x1dd   :  { %v1682_v21 = vadd.f32 %v1658_v63, %v7402_v47  ;;  %v1683_v4 = vadd.f32 %v1659_v49, %v7405_v23  ;;  %v1684_v9 = vadd.f32 %v1660_v20, %v7408_v46  ;;  %v1685_v42 = vadd.f32 %v1661_v17, %v7411_v25 }
 0x1de   :  { %v1686_v51 = vadd.f32 %v1662_v29, %v7414_v16  ;;  %v1687_v50 = vadd.f32 %v1663_v31, %v7417_v38  ;;  %v1688_v30 = vadd.f32 %v1664_v22, %v7420_v12  ;;  %v1689_v7 = vadd.f32 %v1665_v32, %v7432_v1 }
 0x1df   :  { %v1690_v61 = vadd.f32 %v1666_v34, %v7435_v11  ;;  %v1691_v10 = vadd.f32 %v1667_v0, %v7438_v8  ;;  %v1692_v47 = vadd.f32 %v1668_v56, %v7441_v14  ;;  %v1693_v23 = vadd.f32 %v1669_v2, %v7453_v52 }
 0x1e0   :  { %v1694_v46 = vadd.f32 %v1670_v36, %v8818_v13  ;;  %v1695_v25 = vadd.f32 %v1671_v39, %v8819_v41  ;;  %v1696_v16 = vadd.f32 %v1672_v58, %v8820_v18  ;;  %v1698_v33 = vadd.f32 %v1680_v59, %v1674_v5 }
 0x1e1   :  { %v1707_v38 = vadd.f32 %v1681_v26, %v1675_v43  ;;  %v1716_v62 = vadd.f32 %v1682_v21, %v1676_v57  ;;  %v1725_v12 = vadd.f32 %v1683_v4, %v1677_v27  ;;  %v1697_v1 = vadd.f32 %v1673_v3, %v8821_v48 }
 0x1e2   :  { %v1734_v19 = vadd.f32 %v1684_v9, %v1678_v44  ;;  %vm1743_vm0 = vcmask 261120   ;;  %v1757_v11 = vlaneseq  ;;  %v1699_v8 = vadd.f32 %v1698_v33, %v1686_v51 }
 0x1e3   :  { %v1708_v55 = vadd.f32 %v1707_v38, %v1687_v50  ;;  %v1717_v14 = vadd.f32 %v1716_v62, %v1688_v30  ;;  %v1726_v6 = vadd.f32 %v1725_v12, %v1689_v7  ;;  %v1744_v45 = vsel %vm1743_vm0, %v1679_v35, 0.0 }
 0x1e4   :  { %v1735_v52 = vadd.f32 %v1734_v19, %v1690_v61  ;;  %v1745_v24 = vsel %vm1743_vm0, %v1685_v42, 0.0  ;;  %v1747_v15 = vsel %vm1743_vm0, %v1691_v10, 0.0  ;;  %v1700_v37 = vadd.f32 %v1699_v8, %v1692_v47 }
 0x1e5   :  { %v1709_v54 = vadd.f32 %v1708_v55, %v1693_v23  ;;  %v1718_v53 = vadd.f32 %v1717_v14, %v1694_v46  ;;  %v1727_v28 = vadd.f32 %v1726_v6, %v1695_v25  ;;  %v1746_v60 = vadd.f32 %v1745_v24, %v1744_v45 }
 0x1e6   :  { %v1736_v40 = vadd.f32 %v1735_v52, %v1696_v16  ;;  %v1749_v63 = vsel %vm1743_vm0, %v1697_v1, 0.0  ;;  %v1701_v49 = vrot.slane %v1700_v37, 4  ;;  %v7496_v32 = vand.u32 127, %v1757_v11 }
 0x1e7   :  { %v1710_v20 = vrot.slane %v1709_v54, 4  ;;  %v1719_v17 = vrot.slane %v1718_v53, 4  ;;  %v1728_v29 = vrot.slane %v1727_v28, 4  ;;  %v1748_v22 = vadd.f32 %v1747_v15, %v1746_v60 }
 0x1e8   :  { %v1737_v31 = vrot.slane %v1736_v40, 4  ;;  %v1702_v34 = vadd.f32 %v1701_v49, %v1700_v37  ;;  %v1759_v44 = vadd.s32 128, %v7496_v32  ;;  %v1760_v35 = vadd.s32 256, %v7496_v32 }
 0x1e9   :  { %v1711_v0 = vadd.f32 %v1710_v20, %v1709_v54  ;;  %v1720_v56 = vadd.f32 %v1719_v17, %v1718_v53  ;;  %v1729_v2 = vadd.f32 %v1728_v29, %v1727_v28  ;;  %v1750_v39 = vadd.f32 %v1749_v63, %v1748_v22 }
 0x1ea   :  { %v1738_v36 = vadd.f32 %v1737_v31, %v1736_v40  ;;  %v1703_v58 = vrot.slane %v1702_v34, 2  ;;  %v7501_v51 = vmul.u32.u64.low 2863311531, %v7496_v32  ;;  %v7502_v50 = vmul.u32.u64.high 2863311531, %v7496_v32, %v7501_v51 }
 0x1eb   :  { %v1712_v3 = vrot.slane %v1711_v0, 2  ;;  %v1721_v5 = vrot.slane %v1720_v56, 2  ;;  %v1730_v43 = vrot.slane %v1729_v2, 2  ;;  %v1751_v27 = vrot.slane %v1750_v39, 4 }
 0x1ec   :  { %v1739_v57 = vrot.slane %v1738_v36, 2  ;;  %v1704_v59 = vadd.f32 %v1703_v58, %v1702_v34  ;;  %v1761_v23 = vadd.s32 384, %v7496_v32  ;;  %v1762_v38 = vadd.s32 512, %v7496_v32 }
 0x1ed   :  { %v1713_v26 = vadd.f32 %v1712_v3, %v1711_v0  ;;  %v1722_v21 = vadd.f32 %v1721_v5, %v1720_v56  ;;  %v1731_v4 = vadd.f32 %v1730_v43, %v1729_v2  ;;  %v1752_v42 = vadd.f32 %v1751_v27, %v1750_v39 }
 0x1ee   :  { %v1740_v9 = vadd.f32 %v1739_v57, %v1738_v36  ;;  %v1705_v30 = vrot.slane %v1704_v59, 1  ;;  %v7505_v13 = vmul.u32.u64.low 2863311531, %v1759_v44  ;;  %v7506_v46 = vmul.u32.u64.high 2863311531, %v1759_v44, %v7505_v13 }
 0x1ef   :  { %v1714_v7 = vrot.slane %v1713_v26, 1  ;;  %v1723_v61 = vrot.slane %v1722_v21, 1  ;;  %v1732_v10 = vrot.slane %v1731_v4, 1  ;;  %v1753_v47 = vrot.slane %v1752_v42, 2 }
 0x1f0   :  { %v7508_v41 = vadd.f32 %v1705_v30, %v1704_v59  ;;  %v1741_v16 = vrot.slane %v1740_v9, 1  ;;  %v1770_v62 = vshrl.u32 %v7502_v50, 1  ;;  %v1763_v55 = vadd.s32 640, %v7496_v32 }
 0x1f1   :  { %v7510_v25 = vadd.f32 %v1714_v7, %v1713_v26  ;;  %v7512_v18 = vadd.f32 %v1723_v61, %v1722_v21  ;;  %v1754_v33 = vadd.f32 %v1753_v47, %v1752_v42  ;;  %v7516_v12 = vadd.f32 %v1732_v10, %v1731_v4 }
 0x1f2   :  { %v7520_v1 = vmul.u32.u64.low 2863311531, %v1760_v35  ;;  %v7521_v19 = vmul.u32.u64.high 2863311531, %v1760_v35, %v7520_v1  ;;  %v1771_v14 = vmul.u32 3, %v1770_v62  ;;  %v1781_v6 = vshrl.u32 %v7506_v46, 1 }
 0x1f3   :  { %v1860_v48 = vadd.f32 %v7510_v25, %v7508_v41  ;;  %v1755_v8 = vrot.slane %v1754_v33, 1  ;;  %v7525_v52 = vadd.f32 %v1741_v16, %v1740_v9 }
 0x1f4   :  { %v7528_v24 = vmul.u32.u64.low 2863311531, %v1761_v23  ;;  %v7529_v15 = vmul.u32.u64.high 2863311531, %v1761_v23, %v7528_v24  ;;  %v1772_v54 = vsub.s32 %v7496_v32, %v1771_v14  ;;  %v1782_v53 = vmul.u32 3, %v1781_v6 }
 0x1f5   :  { %v1861_v45 = vadd.f32 %v1860_v48, %v7512_v18  ;;  %v7531_v37 = vadd.f32 %v1755_v8, %v1754_v33  ;;  %v1792_v40 = vshrl.u32 %v7521_v19, 1 }
 0x1f6   :  { %v7536_v60 = vmul.u32.u64.low 2863311531, %v1762_v38  ;;  %v7537_v63 = vmul.u32.u64.high 2863311531, %v1762_v38, %v7536_v60  ;;  %v1783_v20 = vsub.s32 %v1759_v44, %v1782_v53  ;;  %v1803_v34 = vshrl.u32 %v7529_v15, 1 }
 0x1f7   :  { %v1862_v28 = vadd.f32 %v1861_v45, %v7516_v12  ;;  %v1864_v49 = vsel %vm1743_vm0, %v7531_v37, 0.0  ;;  %v7541_v17 = vmul.u32.u64.low 2863311531, %v1763_v55  ;;  %v7542_v29 = vmul.u32.u64.high 2863311531, %v1763_v55, %v7541_v17 }
 0x1f8   :  { %v1793_v22 = vmul.u32 3, %v1792_v40  ;;  %vm1830_vm1 = vcmp.ne.s32.totalorder %v1772_v54, 0  ;;  %vm1831_vm2 = vcmp.ne.s32.totalorder %v1783_v20, 0  ;;  %vm1836_vm3 = vcmp.lt.s32.totalorder %v1772_v54, 0 }
 0x1f9   :  { %v1863_v31 = vadd.f32 %v1862_v28, %v7525_v52  ;;  %vm1837_vm4 = vcmp.lt.s32.totalorder %v1783_v20, 0  ;;  %v1848_v0 = vadd.s32 3, %v1772_v54  ;;  %v1804_v36 = vmul.u32 3, %v1803_v34  ;;  %vm1842_vm5 = vmand %vm1836_vm3, %vm1830_vm1  ;;  %v1928_v34 = vld [vmem:[#allocation10 + $0x1] ss:$4 sm:$0xf] }
 0x1fa   :  { %v1794_v2 = vsub.s32 %v1760_v35, %v1793_v22  ;;  %v1814_v39 = vshrl.u32 %v7537_v63, 1  ;;  %v1825_v58 = vshrl.u32 %v7542_v29, 1  ;;  %vm1843_vm6 = vmand %vm1837_vm4, %vm1831_vm2  ;;  %v1849_v3 = vadd.s32 3, %v1783_v20  ;;  %v1921_v63 = vld [vmem:[#allocation10] ss:$4 sm:$0xf] }
 0x1fb   :  { %v1865_v56 = vadd.f32 %v1864_v49, %v1863_v31  ;;  %v1854_v5 = vsel %vm1842_vm5, %v1848_v0, %v1772_v54  ;;  %v1805_v43 = vsub.s32 %v1761_v23, %v1804_v36  ;;  %v1919_v29 = vld [vmem:[#allocation12] sm:$0xf]  ;;  %v1936_v36 = vld [vmem:[#allocation10 + $0x2] ss:$4 sm:$0xf] }
 0x1fc   :  { %v1815_v57 = vmul.u32 3, %v1814_v39  ;;  %vm1832_vm7 = vcmp.ne.s32.totalorder %v1794_v2, 0  ;;  %vm1838_vm8 = vcmp.lt.s32.totalorder %v1794_v2, 0  ;;  %v1826_v27 = vmul.u32 3, %v1825_v58 }
 0x1fd   :  { %1866 = vadd.xlane.f32.xlu0 %v1865_v56  ;;  %vm1844_vm9 = vmand %vm1838_vm8, %vm1832_vm7  ;;  %v1850_v44 = vadd.s32 3, %v1794_v2  ;;  %v1855_v59 = vsel %vm1843_vm6, %v1849_v3, %v1783_v20  ;;  %vm1868_vm10 = vcmp.eq.s32.totalorder %v1854_v5, 0  ;;  %vm1833_vm11 = vcmp.ne.s32.totalorder %v1805_v43, 0 }
 0x1fe   :  { %v1816_v35 = vsub.s32 %v1762_v38, %v1815_v57  ;;  %vm1839_vm12 = vcmp.lt.s32.totalorder %v1805_v43, 0  ;;  %v1851_v26 = vadd.s32 3, %v1805_v43  ;;  %v1827_v21 = vsub.s32 %v1763_v55, %v1826_v27 }
 0x1ff   :  { %vm1845_vm13 = vmand %vm1839_vm12, %vm1833_vm11  ;;  %v1856_v4 = vsel %vm1844_vm9, %v1850_v44, %v1794_v2  ;;  %vm1869_vm14 = vcmp.eq.s32.totalorder %v1855_v59, 0  ;;  %v1874_v9 = vsel %vm1868_vm10, %v7508_v41, 0.0  ;;  %vm1888_vm10 = vcmp.eq.s32.totalorder %v1854_v5, 1  ;;  %v1932_v2 = vld [vmem:[#allocation14 + $0x1] ss:$4 sm:$0xf] }
 0x200   :  { %vm1834_vm15 = vcmp.ne.s32.totalorder %v1816_v35, 0  ;;  %vm1840_vm1 = vcmp.lt.s32.totalorder %v1816_v35, 0  ;;  %v1852_v42 = vadd.s32 3, %v1816_v35  ;;  %v1857_v51 = vsel %vm1845_vm13, %v1851_v26, %v1805_v43  ;;  %v1940_v43 = vld [vmem:[#allocation14 + $0x2] ss:$4 sm:$0xf] }
 0x201   :  { %vm1835_vm2 = vcmp.ne.s32.totalorder %v1827_v21, 0  ;;  %vm1841_vm3 = vcmp.lt.s32.totalorder %v1827_v21, 0  ;;  %vm1846_vm4 = vmand %vm1840_vm1, %vm1834_vm15  ;;  %v1853_v50 = vadd.s32 3, %v1827_v21  ;;  %vm1870_vm5 = vcmp.eq.s32.totalorder %v1856_v4, 0 }
 0x202   :  { %vm1847_vm6 = vmand %vm1841_vm3, %vm1835_vm2  ;;  %v1858_v30 = vsel %vm1846_vm4, %v1852_v42, %v1816_v35  ;;  %vm1871_vm7 = vcmp.eq.s32.totalorder %v1857_v51, 0  ;;  %v1875_v7 = vsel %vm1869_vm14, %v7510_v25, 0.0  ;;  %v1876_v61 = vsel %vm1870_vm5, %v7512_v18, 0.0 }
 0x203   :  { %v1859_v10 = vsel %vm1847_vm6, %v1853_v50, %v1827_v21  ;;  %vm1872_vm8 = vcmp.eq.s32.totalorder %v1858_v30, 0  ;;  %v1880_v47 = vadd.f32 %v1875_v7, %v1874_v9  ;;  %v1877_v23 = vsel %vm1871_vm7, %v7516_v12, 0.0 }
 0x204   :  { %vm1873_vm9 = vcmp.eq.s32.totalorder %v1859_v10, 0  ;;  %vm1889_vm11 = vcmp.eq.s32.totalorder %v1855_v59, 1  ;;  %vm1890_vm12 = vcmp.eq.s32.totalorder %v1856_v4, 1  ;;  %v1878_v16 = vsel %vm1872_vm8, %v7525_v52, 0.0 }
 0x205   :  { %v1879_v13 = vsel %vm1873_vm9, %v7531_v37, 0.0  ;;  %v1881_v46 = vadd.f32 %v1880_v47, %v1876_v61  ;;  %vm1891_vm13 = vcmp.eq.s32.totalorder %v1857_v51, 1  ;;  %v1894_v33 = vsel %vm1888_vm10, %v7508_v41, 0.0 }
 0x206   :  { %vm1893_vm14 = vcmp.eq.s32.totalorder %v1859_v10, 1  ;;  %v1895_v62 = vsel %vm1889_vm11, %v7510_v25, 0.0  ;;  %v1896_v48 = vsel %vm1890_vm12, %v7512_v18, 0.0  ;;  %v1884_v1 = vsel %vm1743_vm0, %v1879_v13, 0.0 }
 0x207   :  { %v1882_v38 = vadd.f32 %v1881_v46, %v1877_v23  ;;  %vm1892_vm15 = vcmp.eq.s32.totalorder %v1858_v30, 1  ;;  %v1900_v19 = vadd.f32 %v1895_v62, %v1894_v33  ;;  %v1897_v55 = vsel %vm1891_vm13, %v7516_v12, 0.0  ;;  %v1924_v12 = vld [vmem:[#allocation14] ss:$4 sm:$0xf] }
 0x208   :  { %v1899_v14 = vsel %vm1893_vm14, %v7531_v37, 0.0  ;;  %v1898_v24 = vsel %vm1892_vm15, %v7525_v52, 0.0  ;;  %v1920_v52 = vld [vmem:[#allocation15] sm:$0xf]  ;;  %v1946_v57 = vshrl.u32 %v1757_v11, 7 }
 0x209   :  { %v1883_v8 = vadd.f32 %v1882_v38, %v1878_v16  ;;  %v1901_v6 = vadd.f32 %v1900_v19, %v1896_v48  ;;  %v1904_v15 = vsel %vm1743_vm0, %v1899_v14, 0.0 }
 0x20a   :  { %v7563_v9 = vsub.s32 0, %v1946_v57  ;;  %v7565_v42 = vsub.s32 1, %v1946_v57  ;;  %v7567_v30 = vsub.s32 2, %v1946_v57  ;;  %v7569_v7 = vsub.s32 3, %v1946_v57 }
 0x20b   :  { %v1885_v45 = vadd.f32 %v1884_v1, %v1883_v8  ;;  %v1902_v41 = vadd.f32 %v1901_v6, %v1897_v55 }
 0x20d   :  { %1886 = vadd.xlane.f32.xlu0 %v1885_v45  ;;  %v1903_v25 = vadd.f32 %v1902_v41, %v1898_v24 }
 0x20f   :  { %v1905_v54 = vadd.f32 %v1904_v15, %v1903_v25 }
 0x211   :  { %1906 = vadd.xlane.f32.xlu1 %v1905_v54 }
 0x286   :  { %v1867_v18 = vpop.xlane.xlu0 %1866 }
 0x296   :  { %v1887_v53 = vpop.xlane.xlu0 %1886 }
 0x297   :  { %v1910_v28 = vmul.f32 7.815626e-08, %v1887_v53  ;;  %v1908_v40 = vsub.f32 %v1867_v18, %v1887_v53 }
 0x299   :  { %v4735_v60 = vadd.f32 -0.485, %v1910_v28 }
 0x29a   :  { %v1907_v49 = vpop.xlane.xlu1 %1906 }
 0x29b   :  { %v1912_v37 = vmul.f32 4.366812, %v4735_v60  ;;  %v1909_v20 = vsub.f32 %v1908_v40, %v1907_v49  ;;  %v1913_v17 = vmul.f32 7.815626e-08, %v1907_v49 }
 0x29d   :  { %v1922_v31 = vmul.f32 %v1921_v63, %v1912_v37  ;;  %v1925_v22 = vmul.f32 %v1924_v12, %v1912_v37  ;;  %v4736_v0 = vadd.f32 -0.456, %v1913_v17  ;;  %v1916_v56 = vmul.f32 7.815626e-08, %v1909_v20 }
 0x29f   :  { %v1915_v39 = vmul.f32 4.464286, %v4736_v0  ;;  %v4737_v58 = vadd.f32 -0.406, %v1916_v56  ;;  %v1923_v3 = vadd.f32 %v1922_v31, %v1919_v29  ;;  %v1926_v5 = vadd.f32 %v1925_v22, %v1920_v52 }
 0x2a1   :  { %v1918_v27 = vmul.f32 4.4444447, %v4737_v58  ;;  %v1929_v44 = vmul.f32 %v1928_v34, %v1915_v39  ;;  %v1933_v59 = vmul.f32 %v1932_v2, %v1915_v39 }
 0x2a3   :  { %v1930_v35 = vadd.f32 %v1929_v44, %v1923_v3  ;;  %v1934_v26 = vadd.f32 %v1933_v59, %v1926_v5  ;;  %v1937_v21 = vmul.f32 %v1936_v36, %v1918_v27  ;;  %v1941_v4 = vmul.f32 %v1940_v43, %v1918_v27 }
 0x2a5   :  { %v1938_v51 = vadd.f32 %v1937_v21, %v1930_v35  ;;  %v1942_v50 = vadd.f32 %v1941_v4, %v1934_v26 }
 0x2a7   :  { %v1943_v61 = vmax.f32 %v1938_v51, 0.0  ;;  %v1969_v10 = vmax.f32 %v1942_v50, 0.0 }
 0x2a9   :  { %v1948_v11 = vrot.slane %v1943_v61, %v7563_v9  ;;  %v1952_v47 = vrot.slane %v1943_v61, %v7565_v42  ;;  %v1956_v23 = vrot.slane %v1943_v61, %v7567_v30  ;;  %v1960_v13 = vrot.slane %v1943_v61, %v7569_v7 }
 0x2aa   :  { %v1974_v46 = vrot.slane %v1969_v10, %v7563_v9  ;;  %v1978_v16 = vrot.slane %v1969_v10, %v7565_v42  ;;  %v1982_v33 = vrot.slane %v1969_v10, %v7567_v30  ;;  %v1986_v38 = vrot.slane %v1969_v10, %v7569_v7 }
 0x2ab   :  { %v7579_v62 = vpack.c.bf16 %v1948_v11, %v1948_v11  ;;  %v7581_v48 = vpack.c.bf16 %v1952_v47, %v1952_v47  ;;  %v7583_v1 = vpack.c.bf16 %v1956_v23, %v1956_v23  ;;  %v7585_v19 = vpack.c.bf16 %v1960_v13, %v1960_v13 }
 0x2ac   :  { %v7587_v8 = vpack.c.bf16 %v1974_v46, %v1974_v46  ;;  %v7589_v55 = vpack.c.bf16 %v1978_v16, %v1978_v16  ;;  %v7591_v14 = vpack.c.bf16 %v1982_v33, %v1982_v33  ;;  %v7593_v6 = vpack.c.bf16 %v1986_v38, %v1986_v38 }
 0x2ad   :  { %5356 = dma.done.wait [#allocation9], 8192 }
 0x2ae   :  { %5357 = vsyncadd [#allocation9], 4294959104  ;;  %v8822_v45 = vld [vmem:[#allocation131_spill] sm:$0xff]  ;;  %v8824_v25 = vld [vmem:[#allocation130_spill] sm:$0xff]  ;;  %2417 = vmatprep.mubr.bf16.mxu0 %v7589_v55  ;;  %2458 = vmatprep.mubr.bf16.mxu1 %v7593_v6 }
 0x2af   :  { %v2286_v24 = vunpack.c.h.s8.bf16 %v8822_v45  ;;  %v8823_v41 = vld [vmem:[#allocation163_spill] sm:$0xff]  ;;  %v2285_v54 = vunpack.c.h.s8.bf16 %v8824_v25  ;;  %v8825_v18 = vld [vmem:[#allocation162_spill] sm:$0xff] }
 0x2b0   :  { %v2350_v15 = vunpack.c.h.s8.bf16 %v8823_v41  ;;  %v2349_v53 = vunpack.c.h.s8.bf16 %v8825_v18 }
 0x2b1   :  { %5358 = dma.done.wait [#allocation9 + $0x1], 8192 }
 0x2b2   :  { %5359 = vsyncadd [#allocation9 + $0x1], 4294959104  ;;  %v2282_v28 = vunpack.c.l.s8.bf16 %v8822_v45  ;;  %v2346_v40 = vunpack.c.l.s8.bf16 %v8823_v41  ;;  %2385 = vmatprep.subr.bf16.mxu0 %v2286_v24  ;;  %2426 = vmatprep.subr.bf16.mxu1 %v2350_v15  ;;  %v2281_v60 = vunpack.c.l.s8.bf16 %v8824_v25  ;;  %v2345_v63 = vunpack.c.l.s8.bf16 %v8825_v18  ;;  %v8826_v12 = vld [vmem:[#allocation127_spill] sm:$0xff]  ;;  %v8828_v17 = vld [vmem:[#allocation126_spill] sm:$0xff] }
 0x2b3   :  { %2386 = vmatpush1.bf16.msra.mxu0 %v2285_v54  ;;  %2427 = vmatpush1.bf16.msra.mxu1 %v2349_v53  ;;  %v2278_v49 = vunpack.c.h.s8.bf16 %v8826_v12  ;;  %v8827_v37 = vld [vmem:[#allocation159_spill] sm:$0xff]  ;;  %v2277_v29 = vunpack.c.h.s8.bf16 %v8828_v17  ;;  %v8829_v52 = vld [vmem:[#allocation158_spill] sm:$0xff]  ;;  %v2274_v22 = vunpack.c.l.s8.bf16 %v8826_v12  ;;  %v2273_v0 = vunpack.c.l.s8.bf16 %v8828_v17 }
 0x2b4   :  { %2387 = vmatprep.subr.bf16.mxu0 %v2282_v28  ;;  %2428 = vmatprep.subr.bf16.mxu1 %v2346_v40  ;;  %v2342_v20 = vunpack.c.h.s8.bf16 %v8827_v37  ;;  %v2341_v31 = vunpack.c.h.s8.bf16 %v8829_v52  ;;  %v2338_v34 = vunpack.c.l.s8.bf16 %v8827_v37  ;;  %v2337_v56 = vunpack.c.l.s8.bf16 %v8829_v52  ;;  %v8830_v2 = vld [vmem:[#allocation123_spill] sm:$0xff]  ;;  %v8832_v3 = vld [vmem:[#allocation122_spill] sm:$0xff] }
 0x2b5   :  { %v2270_v36 = vunpack.c.h.s8.bf16 %v8830_v2  ;;  %v8831_v39 = vld [vmem:[#allocation155_spill] sm:$0xff]  ;;  %v2269_v5 = vunpack.c.h.s8.bf16 %v8832_v3  ;;  %v8833_v43 = vld [vmem:[#allocation154_spill] sm:$0xff]  ;;  %v2266_v27 = vunpack.c.l.s8.bf16 %v8830_v2  ;;  %v2265_v59 = vunpack.c.l.s8.bf16 %v8832_v3 }
 0x2b6   :  { %v2334_v58 = vunpack.c.h.s8.bf16 %v8831_v39  ;;  %v2333_v57 = vunpack.c.h.s8.bf16 %v8833_v43  ;;  %v2330_v44 = vunpack.c.l.s8.bf16 %v8831_v39  ;;  %v2329_v35 = vunpack.c.l.s8.bf16 %v8833_v43  ;;  %v8834_v26 = vld [vmem:[#allocation119_spill] sm:$0xff]  ;;  %v8836_v50 = vld [vmem:[#allocation118_spill] sm:$0xff] }
 0x2b7   :  { %2388 = vmatpush1.bf16.msra.mxu0 %v2281_v60  ;;  %2429 = vmatpush1.bf16.msra.mxu1 %v2345_v63  ;;  %v2262_v21 = vunpack.c.h.s8.bf16 %v8834_v26  ;;  %v8835_v4 = vld [vmem:[#allocation151_spill] sm:$0xff]  ;;  %v2261_v61 = vunpack.c.h.s8.bf16 %v8836_v50  ;;  %v8837_v10 = vld [vmem:[#allocation150_spill] sm:$0xff]  ;;  %v2258_v47 = vunpack.c.l.s8.bf16 %v8834_v26  ;;  %v2257_v13 = vunpack.c.l.s8.bf16 %v8836_v50 }
 0x2b8   :  { %2389 = vmatprep.subr.bf16.mxu0 %v2278_v49  ;;  %2430 = vmatprep.subr.bf16.mxu1 %v2342_v20  ;;  %v2326_v51 = vunpack.c.h.s8.bf16 %v8835_v4  ;;  %v2325_v11 = vunpack.c.h.s8.bf16 %v8837_v10  ;;  %v2322_v23 = vunpack.c.l.s8.bf16 %v8835_v4  ;;  %v2321_v46 = vunpack.c.l.s8.bf16 %v8837_v10  ;;  %v8838_v16 = vld [vmem:[#allocation147_spill] sm:$0xff]  ;;  %v8840_v24 = vld [vmem:[#allocation146_spill] sm:$0xff] }
 0x2b9   :  { %v2318_v33 = vunpack.c.h.s8.bf16 %v8838_v16  ;;  %v8839_v38 = vld [vmem:[#allocation179_spill] sm:$0xff]  ;;  %v2317_v41 = vunpack.c.h.s8.bf16 %v8840_v24  ;;  %v8841_v15 = vld [vmem:[#allocation178_spill] sm:$0xff]  ;;  %v2314_v54 = vunpack.c.l.s8.bf16 %v8838_v16  ;;  %v2313_v53 = vunpack.c.l.s8.bf16 %v8840_v24 }
 0x2ba   :  { %v2382_v45 = vunpack.c.h.s8.bf16 %v8839_v38  ;;  %v2381_v25 = vunpack.c.h.s8.bf16 %v8841_v15  ;;  %v2378_v18 = vunpack.c.l.s8.bf16 %v8839_v38  ;;  %v2377_v28 = vunpack.c.l.s8.bf16 %v8841_v15  ;;  %v8842_v40 = vld [vmem:[#allocation143_spill] sm:$0xff]  ;;  %v8844_v49 = vld [vmem:[#allocation142_spill] sm:$0xff] }
 0x2bb   :  { %2390 = vmatpush1.bf16.msra.mxu0 %v2277_v29  ;;  %2431 = vmatpush1.bf16.msra.mxu1 %v2341_v31  ;;  %v2310_v60 = vunpack.c.h.s8.bf16 %v8842_v40  ;;  %v8843_v63 = vld [vmem:[#allocation175_spill] sm:$0xff]  ;;  %v2309_v37 = vunpack.c.h.s8.bf16 %v8844_v49  ;;  %v8845_v20 = vld [vmem:[#allocation174_spill] sm:$0xff]  ;;  %v2306_v29 = vunpack.c.l.s8.bf16 %v8842_v40  ;;  %v2305_v31 = vunpack.c.l.s8.bf16 %v8844_v49 }
 0x2bc   :  { %2391 = vmatprep.subr.bf16.mxu0 %v2274_v22  ;;  %2432 = vmatprep.subr.bf16.mxu1 %v2338_v34  ;;  %v2374_v12 = vunpack.c.h.s8.bf16 %v8843_v63  ;;  %v2373_v17 = vunpack.c.h.s8.bf16 %v8845_v20  ;;  %v2370_v52 = vunpack.c.l.s8.bf16 %v8843_v63  ;;  %v2369_v22 = vunpack.c.l.s8.bf16 %v8845_v20  ;;  %v8846_v34 = vld [vmem:[#allocation139_spill] sm:$0xff] }
 0x2bf   :  { %2392 = vmatpush1.bf16.msra.mxu0 %v2273_v0  ;;  %2433 = vmatpush1.bf16.msra.mxu1 %v2337_v56  ;;  %v2302_v0 = vunpack.c.h.s8.bf16 %v8846_v34  ;;  %v8847_v56 = vld [vmem:[#allocation171_spill] sm:$0xff] }
 0x2c0   :  { %2393 = vmatprep.subr.bf16.mxu0 %v2270_v36  ;;  %2434 = vmatprep.subr.bf16.mxu1 %v2334_v58  ;;  %v2366_v2 = vunpack.c.h.s8.bf16 %v8847_v56  ;;  %v8848_v36 = vld [vmem:[#allocation138_spill] sm:$0xff]  ;;  %v2362_v43 = vunpack.c.l.s8.bf16 %v8847_v56 }
 0x2c1   :  { %v2301_v39 = vunpack.c.h.s8.bf16 %v8848_v36  ;;  %v8849_v58 = vld [vmem:[#allocation170_spill] sm:$0xff] }
 0x2c2   :  { %v2365_v3 = vunpack.c.h.s8.bf16 %v8849_v58 }
 0x2c3   :  { %2394 = vmatpush1.bf16.msra.mxu0 %v2269_v5  ;;  %2435 = vmatpush1.bf16.msra.mxu1 %v2333_v57  ;;  %v2298_v5 = vunpack.c.l.s8.bf16 %v8846_v34  ;;  %v2297_v57 = vunpack.c.l.s8.bf16 %v8848_v36 }
 0x2c4   :  { %2395 = vmatprep.subr.bf16.mxu0 %v2266_v27  ;;  %2436 = vmatprep.subr.bf16.mxu1 %v2330_v44  ;;  %v2361_v27 = vunpack.c.l.s8.bf16 %v8849_v58  ;;  %v8850_v44 = vld [vmem:[#allocation135_spill] sm:$0xff] }
 0x2c7   :  { %2396 = vmatpush1.bf16.msra.mxu0 %v2265_v59  ;;  %2437 = vmatpush1.bf16.msra.mxu1 %v2329_v35  ;;  %v2294_v59 = vunpack.c.h.s8.bf16 %v8850_v44  ;;  %v8851_v35 = vld [vmem:[#allocation167_spill] sm:$0xff] }
 0x2c8   :  { %2397 = vmatprep.subr.bf16.mxu0 %v2262_v21  ;;  %2438 = vmatprep.subr.bf16.mxu1 %v2326_v51  ;;  %v2358_v26 = vunpack.c.h.s8.bf16 %v8851_v35  ;;  %v8852_v21 = vld [vmem:[#allocation134_spill] sm:$0xff]  ;;  %v2354_v10 = vunpack.c.l.s8.bf16 %v8851_v35 }
 0x2c9   :  { %v2293_v4 = vunpack.c.h.s8.bf16 %v8852_v21  ;;  %v8853_v51 = vld [vmem:[#allocation166_spill] sm:$0xff] }
 0x2ca   :  { %v2357_v50 = vunpack.c.h.s8.bf16 %v8853_v51 }
 0x2cb   :  { %2398 = vmatpush1.bf16.msra.mxu0 %v2261_v61  ;;  %2439 = vmatpush1.bf16.msra.mxu1 %v2325_v11  ;;  %v2290_v61 = vunpack.c.l.s8.bf16 %v8850_v44  ;;  %v2289_v11 = vunpack.c.l.s8.bf16 %v8852_v21 }
 0x2cc   :  { %2399 = vmatprep.subr.bf16.mxu0 %v2258_v47  ;;  %2440 = vmatprep.subr.bf16.mxu1 %v2322_v23  ;;  %v2353_v47 = vunpack.c.l.s8.bf16 %v8853_v51  ;;  %v8854_v23 = vld [vmem:[#allocation133_spill] sm:$0xff] }
 0x2cf   :  { %2400 = vmatpush1.bf16.msra.mxu0 %v2257_v13  ;;  %2441 = vmatpush1.bf16.msra.mxu1 %v2321_v46  ;;  %v2288_v13 = vunpack.c.h.s8.bf16 %v8854_v23  ;;  %v8855_v46 = vld [vmem:[#allocation165_spill] sm:$0xff] }
 0x2d0   :  { %2401 = vmatprep.subr.bf16.mxu0 %v2318_v33  ;;  %2442 = vmatprep.subr.bf16.mxu1 %v2382_v45  ;;  %v2352_v16 = vunpack.c.h.s8.bf16 %v8855_v46  ;;  %v8856_v33 = vld [vmem:[#allocation132_spill] sm:$0xff]  ;;  %v2348_v15 = vunpack.c.l.s8.bf16 %v8855_v46 }
 0x2d1   :  { %v2287_v38 = vunpack.c.h.s8.bf16 %v8856_v33  ;;  %v8857_v45 = vld [vmem:[#allocation164_spill] sm:$0xff] }
 0x2d2   :  { %v2351_v24 = vunpack.c.h.s8.bf16 %v8857_v45 }
 0x2d3   :  { %2402 = vmatpush2.bf16.msra.mxu0 %v2317_v41  ;;  %2443 = vmatpush2.bf16.msra.mxu1 %v2381_v25  ;;  %v2284_v41 = vunpack.c.l.s8.bf16 %v8854_v23  ;;  %v2283_v25 = vunpack.c.l.s8.bf16 %v8856_v33 }
 0x2d4   :  { %2403 = vmatprep.subr.bf16.mxu0 %v2314_v54  ;;  %2444 = vmatprep.subr.bf16.mxu1 %v2378_v18  ;;  %v2347_v54 = vunpack.c.l.s8.bf16 %v8857_v45  ;;  %v8858_v18 = vld [vmem:[#allocation129_spill] sm:$0xff] }
 0x2d7   :  { %2404 = vmatpush2.bf16.msra.mxu0 %v2313_v53  ;;  %2445 = vmatpush2.bf16.msra.mxu1 %v2377_v28  ;;  %v2280_v53 = vunpack.c.h.s8.bf16 %v8858_v18  ;;  %v8859_v28 = vld [vmem:[#allocation161_spill] sm:$0xff] }
 0x2d8   :  { %2405 = vmatprep.subr.bf16.mxu0 %v2310_v60  ;;  %2446 = vmatprep.subr.bf16.mxu1 %v2374_v12  ;;  %v2344_v40 = vunpack.c.h.s8.bf16 %v8859_v28  ;;  %v8860_v60 = vld [vmem:[#allocation128_spill] sm:$0xff]  ;;  %v2340_v20 = vunpack.c.l.s8.bf16 %v8859_v28 }
 0x2d9   :  { %v2279_v63 = vunpack.c.h.s8.bf16 %v8860_v60  ;;  %v8861_v12 = vld [vmem:[#allocation160_spill] sm:$0xff] }
 0x2da   :  { %v2343_v49 = vunpack.c.h.s8.bf16 %v8861_v12 }
 0x2db   :  { %2406 = vmatpush2.bf16.msra.mxu0 %v2309_v37  ;;  %2447 = vmatpush2.bf16.msra.mxu1 %v2373_v17  ;;  %v2276_v37 = vunpack.c.l.s8.bf16 %v8858_v18  ;;  %v2275_v17 = vunpack.c.l.s8.bf16 %v8860_v60 }
 0x2dc   :  { %2407 = vmatprep.subr.bf16.mxu0 %v2306_v29  ;;  %2448 = vmatprep.subr.bf16.mxu1 %v2370_v52  ;;  %v8863_v52 = vld [vmem:[#allocation157_spill] sm:$0xff] }
 0x2dd   :  { %v2332_v36 = vunpack.c.l.s8.bf16 %v8863_v52 }
 0x2df   :  { %2408 = vmatpush2.bf16.msra.mxu0 %v2305_v31  ;;  %2449 = vmatpush2.bf16.msra.mxu1 %v2369_v22  ;;  %v2336_v31 = vunpack.c.h.s8.bf16 %v8863_v52  ;;  %v8864_v22 = vld [vmem:[#allocation124_spill] sm:$0xff] }
 0x2e0   :  { %2409 = vmatprep.subr.bf16.mxu0 %v2302_v0  ;;  %2450 = vmatprep.subr.bf16.mxu1 %v2366_v2  ;;  %v2271_v34 = vunpack.c.h.s8.bf16 %v8864_v22  ;;  %v8865_v0 = vld [vmem:[#allocation156_spill] sm:$0xff] }
 0x2e1   :  { %v2335_v56 = vunpack.c.h.s8.bf16 %v8865_v0  ;;  %v2331_v58 = vunpack.c.l.s8.bf16 %v8865_v0 }
 0x2e3   :  { %2410 = vmatpush2.bf16.msra.mxu0 %v2301_v39  ;;  %2451 = vmatpush2.bf16.msra.mxu1 %v2365_v3  ;;  %v2267_v39 = vunpack.c.l.s8.bf16 %v8864_v22  ;;  %v8866_v3 = vld [vmem:[#allocation121_spill] sm:$0xff] }
 0x2e4   :  { %2411 = vmatprep.subr.bf16.mxu0 %v2298_v5  ;;  %2452 = vmatprep.subr.bf16.mxu1 %v2362_v43  ;;  %v2264_v5 = vunpack.c.h.s8.bf16 %v8866_v3  ;;  %v8867_v43 = vld [vmem:[#allocation153_spill] sm:$0xff] }
 0x2e5   :  { %v2324_v21 = vunpack.c.l.s8.bf16 %v8867_v43 }
 0x2e7   :  { %2412 = vmatpush2.bf16.msra.mxu0 %v2297_v57  ;;  %2453 = vmatpush2.bf16.msra.mxu1 %v2361_v27  ;;  %v2328_v57 = vunpack.c.h.s8.bf16 %v8867_v43  ;;  %v8868_v27 = vld [vmem:[#allocation120_spill] sm:$0xff] }
 0x2e8   :  { %2413 = vmatprep.subr.bf16.mxu0 %v2294_v59  ;;  %2454 = vmatprep.subr.bf16.mxu1 %v2358_v26  ;;  %v2263_v44 = vunpack.c.h.s8.bf16 %v8868_v27  ;;  %v8869_v59 = vld [vmem:[#allocation152_spill] sm:$0xff]  ;;  %v2260_v26 = vunpack.c.l.s8.bf16 %v8866_v3 }
 0x2e9   :  { %v2327_v35 = vunpack.c.h.s8.bf16 %v8869_v59  ;;  %v2323_v51 = vunpack.c.l.s8.bf16 %v8869_v59 }
 0x2eb   :  { %2414 = vmatpush2.bf16.msra.mxu0 %v2293_v4  ;;  %2455 = vmatpush2.bf16.msra.mxu1 %v2357_v50  ;;  %v2259_v4 = vunpack.c.l.s8.bf16 %v8868_v27  ;;  %v8870_v50 = vld [vmem:[#allocation149_spill] sm:$0xff] }
 0x2ec   :  { %2415 = vmatprep.subr.bf16.mxu0 %v2290_v61  ;;  %2456 = vmatprep.subr.bf16.mxu1 %v2354_v10  ;;  %v2320_v61 = vunpack.c.h.s8.bf16 %v8870_v50  ;;  %v8871_v10 = vld [vmem:[#allocation181_spill] sm:$0xff] }
 0x2ed   :  { %v2380_v33 = vunpack.c.l.s8.bf16 %v8871_v10 }
 0x2ef   :  { %2416 = vmatpush2.bf16.msra.mxu0 %v2289_v11  ;;  %2457 = vmatpush2.bf16.msra.mxu1 %v2353_v47  ;;  %v2384_v11 = vunpack.c.h.s8.bf16 %v8871_v10  ;;  %v8872_v47 = vld [vmem:[#allocation148_spill] sm:$0xff] }
 0x2f0   :  { %2467 = vmatprep.subr.bf16.mxu0 %v2288_v13  ;;  %2508 = vmatprep.subr.bf16.mxu1 %v2352_v16  ;;  %v2319_v23 = vunpack.c.h.s8.bf16 %v8872_v47  ;;  %v8873_v13 = vld [vmem:[#allocation180_spill] sm:$0xff]  ;;  %v2316_v16 = vunpack.c.l.s8.bf16 %v8870_v50 }
 0x2f1   :  { %v2383_v46 = vunpack.c.h.s8.bf16 %v8873_v13  ;;  %v2379_v45 = vunpack.c.l.s8.bf16 %v8873_v13 }
 0x2f2   :  { %2418 = vmatmul.mubr.bf16.vlgmr.msra.gmra.mxu0 %v7587_v8  ;;  %2459 = vmatmul.mubr.bf16.vlgmr.msra.gmra.mxu1 %v7591_v14 }
 0x2f3   :  { %2468 = vmatpush1.bf16.msra.mxu0 %v2287_v38  ;;  %2509 = vmatpush1.bf16.msra.mxu1 %v2351_v24  ;;  %v2315_v38 = vunpack.c.l.s8.bf16 %v8872_v47  ;;  %v8874_v24 = vld [vmem:[#allocation145_spill] sm:$0xff] }
 0x2f4   :  { %2469 = vmatprep.subr.bf16.mxu0 %v2284_v41  ;;  %2510 = vmatprep.subr.bf16.mxu1 %v2348_v15  ;;  %v2312_v41 = vunpack.c.h.s8.bf16 %v8874_v24  ;;  %v8875_v15 = vld [vmem:[#allocation177_spill] sm:$0xff] }
 0x2f5   :  { %2499 = vmatprep.mubr.bf16.mxu0 %v7589_v55  ;;  %2540 = vmatprep.mubr.bf16.mxu1 %v7593_v6  ;;  %v2339_v55 = vunpack.c.l.s8.bf16 %v8861_v12  ;;  %v8862_v6 = vld [vmem:[#allocation125_spill] sm:$0xff]  ;;  %v2372_v60 = vunpack.c.l.s8.bf16 %v8875_v15 }
 0x2f6   :  { %v2272_v29 = vunpack.c.h.s8.bf16 %v8862_v6  ;;  %v2268_v2 = vunpack.c.l.s8.bf16 %v8862_v6 }
 0x2f7   :  { %2470 = vmatpush1.bf16.msra.mxu0 %v2283_v25  ;;  %2511 = vmatpush1.bf16.msra.mxu1 %v2347_v54  ;;  %v2376_v25 = vunpack.c.h.s8.bf16 %v8875_v15  ;;  %v8876_v54 = vld [vmem:[#allocation144_spill] sm:$0xff] }
 0x2f8   :  { %2471 = vmatprep.subr.bf16.mxu0 %v2280_v53  ;;  %2512 = vmatprep.subr.bf16.mxu1 %v2344_v40  ;;  %v2311_v18 = vunpack.c.h.s8.bf16 %v8876_v54  ;;  %v8877_v53 = vld [vmem:[#allocation176_spill] sm:$0xff]  ;;  %v2308_v40 = vunpack.c.l.s8.bf16 %v8874_v24 }
 0x2f9   :  { %v2375_v28 = vunpack.c.h.s8.bf16 %v8877_v53  ;;  %v2371_v12 = vunpack.c.l.s8.bf16 %v8877_v53 }
 0x2fb   :  { %2472 = vmatpush1.bf16.msra.mxu0 %v2279_v63  ;;  %2513 = vmatpush1.bf16.msra.mxu1 %v2343_v49  ;;  %v2307_v63 = vunpack.c.l.s8.bf16 %v8876_v54  ;;  %v8878_v49 = vld [vmem:[#allocation141_spill] sm:$0xff] }
 0x2fc   :  { %2473 = vmatprep.subr.bf16.mxu0 %v2276_v37  ;;  %2514 = vmatprep.subr.bf16.mxu1 %v2340_v20  ;;  %v2304_v37 = vunpack.c.h.s8.bf16 %v8878_v49  ;;  %v8879_v20 = vld [vmem:[#allocation173_spill] sm:$0xff] }
 0x2fd   :  { %v2364_v22 = vunpack.c.l.s8.bf16 %v8879_v20 }
 0x2ff   :  { %2474 = vmatpush1.bf16.msra.mxu0 %v2275_v17  ;;  %2515 = vmatpush1.bf16.msra.mxu1 %v2339_v55  ;;  %v2368_v17 = vunpack.c.h.s8.bf16 %v8879_v20  ;;  %v8880_v55 = vld [vmem:[#allocation140_spill] sm:$0xff] }
 0x300   :  { %2475 = vmatprep.subr.bf16.mxu0 %v2272_v29  ;;  %2516 = vmatprep.subr.bf16.mxu1 %v2336_v31  ;;  %v2303_v6 = vunpack.c.h.s8.bf16 %v8880_v55  ;;  %v8881_v29 = vld [vmem:[#allocation172_spill] sm:$0xff]  ;;  %v2300_v31 = vunpack.c.l.s8.bf16 %v8878_v49 }
 0x301   :  { %v2367_v52 = vunpack.c.h.s8.bf16 %v8881_v29  ;;  %v2363_v0 = vunpack.c.l.s8.bf16 %v8881_v29 }
 0x303   :  { %2476 = vmatpush1.bf16.msra.mxu0 %v2271_v34  ;;  %2517 = vmatpush1.bf16.msra.mxu1 %v2335_v56  ;;  %v2299_v34 = vunpack.c.l.s8.bf16 %v8880_v55  ;;  %v8882_v56 = vld [vmem:[#allocation137_spill] sm:$0xff] }
 0x304   :  { %2477 = vmatprep.subr.bf16.mxu0 %v2268_v2  ;;  %2518 = vmatprep.subr.bf16.mxu1 %v2332_v36  ;;  %v2296_v2 = vunpack.c.h.s8.bf16 %v8882_v56  ;;  %v8883_v36 = vld [vmem:[#allocation169_spill] sm:$0xff] }
 0x305   :  { %v2356_v27 = vunpack.c.l.s8.bf16 %v8883_v36 }
 0x307   :  { %2478 = vmatpush1.bf16.msra.mxu0 %v2267_v39  ;;  %2519 = vmatpush1.bf16.msra.mxu1 %v2331_v58  ;;  %v2360_v39 = vunpack.c.h.s8.bf16 %v8883_v36  ;;  %v8884_v58 = vld [vmem:[#allocation136_spill] sm:$0xff] }
 0x308   :  { %2479 = vmatprep.subr.bf16.mxu0 %v2264_v5  ;;  %2520 = vmatprep.subr.bf16.mxu1 %v2328_v57  ;;  %v2295_v3 = vunpack.c.h.s8.bf16 %v8884_v58  ;;  %v8885_v5 = vld [vmem:[#allocation168_spill] sm:$0xff]  ;;  %v2292_v57 = vunpack.c.l.s8.bf16 %v8882_v56 }
 0x309   :  { %v2359_v43 = vunpack.c.h.s8.bf16 %v8885_v5  ;;  %v2355_v59 = vunpack.c.l.s8.bf16 %v8885_v5 }
 0x30b   :  { %2480 = vmatpush1.bf16.msra.mxu0 %v2263_v44  ;;  %2521 = vmatpush1.bf16.msra.mxu1 %v2327_v35  ;;  %v2291_v44 = vunpack.c.l.s8.bf16 %v8884_v58  ;;  %v8886_v35 = vld [vmem:[#allocation67_spill] sm:$0xff] }
 0x30c   :  { %2481 = vmatprep.subr.bf16.mxu0 %v2260_v26  ;;  %2522 = vmatprep.subr.bf16.mxu1 %v2324_v21  ;;  %v2094_v26 = vunpack.c.h.s8.bf16 %v8886_v35  ;;  %v8887_v21 = vld [vmem:[#allocation99_spill] sm:$0xff] }
 0x30d   :  { %v2154_v47 = vunpack.c.l.s8.bf16 %v8887_v21 }
 0x30f   :  { %2482 = vmatpush1.bf16.msra.mxu0 %v2259_v4  ;;  %2523 = vmatpush1.bf16.msra.mxu1 %v2323_v51  ;;  %v2158_v4 = vunpack.c.h.s8.bf16 %v8887_v21  ;;  %v8888_v51 = vld [vmem:[#allocation66_spill] sm:$0xff] }
 0x310   :  { %2483 = vmatprep.subr.bf16.mxu0 %v2320_v61  ;;  %2524 = vmatprep.subr.bf16.mxu1 %v2384_v11  ;;  %v2093_v50 = vunpack.c.h.s8.bf16 %v8888_v51  ;;  %v8889_v61 = vld [vmem:[#allocation98_spill] sm:$0xff]  ;;  %v2090_v11 = vunpack.c.l.s8.bf16 %v8886_v35 }
 0x311   :  { %v2157_v10 = vunpack.c.h.s8.bf16 %v8889_v61  ;;  %v2153_v13 = vunpack.c.l.s8.bf16 %v8889_v61 }
 0x313   :  { %2484 = vmatpush2.bf16.msra.mxu0 %v2319_v23  ;;  %2525 = vmatpush2.bf16.msra.mxu1 %v2383_v46  ;;  %v2089_v23 = vunpack.c.l.s8.bf16 %v8888_v51  ;;  %v8890_v46 = vld [vmem:[#allocation63_spill] sm:$0xff] }
 0x314   :  { %2485 = vmatprep.subr.bf16.mxu0 %v2316_v16  ;;  %2526 = vmatprep.subr.bf16.mxu1 %v2380_v33  ;;  %v2086_v16 = vunpack.c.h.s8.bf16 %v8890_v46  ;;  %v8891_v33 = vld [vmem:[#allocation95_spill] sm:$0xff] }
 0x315   :  { %v2146_v15 = vunpack.c.l.s8.bf16 %v8891_v33 }
 0x317   :  { %2486 = vmatpush2.bf16.msra.mxu0 %v2315_v38  ;;  %2527 = vmatpush2.bf16.msra.mxu1 %v2379_v45  ;;  %v2150_v38 = vunpack.c.h.s8.bf16 %v8891_v33  ;;  %v8893_v45 = vld [vmem:[#allocation94_spill] sm:$0xff] }
 0x318   :  { %2487 = vmatprep.subr.bf16.mxu0 %v2312_v41  ;;  %2528 = vmatprep.subr.bf16.mxu1 %v2376_v25  ;;  %v2149_v24 = vunpack.c.h.s8.bf16 %v8893_v45  ;;  %v2082_v41 = vunpack.c.l.s8.bf16 %v8890_v46  ;;  %v2145_v54 = vunpack.c.l.s8.bf16 %v8893_v45 }
 0x31b   :  { %2488 = vmatpush2.bf16.msra.mxu0 %v2311_v18  ;;  %2529 = vmatpush2.bf16.msra.mxu1 %v2375_v28  ;;  %v8894_v18 = vld [vmem:[#allocation59_spill] sm:$0xff] }
 0x31c   :  { %2489 = vmatprep.subr.bf16.mxu0 %v2308_v40  ;;  %2530 = vmatprep.subr.bf16.mxu1 %v2372_v60  ;;  %v2078_v53 = vunpack.c.h.s8.bf16 %v8894_v18  ;;  %v8895_v28 = vld [vmem:[#allocation91_spill] sm:$0xff]  ;;  %v8896_v60 = vld [vmem:[#allocation58_spill] sm:$0xff] }
 0x31d   :  { %v2142_v40 = vunpack.c.h.s8.bf16 %v8895_v28  ;;  %v2138_v20 = vunpack.c.l.s8.bf16 %v8895_v28 }
 0x31f   :  { %2490 = vmatpush2.bf16.msra.mxu0 %v2307_v63  ;;  %2531 = vmatpush2.bf16.msra.mxu1 %v2371_v12  ;;  %v2077_v63 = vunpack.c.h.s8.bf16 %v8896_v60  ;;  %v8897_v12 = vld [vmem:[#allocation90_spill] sm:$0xff] }
 0x320   :  { %2491 = vmatprep.subr.bf16.mxu0 %v2304_v37  ;;  %2532 = vmatprep.subr.bf16.mxu1 %v2368_v17  ;;  %v2141_v49 = vunpack.c.h.s8.bf16 %v8897_v12  ;;  %v2074_v37 = vunpack.c.l.s8.bf16 %v8894_v18  ;;  %v2073_v17 = vunpack.c.l.s8.bf16 %v8896_v60  ;;  %v2137_v55 = vunpack.c.l.s8.bf16 %v8897_v12 }
 0x323   :  { %2492 = vmatpush2.bf16.msra.mxu0 %v2303_v6  ;;  %2533 = vmatpush2.bf16.msra.mxu1 %v2367_v52  ;;  %v8898_v6 = vld [vmem:[#allocation55_spill] sm:$0xff] }
 0x324   :  { %2493 = vmatprep.subr.bf16.mxu0 %v2300_v31  ;;  %2534 = vmatprep.subr.bf16.mxu1 %v2364_v22  ;;  %v2070_v29 = vunpack.c.h.s8.bf16 %v8898_v6  ;;  %v8899_v52 = vld [vmem:[#allocation87_spill] sm:$0xff]  ;;  %v8900_v22 = vld [vmem:[#allocation54_spill] sm:$0xff] }
 0x325   :  { %v2134_v31 = vunpack.c.h.s8.bf16 %v8899_v52  ;;  %v2130_v36 = vunpack.c.l.s8.bf16 %v8899_v52 }
 0x327   :  { %2494 = vmatpush2.bf16.msra.mxu0 %v2299_v34  ;;  %2535 = vmatpush2.bf16.msra.mxu1 %v2363_v0  ;;  %v2069_v34 = vunpack.c.h.s8.bf16 %v8900_v22  ;;  %v8901_v0 = vld [vmem:[#allocation86_spill] sm:$0xff] }
 0x328   :  { %2495 = vmatprep.subr.bf16.mxu0 %v2296_v2  ;;  %2536 = vmatprep.subr.bf16.mxu1 %v2360_v39  ;;  %v2133_v56 = vunpack.c.h.s8.bf16 %v8901_v0  ;;  %v2066_v2 = vunpack.c.l.s8.bf16 %v8898_v6  ;;  %v2065_v39 = vunpack.c.l.s8.bf16 %v8900_v22  ;;  %v2129_v58 = vunpack.c.l.s8.bf16 %v8901_v0 }
 0x32b   :  { %2496 = vmatpush2.bf16.msra.mxu0 %v2295_v3  ;;  %2537 = vmatpush2.bf16.msra.mxu1 %v2359_v43  ;;  %v8902_v3 = vld [vmem:[#allocation83_spill] sm:$0xff] }
 0x32c   :  { %2497 = vmatprep.subr.bf16.mxu0 %v2292_v57  ;;  %2538 = vmatprep.subr.bf16.mxu1 %v2356_v27  ;;  %v2126_v5 = vunpack.c.h.s8.bf16 %v8902_v3  ;;  %v8903_v43 = vld [vmem:[#allocation115_spill] sm:$0xff]  ;;  %v8904_v27 = vld [vmem:[#allocation82_spill] sm:$0xff] }
 0x32d   :  { %v2190_v57 = vunpack.c.h.s8.bf16 %v8903_v43  ;;  %v2186_v21 = vunpack.c.l.s8.bf16 %v8903_v43 }
 0x32f   :  { %2498 = vmatpush2.bf16.msra.mxu0 %v2291_v44  ;;  %2539 = vmatpush2.bf16.msra.mxu1 %v2355_v59  ;;  %v2125_v44 = vunpack.c.h.s8.bf16 %v8904_v27  ;;  %v8905_v59 = vld [vmem:[#allocation114_spill] sm:$0xff] }
 0x330   :  { %2549 = vmatprep.subr.bf16.mxu0 %v2094_v26  ;;  %2590 = vmatprep.subr.bf16.mxu1 %v2158_v4  ;;  %v2189_v35 = vunpack.c.h.s8.bf16 %v8905_v59  ;;  %v2122_v26 = vunpack.c.l.s8.bf16 %v8902_v3  ;;  %v2121_v4 = vunpack.c.l.s8.bf16 %v8904_v27  ;;  %v2185_v51 = vunpack.c.l.s8.bf16 %v8905_v59 }
 0x332   :  { %2500 = vmatmul.mubr.bf16.vlgmr.msra.gmra.mxu0 %v7587_v8  ;;  %2541 = vmatmul.mubr.bf16.vlgmr.msra.gmra.mxu1 %v7591_v14  ;;  %v8892_v8 = vld [vmem:[#allocation62_spill] sm:$0xff] }
 0x333   :  { %2550 = vmatpush1.bf16.msra.mxu0 %v2093_v50  ;;  %2591 = vmatpush1.bf16.msra.mxu1 %v2157_v10  ;;  %v2085_v14 = vunpack.c.h.s8.bf16 %v8892_v8  ;;  %v2081_v25 = vunpack.c.l.s8.bf16 %v8892_v8  ;;  %v8906_v50 = vld [vmem:[#allocation79_spill] sm:$0xff] }
 0x334   :  { %2551 = vmatprep.subr.bf16.mxu0 %v2090_v11  ;;  %2592 = vmatprep.subr.bf16.mxu1 %v2154_v47  ;;  %v2118_v61 = vunpack.c.h.s8.bf16 %v8906_v50  ;;  %v8907_v10 = vld [vmem:[#allocation111_spill] sm:$0xff]  ;;  %v8908_v47 = vld [vmem:[#allocation78_spill] sm:$0xff] }
 0x335   :  { %2581 = vmatprep.mubr.bf16.mxu0 %v7581_v48  ;;  %2622 = vmatprep.mubr.bf16.mxu1 %v7585_v19  ;;  %v2182_v11 = vunpack.c.h.s8.bf16 %v8907_v10  ;;  %v2178_v33 = vunpack.c.l.s8.bf16 %v8907_v10 }
 0x337   :  { %2552 = vmatpush1.bf16.msra.mxu0 %v2089_v23  ;;  %2593 = vmatpush1.bf16.msra.mxu1 %v2153_v13  ;;  %v2117_v23 = vunpack.c.h.s8.bf16 %v8908_v47  ;;  %v8909_v13 = vld [vmem:[#allocation110_spill] sm:$0xff] }
 0x338   :  { %2553 = vmatprep.subr.bf16.mxu0 %v2086_v16  ;;  %2594 = vmatprep.subr.bf16.mxu1 %v2150_v38  ;;  %v2181_v46 = vunpack.c.h.s8.bf16 %v8909_v13  ;;  %v2114_v16 = vunpack.c.l.s8.bf16 %v8906_v50  ;;  %v2113_v38 = vunpack.c.l.s8.bf16 %v8908_v47  ;;  %v2177_v8 = vunpack.c.l.s8.bf16 %v8909_v13 }
 0x33b   :  { %2554 = vmatpush1.bf16.msra.mxu0 %v2085_v14  ;;  %2595 = vmatpush1.bf16.msra.mxu1 %v2149_v24  ;;  %v8910_v14 = vld [vmem:[#allocation75_spill] sm:$0xff] }
 0x33c   :  { %2555 = vmatprep.subr.bf16.mxu0 %v2082_v41  ;;  %2596 = vmatprep.subr.bf16.mxu1 %v2146_v15  ;;  %v2110_v45 = vunpack.c.h.s8.bf16 %v8910_v14  ;;  %v8911_v24 = vld [vmem:[#allocation107_spill] sm:$0xff]  ;;  %v8912_v15 = vld [vmem:[#allocation74_spill] sm:$0xff] }
 0x33d   :  { %v2174_v41 = vunpack.c.h.s8.bf16 %v8911_v24  ;;  %v2170_v28 = vunpack.c.l.s8.bf16 %v8911_v24 }
 0x33f   :  { %2556 = vmatpush1.bf16.msra.mxu0 %v2081_v25  ;;  %2597 = vmatpush1.bf16.msra.mxu1 %v2145_v54  ;;  %v2109_v25 = vunpack.c.h.s8.bf16 %v8912_v15  ;;  %v8913_v54 = vld [vmem:[#allocation106_spill] sm:$0xff] }
 0x340   :  { %2557 = vmatprep.subr.bf16.mxu0 %v2078_v53  ;;  %2598 = vmatprep.subr.bf16.mxu1 %v2142_v40  ;;  %v2173_v18 = vunpack.c.h.s8.bf16 %v8913_v54  ;;  %v2106_v53 = vunpack.c.l.s8.bf16 %v8910_v14  ;;  %v2105_v40 = vunpack.c.l.s8.bf16 %v8912_v15  ;;  %v2169_v60 = vunpack.c.l.s8.bf16 %v8913_v54 }
 0x343   :  { %2558 = vmatpush1.bf16.msra.mxu0 %v2077_v63  ;;  %2599 = vmatpush1.bf16.msra.mxu1 %v2141_v49  ;;  %v8914_v63 = vld [vmem:[#allocation71_spill] sm:$0xff] }
 0x344   :  { %2559 = vmatprep.subr.bf16.mxu0 %v2074_v37  ;;  %2600 = vmatprep.subr.bf16.mxu1 %v2138_v20  ;;  %v2102_v12 = vunpack.c.h.s8.bf16 %v8914_v63  ;;  %v8915_v49 = vld [vmem:[#allocation103_spill] sm:$0xff]  ;;  %v8916_v20 = vld [vmem:[#allocation70_spill] sm:$0xff] }
 0x345   :  { %v2166_v37 = vunpack.c.h.s8.bf16 %v8915_v49  ;;  %v2162_v52 = vunpack.c.l.s8.bf16 %v8915_v49 }
 0x347   :  { %2560 = vmatpush1.bf16.msra.mxu0 %v2073_v17  ;;  %2601 = vmatpush1.bf16.msra.mxu1 %v2137_v55  ;;  %v2101_v17 = vunpack.c.h.s8.bf16 %v8916_v20  ;;  %v8917_v55 = vld [vmem:[#allocation102_spill] sm:$0xff] }
 0x348   :  { %2561 = vmatprep.subr.bf16.mxu0 %v2070_v29  ;;  %2602 = vmatprep.subr.bf16.mxu1 %v2134_v31  ;;  %v2165_v6 = vunpack.c.h.s8.bf16 %v8917_v55  ;;  %v2098_v29 = vunpack.c.l.s8.bf16 %v8914_v63  ;;  %v2097_v31 = vunpack.c.l.s8.bf16 %v8916_v20  ;;  %v2161_v22 = vunpack.c.l.s8.bf16 %v8917_v55 }
 0x34b   :  { %2562 = vmatpush1.bf16.msra.mxu0 %v2069_v34  ;;  %2603 = vmatpush1.bf16.msra.mxu1 %v2133_v56  ;;  %v8918_v34 = vld [vmem:[#allocation69_spill] sm:$0xff] }
 0x34c   :  { %2563 = vmatprep.subr.bf16.mxu0 %v2066_v2  ;;  %2604 = vmatprep.subr.bf16.mxu1 %v2130_v36  ;;  %v2096_v0 = vunpack.c.h.s8.bf16 %v8918_v34  ;;  %v8919_v56 = vld [vmem:[#allocation101_spill] sm:$0xff]  ;;  %v8920_v36 = vld [vmem:[#allocation68_spill] sm:$0xff] }
 0x34d   :  { %v2160_v2 = vunpack.c.h.s8.bf16 %v8919_v56  ;;  %v2156_v43 = vunpack.c.l.s8.bf16 %v8919_v56 }
 0x34f   :  { %2564 = vmatpush1.bf16.msra.mxu0 %v2065_v39  ;;  %2605 = vmatpush1.bf16.msra.mxu1 %v2129_v58  ;;  %v2095_v39 = vunpack.c.h.s8.bf16 %v8920_v36  ;;  %v8921_v58 = vld [vmem:[#allocation100_spill] sm:$0xff] }
 0x350   :  { %2565 = vmatprep.subr.bf16.mxu0 %v2126_v5  ;;  %2606 = vmatprep.subr.bf16.mxu1 %v2190_v57  ;;  %v2159_v3 = vunpack.c.h.s8.bf16 %v8921_v58  ;;  %v2092_v5 = vunpack.c.l.s8.bf16 %v8918_v34  ;;  %v2091_v57 = vunpack.c.l.s8.bf16 %v8920_v36  ;;  %v2155_v27 = vunpack.c.l.s8.bf16 %v8921_v58 }
 0x353   :  { %2566 = vmatpush2.bf16.msra.mxu0 %v2125_v44  ;;  %2607 = vmatpush2.bf16.msra.mxu1 %v2189_v35  ;;  %v8922_v44 = vld [vmem:[#allocation65_spill] sm:$0xff] }
 0x354   :  { %2567 = vmatprep.subr.bf16.mxu0 %v2122_v26  ;;  %2608 = vmatprep.subr.bf16.mxu1 %v2186_v21  ;;  %v2088_v59 = vunpack.c.h.s8.bf16 %v8922_v44  ;;  %v8923_v35 = vld [vmem:[#allocation97_spill] sm:$0xff]  ;;  %v8924_v21 = vld [vmem:[#allocation64_spill] sm:$0xff] }
 0x355   :  { %v2152_v26 = vunpack.c.h.s8.bf16 %v8923_v35  ;;  %v2148_v10 = vunpack.c.l.s8.bf16 %v8923_v35 }
 0x357   :  { %2568 = vmatpush2.bf16.msra.mxu0 %v2121_v4  ;;  %2609 = vmatpush2.bf16.msra.mxu1 %v2185_v51  ;;  %v2087_v4 = vunpack.c.h.s8.bf16 %v8924_v21  ;;  %v8925_v51 = vld [vmem:[#allocation96_spill] sm:$0xff] }
 0x358   :  { %2569 = vmatprep.subr.bf16.mxu0 %v2118_v61  ;;  %2610 = vmatprep.subr.bf16.mxu1 %v2182_v11  ;;  %v2151_v50 = vunpack.c.h.s8.bf16 %v8925_v51  ;;  %v2084_v61 = vunpack.c.l.s8.bf16 %v8922_v44  ;;  %v2083_v11 = vunpack.c.l.s8.bf16 %v8924_v21 }
 0x35b   :  { %2570 = vmatpush2.bf16.msra.mxu0 %v2117_v23  ;;  %2611 = vmatpush2.bf16.msra.mxu1 %v2181_v46  ;;  %v8927_v23 = vld [vmem:[#allocation93_spill] sm:$0xff]  ;;  %v8928_v46 = vld [vmem:[#allocation60_spill] sm:$0xff] }
 0x35c   :  { %2571 = vmatprep.subr.bf16.mxu0 %v2114_v16  ;;  %2612 = vmatprep.subr.bf16.mxu1 %v2178_v33  ;;  %v2144_v13 = vunpack.c.h.s8.bf16 %v8927_v23  ;;  %v2079_v16 = vunpack.c.h.s8.bf16 %v8928_v46  ;;  %v8929_v33 = vld [vmem:[#allocation92_spill] sm:$0xff]  ;;  %v2140_v14 = vunpack.c.l.s8.bf16 %v8927_v23 }
 0x35d   :  { %v2139_v24 = vunpack.c.l.s8.bf16 %v8929_v33 }
 0x35f   :  { %2572 = vmatpush2.bf16.msra.mxu0 %v2113_v38  ;;  %2613 = vmatpush2.bf16.msra.mxu1 %v2177_v8  ;;  %v2143_v38 = vunpack.c.h.s8.bf16 %v8929_v33 }
 0x360   :  { %2573 = vmatprep.subr.bf16.mxu0 %v2110_v45  ;;  %2614 = vmatprep.subr.bf16.mxu1 %v2174_v41  ;;  %v2075_v45 = vunpack.c.l.s8.bf16 %v8928_v46  ;;  %v8930_v41 = vld [vmem:[#allocation57_spill] sm:$0xff] }
 0x361   :  { %v2072_v15 = vunpack.c.h.s8.bf16 %v8930_v41 }
 0x363   :  { %2574 = vmatpush2.bf16.msra.mxu0 %v2109_v25  ;;  %2615 = vmatpush2.bf16.msra.mxu1 %v2173_v18  ;;  %v8931_v25 = vld [vmem:[#allocation89_spill] sm:$0xff]  ;;  %v8932_v18 = vld [vmem:[#allocation56_spill] sm:$0xff] }
 0x364   :  { %2575 = vmatprep.subr.bf16.mxu0 %v2106_v53  ;;  %2616 = vmatprep.subr.bf16.mxu1 %v2170_v28  ;;  %v2136_v54 = vunpack.c.h.s8.bf16 %v8931_v25  ;;  %v2071_v53 = vunpack.c.h.s8.bf16 %v8932_v18  ;;  %v8933_v28 = vld [vmem:[#allocation88_spill] sm:$0xff]  ;;  %v2132_v63 = vunpack.c.l.s8.bf16 %v8931_v25 }
 0x365   :  { %v2131_v49 = vunpack.c.l.s8.bf16 %v8933_v28 }
 0x367   :  { %2576 = vmatpush2.bf16.msra.mxu0 %v2105_v40  ;;  %2617 = vmatpush2.bf16.msra.mxu1 %v2169_v60  ;;  %v2135_v40 = vunpack.c.h.s8.bf16 %v8933_v28  ;;  %v2068_v60 = vunpack.c.l.s8.bf16 %v8930_v41 }
 0x368   :  { %2577 = vmatprep.subr.bf16.mxu0 %v2102_v12  ;;  %2618 = vmatprep.subr.bf16.mxu1 %v2166_v37  ;;  %v2067_v12 = vunpack.c.l.s8.bf16 %v8932_v18  ;;  %v8934_v37 = vld [vmem:[#allocation85_spill] sm:$0xff] }
 0x369   :  { %v2128_v20 = vunpack.c.h.s8.bf16 %v8934_v37 }
 0x36b   :  { %2578 = vmatpush2.bf16.msra.mxu0 %v2101_v17  ;;  %2619 = vmatpush2.bf16.msra.mxu1 %v2165_v6  ;;  %v8935_v17 = vld [vmem:[#allocation117_spill] sm:$0xff]  ;;  %v8936_v6 = vld [vmem:[#allocation84_spill] sm:$0xff] }
 0x36c   :  { %2579 = vmatprep.subr.bf16.mxu0 %v2098_v29  ;;  %2620 = vmatprep.subr.bf16.mxu1 %v2162_v52  ;;  %v2192_v55 = vunpack.c.h.s8.bf16 %v8935_v17  ;;  %v2127_v29 = vunpack.c.h.s8.bf16 %v8936_v6  ;;  %v8937_v52 = vld [vmem:[#allocation116_spill] sm:$0xff]  ;;  %v2188_v34 = vunpack.c.l.s8.bf16 %v8935_v17 }
 0x36d   :  { %v2187_v56 = vunpack.c.l.s8.bf16 %v8937_v52 }
 0x36f   :  { %2580 = vmatpush2.bf16.msra.mxu0 %v2097_v31  ;;  %2621 = vmatpush2.bf16.msra.mxu1 %v2161_v22  ;;  %v2191_v31 = vunpack.c.h.s8.bf16 %v8937_v52  ;;  %v2124_v22 = vunpack.c.l.s8.bf16 %v8934_v37 }
 0x370   :  { %2631 = vmatprep.subr.bf16.mxu0 %v2096_v0  ;;  %2672 = vmatprep.subr.bf16.mxu1 %v2160_v2  ;;  %v2123_v0 = vunpack.c.l.s8.bf16 %v8936_v6  ;;  %v8938_v2 = vld [vmem:[#allocation81_spill] sm:$0xff] }
 0x371   :  { %v2120_v36 = vunpack.c.h.s8.bf16 %v8938_v2 }
 0x372   :  { %2582 = vmatmul.mubr.bf16.vlgmr.msra.gmra.mxu0 %v7579_v62  ;;  %2623 = vmatmul.mubr.bf16.vlgmr.msra.gmra.mxu1 %v7583_v1 }
 0x373   :  { %2632 = vmatpush1.bf16.msra.mxu0 %v2095_v39  ;;  %2673 = vmatpush1.bf16.msra.mxu1 %v2159_v3  ;;  %v8939_v39 = vld [vmem:[#allocation113_spill] sm:$0xff]  ;;  %v8940_v3 = vld [vmem:[#allocation80_spill] sm:$0xff] }
 0x374   :  { %2633 = vmatprep.subr.bf16.mxu0 %v2092_v5  ;;  %2674 = vmatprep.subr.bf16.mxu1 %v2156_v43  ;;  %v2184_v58 = vunpack.c.h.s8.bf16 %v8939_v39  ;;  %v2119_v5 = vunpack.c.h.s8.bf16 %v8940_v3  ;;  %v8941_v43 = vld [vmem:[#allocation112_spill] sm:$0xff]  ;;  %v2180_v44 = vunpack.c.l.s8.bf16 %v8939_v39 }
 0x375   :  { %2663 = vmatprep.mubr.bf16.mxu0 %v7581_v48  ;;  %2704 = vmatprep.mubr.bf16.mxu1 %v7585_v19  ;;  %v2147_v48 = vunpack.c.l.s8.bf16 %v8925_v51  ;;  %v8926_v19 = vld [vmem:[#allocation61_spill] sm:$0xff]  ;;  %v2179_v35 = vunpack.c.l.s8.bf16 %v8941_v43 }
 0x376   :  { %v2080_v47 = vunpack.c.h.s8.bf16 %v8926_v19  ;;  %v2076_v8 = vunpack.c.l.s8.bf16 %v8926_v19 }
 0x377   :  { %2634 = vmatpush1.bf16.msra.mxu0 %v2091_v57  ;;  %2675 = vmatpush1.bf16.msra.mxu1 %v2155_v27  ;;  %v2183_v57 = vunpack.c.h.s8.bf16 %v8941_v43  ;;  %v2116_v27 = vunpack.c.l.s8.bf16 %v8938_v2 }
 0x378   :  { %2635 = vmatprep.subr.bf16.mxu0 %v2088_v59  ;;  %2676 = vmatprep.subr.bf16.mxu1 %v2152_v26  ;;  %v2115_v59 = vunpack.c.l.s8.bf16 %v8940_v3  ;;  %v8942_v26 = vld [vmem:[#allocation77_spill] sm:$0xff] }
 0x379   :  { %v2112_v21 = vunpack.c.h.s8.bf16 %v8942_v26 }
 0x37b   :  { %2636 = vmatpush1.bf16.msra.mxu0 %v2087_v4  ;;  %2677 = vmatpush1.bf16.msra.mxu1 %v2151_v50  ;;  %v8943_v4 = vld [vmem:[#allocation109_spill] sm:$0xff]  ;;  %v8944_v50 = vld [vmem:[#allocation76_spill] sm:$0xff] }
 0x37c   :  { %2637 = vmatprep.subr.bf16.mxu0 %v2084_v61  ;;  %2678 = vmatprep.subr.bf16.mxu1 %v2148_v10  ;;  %v2176_v51 = vunpack.c.h.s8.bf16 %v8943_v4  ;;  %v2111_v61 = vunpack.c.h.s8.bf16 %v8944_v50  ;;  %v8945_v10 = vld [vmem:[#allocation108_spill] sm:$0xff]  ;;  %v2172_v19 = vunpack.c.l.s8.bf16 %v8943_v4 }
 0x37d   :  { %v2171_v23 = vunpack.c.l.s8.bf16 %v8945_v10 }
 0x37f   :  { %2638 = vmatpush1.bf16.msra.mxu0 %v2083_v11  ;;  %2679 = vmatpush1.bf16.msra.mxu1 %v2147_v48  ;;  %v2175_v11 = vunpack.c.h.s8.bf16 %v8945_v10  ;;  %v2108_v48 = vunpack.c.l.s8.bf16 %v8942_v26 }
 0x380   :  { %2639 = vmatprep.subr.bf16.mxu0 %v2080_v47  ;;  %2680 = vmatprep.subr.bf16.mxu1 %v2144_v13  ;;  %v2107_v47 = vunpack.c.l.s8.bf16 %v8944_v50  ;;  %v8946_v13 = vld [vmem:[#allocation73_spill] sm:$0xff] }
 0x381   :  { %v2104_v46 = vunpack.c.h.s8.bf16 %v8946_v13 }
 0x383   :  { %2640 = vmatpush1.bf16.msra.mxu0 %v2079_v16  ;;  %2681 = vmatpush1.bf16.msra.mxu1 %v2143_v38  ;;  %v8947_v16 = vld [vmem:[#allocation105_spill] sm:$0xff]  ;;  %v8948_v38 = vld [vmem:[#allocation72_spill] sm:$0xff] }
 0x384   :  { %2641 = vmatprep.subr.bf16.mxu0 %v2076_v8  ;;  %2682 = vmatprep.subr.bf16.mxu1 %v2140_v14  ;;  %v2168_v33 = vunpack.c.h.s8.bf16 %v8947_v16  ;;  %v2103_v8 = vunpack.c.h.s8.bf16 %v8948_v38  ;;  %v8949_v14 = vld [vmem:[#allocation104_spill] sm:$0xff]  ;;  %v2164_v41 = vunpack.c.l.s8.bf16 %v8947_v16 }
 0x385   :  { %v2163_v25 = vunpack.c.l.s8.bf16 %v8949_v14 }
 0x387   :  { %2642 = vmatpush1.bf16.msra.mxu0 %v2075_v45  ;;  %2683 = vmatpush1.bf16.msra.mxu1 %v2139_v24  ;;  %v2167_v45 = vunpack.c.h.s8.bf16 %v8949_v14  ;;  %v2100_v24 = vunpack.c.l.s8.bf16 %v8946_v13 }
 0x388   :  { %2643 = vmatprep.subr.bf16.mxu0 %v2072_v15  ;;  %2684 = vmatprep.subr.bf16.mxu1 %v2136_v54  ;;  %v2099_v15 = vunpack.c.l.s8.bf16 %v8948_v38 }
 0x38b   :  { %2644 = vmatpush1.bf16.msra.mxu0 %v2071_v53  ;;  %2685 = vmatpush1.bf16.msra.mxu1 %v2135_v40 }
 0x38c   :  { %2645 = vmatprep.subr.bf16.mxu0 %v2068_v60  ;;  %2686 = vmatprep.subr.bf16.mxu1 %v2132_v63 }
 0x38f   :  { %2646 = vmatpush1.bf16.msra.mxu0 %v2067_v12  ;;  %2687 = vmatpush1.bf16.msra.mxu1 %v2131_v49 }
 0x390   :  { %2647 = vmatprep.subr.bf16.mxu0 %v2128_v20  ;;  %2688 = vmatprep.subr.bf16.mxu1 %v2192_v55 }
 0x393   :  { %2648 = vmatpush2.bf16.msra.mxu0 %v2127_v29  ;;  %2689 = vmatpush2.bf16.msra.mxu1 %v2191_v31 }
 0x394   :  { %2649 = vmatprep.subr.bf16.mxu0 %v2124_v22  ;;  %2690 = vmatprep.subr.bf16.mxu1 %v2188_v34 }
 0x397   :  { %2650 = vmatpush2.bf16.msra.mxu0 %v2123_v0  ;;  %2691 = vmatpush2.bf16.msra.mxu1 %v2187_v56  ;;  %v2713_v0 = vld [vmem:[#allocation18] sm:$0xf] }
 0x398   :  { %2651 = vmatprep.subr.bf16.mxu0 %v2120_v36  ;;  %2692 = vmatprep.subr.bf16.mxu1 %v2184_v58  ;;  %v2718_v39 = vrot.slane %v2713_v0, %v7563_v9  ;;  %v2726_v13 = vrot.slane %v2713_v0, %v7567_v30  ;;  %v2730_v14 = vrot.slane %v2713_v0, %v7569_v7 }
 0x39b   :  { %2652 = vmatpush2.bf16.msra.mxu0 %v2119_v5  ;;  %2693 = vmatpush2.bf16.msra.mxu1 %v2183_v57 }
 0x39c   :  { %2653 = vmatprep.subr.bf16.mxu0 %v2116_v27  ;;  %2694 = vmatprep.subr.bf16.mxu1 %v2180_v44  ;;  %v2722_v27 = vrot.slane %v2713_v0, %v7565_v42 }
 0x39f   :  { %2654 = vmatpush2.bf16.msra.mxu0 %v2115_v59  ;;  %2695 = vmatpush2.bf16.msra.mxu1 %v2179_v35 }
 0x3a0   :  { %2655 = vmatprep.subr.bf16.mxu0 %v2112_v21  ;;  %2696 = vmatprep.subr.bf16.mxu1 %v2176_v51 }
 0x3a3   :  { %2656 = vmatpush2.bf16.msra.mxu0 %v2111_v61  ;;  %2697 = vmatpush2.bf16.msra.mxu1 %v2175_v11 }
 0x3a4   :  { %2657 = vmatprep.subr.bf16.mxu0 %v2108_v48  ;;  %2698 = vmatprep.subr.bf16.mxu1 %v2172_v19 }
 0x3a7   :  { %2658 = vmatpush2.bf16.msra.mxu0 %v2107_v47  ;;  %2699 = vmatpush2.bf16.msra.mxu1 %v2171_v23 }
 0x3a8   :  { %2659 = vmatprep.subr.bf16.mxu0 %v2104_v46  ;;  %2700 = vmatprep.subr.bf16.mxu1 %v2168_v33 }
 0x3ab   :  { %2660 = vmatpush2.bf16.msra.mxu0 %v2103_v8  ;;  %2701 = vmatpush2.bf16.msra.mxu1 %v2167_v45 }
 0x3ac   :  { %2661 = vmatprep.subr.bf16.mxu0 %v2100_v24  ;;  %2702 = vmatprep.subr.bf16.mxu1 %v2164_v41 }
 0x3af   :  { %2662 = vmatpush2.bf16.msra.mxu0 %v2099_v15  ;;  %2703 = vmatpush2.bf16.msra.mxu1 %v2163_v25 }
 0x3b2   :  { %v2419_v54 = vpop.f32.mrf.mxu0  ;;  %v2460_v18 = vpop.f32.mrf.mxu1  ;;  %2664 = vmatmul.mubr.bf16.vlgmr.msra.gmra.mxu0 %v7579_v62  ;;  %2705 = vmatmul.mubr.bf16.vlgmr.msra.gmra.mxu1 %v7583_v1  ;;  %v2739_v1 = vld [vmem:[#allocation17] sm:$0xf] }
 0x3b3   :  { %v2461_v53 = vadd.f32 %v2460_v18, %v2419_v54  ;;  %v2744_v43 = vrot.slane %v2739_v1, %v7563_v9  ;;  %v2748_v21 = vrot.slane %v2739_v1, %v7565_v42  ;;  %v2752_v38 = vrot.slane %v2739_v1, %v7567_v30 }
 0x3b4   :  { %v2421_v28 = vpop.f32.mrf.mxu0  ;;  %v2462_v40 = vpop.f32.mrf.mxu1  ;;  %v2756_v25 = vrot.slane %v2739_v1, %v7569_v7 }
 0x3b5   :  { %v2463_v60 = vadd.f32 %v2462_v40, %v2421_v28 }
 0x3b6   :  { %v2423_v63 = vpop.f32.mrf.mxu0  ;;  %v2464_v12 = vpop.f32.mrf.mxu1 }
 0x3b8   :  { %v2424_v49 = vpop.f32.mrf.mxu0  ;;  %v2465_v37 = vpop.f32.mrf.mxu1 }
 0x3f2   :  { %v2501_v20 = vpop.f32.mrf.mxu0  ;;  %v2542_v17 = vpop.f32.mrf.mxu1 }
 0x3f3   :  { %v2543_v55 = vadd.f32 %v2542_v17, %v2501_v20 }
 0x3f4   :  { %v2503_v6 = vpop.f32.mrf.mxu0  ;;  %v2544_v29 = vpop.f32.mrf.mxu1 }
 0x3f5   :  { %v2545_v52 = vadd.f32 %v2544_v29, %v2503_v6 }
 0x3f6   :  { %v2505_v31 = vpop.f32.mrf.mxu0  ;;  %v2546_v22 = vpop.f32.mrf.mxu1 }
 0x3f8   :  { %v2506_v34 = vpop.f32.mrf.mxu0  ;;  %v2547_v62 = vpop.f32.mrf.mxu1 }
 0x432   :  { %v2583_v56 = vpop.f32.mrf.mxu0  ;;  %v2624_v2 = vpop.f32.mrf.mxu1 }
 0x433   :  { %v2584_v36 = vadd.f32 %v2583_v56, %v2461_v53 }
 0x434   :  { %v2585_v58 = vpop.f32.mrf.mxu0  ;;  %v2626_v3 = vpop.f32.mrf.mxu1 }
 0x435   :  { %v2625_v5 = vadd.f32 %v2624_v2, %v2584_v36  ;;  %v2586_v57 = vadd.f32 %v2585_v58, %v2463_v60 }
 0x436   :  { %v2587_v44 = vpop.f32.mrf.mxu0  ;;  %v2628_v59 = vpop.f32.mrf.mxu1 }
 0x437   :  { %v2735_v35 = vmul.f32 %v2718_v39, %v2625_v5  ;;  %v2627_v26 = vadd.f32 %v2626_v3, %v2586_v57 }
 0x438   :  { %v2588_v4 = vpop.f32.mrf.mxu0  ;;  %v2629_v51 = vpop.f32.mrf.mxu1 }
 0x439   :  { %v7871_v50 = vadd.f32 %v2744_v43, %v2735_v35  ;;  %v2736_v61 = vmul.f32 %v2722_v27, %v2627_v26 }
 0x43b   :  { %v2765_v10 = vmax.f32 %v7871_v50, 0.0  ;;  %v2762_v11 = vadd.f32 %v2748_v21, %v2736_v61 }
 0x43d   :  { %v2766_v48 = vmax.f32 %v2762_v11, 0.0 }
 0x472   :  { %v2665_v19 = vpop.f32.mrf.mxu0  ;;  %v2706_v47 = vpop.f32.mrf.mxu1 }
 0x473   :  { %v2666_v23 = vadd.f32 %v2665_v19, %v2543_v55 }
 0x474   :  { %v2667_v46 = vpop.f32.mrf.mxu0  ;;  %v2708_v16 = vpop.f32.mrf.mxu1 }
 0x475   :  { %v2707_v33 = vadd.f32 %v2706_v47, %v2666_v23  ;;  %v2668_v8 = vadd.f32 %v2667_v46, %v2545_v52 }
 0x476   :  { %v2669_v45 = vpop.f32.mrf.mxu0  ;;  %v2710_v24 = vpop.f32.mrf.mxu1 }
 0x477   :  { %v2737_v41 = vmul.f32 %v2726_v13, %v2707_v33  ;;  %v2709_v15 = vadd.f32 %v2708_v16, %v2668_v8 }
 0x478   :  { %v2670_v54 = vpop.f32.mrf.mxu0  ;;  %v2711_v18 = vpop.f32.mrf.mxu1 }
 0x479   :  { %v7878_v53 = vadd.f32 %v2752_v38, %v2737_v41  ;;  %v2738_v28 = vmul.f32 %v2730_v14, %v2709_v15 }
 0x47b   :  { %v2767_v40 = vmax.f32 %v7878_v53, 0.0  ;;  %v2764_v60 = vadd.f32 %v2756_v25, %v2738_v28 }
 0x47d   :  { %v2768_v63 = vmax.f32 %v2764_v60, 0.0 }
 0x47e   :  { %5360 = dma.done.wait [#allocation9 + $0x2], 8192 }
 0x47f   :  { %5361 = vsyncadd [#allocation9 + $0x2], 4294959104  ;;  %v7881_v12 = vpack.c.bf16 %v2766_v48, %v2766_v48  ;;  %v7883_v49 = vpack.c.bf16 %v2768_v63, %v2768_v63  ;;  %v2788_v37 = vld [vmem:[#allocation4 + $0x68] sm:$0xff]  ;;  %v2787_v17 = vld [vmem:[#allocation4 + $0x60] sm:$0xff] }
 0x480   :  { %v2820_v20 = vld [vmem:[#allocation4 + $0x168] sm:$0xff]  ;;  %v2864_v55 = vunpack.c.l.s8.bf16 %v2788_v37  ;;  %v2868_v6 = vunpack.c.h.s8.bf16 %v2788_v37  ;;  %v2819_v31 = vld [vmem:[#allocation4 + $0x160] sm:$0xff]  ;;  %v2867_v22 = vunpack.c.h.s8.bf16 %v2787_v17  ;;  %v2863_v1 = vunpack.c.l.s8.bf16 %v2787_v17 }
 0x481   :  { %2999 = vmatprep.mubr.bf16.mxu0 %v7881_v12  ;;  %3040 = vmatprep.mubr.bf16.mxu1 %v7883_v49  ;;  %v2928_v29 = vunpack.c.l.s8.bf16 %v2820_v20  ;;  %v2932_v52 = vunpack.c.h.s8.bf16 %v2820_v20  ;;  %v2931_v34 = vunpack.c.h.s8.bf16 %v2819_v31  ;;  %v2784_v62 = vld [vmem:[#allocation4 + $0x48] sm:$0xff]  ;;  %v2927_v56 = vunpack.c.l.s8.bf16 %v2819_v31  ;;  %v2783_v39 = vld [vmem:[#allocation4 + $0x40] sm:$0xff] }
 0x482   :  { %v2816_v0 = vld [vmem:[#allocation4 + $0x148] sm:$0xff]  ;;  %2967 = vmatprep.subr.bf16.mxu0 %v2868_v6  ;;  %v2860_v2 = vunpack.c.h.s8.bf16 %v2784_v62  ;;  %v2815_v58 = vld [vmem:[#allocation4 + $0x140] sm:$0xff]  ;;  %v2859_v3 = vunpack.c.h.s8.bf16 %v2783_v39  ;;  %v2856_v43 = vunpack.c.l.s8.bf16 %v2784_v62  ;;  %v2855_v59 = vunpack.c.l.s8.bf16 %v2783_v39 }
 0x483   :  { %3008 = vmatprep.subr.bf16.mxu1 %v2932_v52  ;;  %2968 = vmatpush1.bf16.msra.mxu0 %v2867_v22  ;;  %v2924_v36 = vunpack.c.h.s8.bf16 %v2816_v0  ;;  %v2923_v5 = vunpack.c.h.s8.bf16 %v2815_v58  ;;  %v2920_v57 = vunpack.c.l.s8.bf16 %v2816_v0  ;;  %v2780_v27 = vld [vmem:[#allocation4 + $0x28] sm:$0xff]  ;;  %v2919_v35 = vunpack.c.l.s8.bf16 %v2815_v58  ;;  %v2779_v4 = vld [vmem:[#allocation4 + $0x20] sm:$0xff] }
 0x484   :  { %3009 = vmatpush1.bf16.msra.mxu1 %v2931_v34  ;;  %2969 = vmatprep.subr.bf16.mxu0 %v2864_v55  ;;  %v2812_v44 = vld [vmem:[#allocation4 + $0x128] sm:$0xff]  ;;  %v2852_v26 = vunpack.c.h.s8.bf16 %v2780_v27  ;;  %v2811_v51 = vld [vmem:[#allocation4 + $0x120] sm:$0xff]  ;;  %v2851_v61 = vunpack.c.h.s8.bf16 %v2779_v4  ;;  %v2848_v48 = vunpack.c.l.s8.bf16 %v2780_v27  ;;  %v2847_v13 = vunpack.c.l.s8.bf16 %v2779_v4 }
 0x485   :  { %3010 = vmatprep.subr.bf16.mxu1 %v2928_v29  ;;  %v2916_v21 = vunpack.c.h.s8.bf16 %v2812_v44  ;;  %v2915_v11 = vunpack.c.h.s8.bf16 %v2811_v51  ;;  %v2912_v19 = vunpack.c.l.s8.bf16 %v2812_v44  ;;  %v2776_v47 = vld [vmem:[#allocation4 + $0x8] sm:$0xff]  ;;  %v2911_v46 = vunpack.c.l.s8.bf16 %v2811_v51  ;;  %v2775_v38 = vld [vmem:[#allocation4] sm:$0xff] }
 0x486   :  { %v2808_v23 = vld [vmem:[#allocation4 + $0x108] sm:$0xff]  ;;  %v2844_v16 = vunpack.c.h.s8.bf16 %v2776_v47  ;;  %v2807_v8 = vld [vmem:[#allocation4 + $0x100] sm:$0xff]  ;;  %v2843_v14 = vunpack.c.h.s8.bf16 %v2775_v38  ;;  %v2840_v24 = vunpack.c.l.s8.bf16 %v2776_v47  ;;  %v2839_v54 = vunpack.c.l.s8.bf16 %v2775_v38 }
 0x487   :  { %2970 = vmatpush1.bf16.msra.mxu0 %v2863_v1  ;;  %v2908_v33 = vunpack.c.h.s8.bf16 %v2808_v23  ;;  %v2907_v45 = vunpack.c.h.s8.bf16 %v2807_v8  ;;  %v2904_v41 = vunpack.c.l.s8.bf16 %v2808_v23  ;;  %v2804_v15 = vld [vmem:[#allocation4 + $0xe8] sm:$0xff]  ;;  %v2903_v18 = vunpack.c.l.s8.bf16 %v2807_v8  ;;  %v2803_v63 = vld [vmem:[#allocation4 + $0xe0] sm:$0xff]  ;;  %v2790_v8 = vld [vmem:[#allocation4 + $0x78] sm:$0xff] }
 0x488   :  { %3011 = vmatpush1.bf16.msra.mxu1 %v2927_v56  ;;  %2971 = vmatprep.subr.bf16.mxu0 %v2860_v2  ;;  %v2836_v25 = vld [vmem:[#allocation4 + $0x1e8] sm:$0xff]  ;;  %v2900_v28 = vunpack.c.h.s8.bf16 %v2804_v15  ;;  %v2835_v37 = vld [vmem:[#allocation4 + $0x1e0] sm:$0xff]  ;;  %v2899_v20 = vunpack.c.h.s8.bf16 %v2803_v63  ;;  %v2896_v55 = vunpack.c.l.s8.bf16 %v2804_v15  ;;  %v2895_v31 = vunpack.c.l.s8.bf16 %v2803_v63 }
 0x489   :  { %3012 = vmatprep.subr.bf16.mxu1 %v2924_v36  ;;  %v2964_v60 = vunpack.c.h.s8.bf16 %v2836_v25  ;;  %v2963_v17 = vunpack.c.h.s8.bf16 %v2835_v37  ;;  %v2960_v6 = vunpack.c.l.s8.bf16 %v2836_v25  ;;  %v2800_v29 = vld [vmem:[#allocation4 + $0xc8] sm:$0xff]  ;;  %v2959_v22 = vunpack.c.l.s8.bf16 %v2835_v37  ;;  %v2799_v0 = vld [vmem:[#allocation4 + $0xc0] sm:$0xff]  ;;  %v2789_v25 = vld [vmem:[#allocation4 + $0x70] sm:$0xff] }
 0x48a   :  { %v2832_v52 = vld [vmem:[#allocation4 + $0x1c8] sm:$0xff]  ;;  %v2892_v34 = vunpack.c.h.s8.bf16 %v2800_v29  ;;  %v2831_v1 = vld [vmem:[#allocation4 + $0x1c0] sm:$0xff]  ;;  %v2891_v56 = vunpack.c.h.s8.bf16 %v2799_v0  ;;  %v2888_v36 = vunpack.c.l.s8.bf16 %v2800_v29  ;;  %v2866_v37 = vunpack.c.l.s8.bf16 %v2790_v8  ;;  %v2817_v29 = vld [vmem:[#allocation4 + $0x150] sm:$0xff] }
 0x48b   :  { %2972 = vmatpush1.bf16.msra.mxu0 %v2859_v3  ;;  %v2956_v62 = vunpack.c.h.s8.bf16 %v2832_v52  ;;  %v2955_v2 = vunpack.c.h.s8.bf16 %v2831_v1  ;;  %v2952_v39 = vunpack.c.l.s8.bf16 %v2832_v52  ;;  %v2796_v58 = vld [vmem:[#allocation4 + $0xa8] sm:$0xff]  ;;  %v2795_v44 = vld [vmem:[#allocation4 + $0xa0] sm:$0xff]  ;;  %v2865_v50 = vunpack.c.l.s8.bf16 %v2789_v25 }
 0x48c   :  { %3013 = vmatpush1.bf16.msra.mxu1 %v2923_v5  ;;  %2973 = vmatprep.subr.bf16.mxu0 %v2856_v43  ;;  %v2828_v3 = vld [vmem:[#allocation4 + $0x1a8] sm:$0xff]  ;;  %v2887_v5 = vunpack.c.l.s8.bf16 %v2799_v0  ;;  %v2951_v43 = vunpack.c.l.s8.bf16 %v2831_v1  ;;  %v2791_v23 = vld [vmem:[#allocation4 + $0x80] sm:$0xff]  ;;  %v2814_v0 = vld [vmem:[#allocation4 + $0x138] sm:$0xff] }
 0x48d   :  { %3014 = vmatprep.subr.bf16.mxu1 %v2920_v57  ;;  %v2884_v57 = vunpack.c.h.s8.bf16 %v2796_v58  ;;  %v2948_v27 = vunpack.c.h.s8.bf16 %v2828_v3  ;;  %v2944_v4 = vunpack.c.l.s8.bf16 %v2828_v3  ;;  %v2792_v51 = vld [vmem:[#allocation4 + $0x88] sm:$0xff] }
 0x48f   :  { %2974 = vmatpush1.bf16.msra.mxu0 %v2855_v59  ;;  %v2827_v59 = vld [vmem:[#allocation4 + $0x1a0] sm:$0xff] }
 0x490   :  { %3015 = vmatpush1.bf16.msra.mxu1 %v2919_v35  ;;  %2975 = vmatprep.subr.bf16.mxu0 %v2852_v26  ;;  %v2883_v35 = vunpack.c.h.s8.bf16 %v2795_v44  ;;  %v2947_v26 = vunpack.c.h.s8.bf16 %v2827_v59 }
 0x491   :  { %3016 = vmatprep.subr.bf16.mxu1 %v2916_v21  ;;  %v2880_v21 = vunpack.c.l.s8.bf16 %v2796_v58 }
 0x493   :  { %2976 = vmatpush1.bf16.msra.mxu0 %v2851_v61  ;;  %v2824_v61 = vld [vmem:[#allocation4 + $0x188] sm:$0xff] }
 0x494   :  { %3017 = vmatpush1.bf16.msra.mxu1 %v2915_v11  ;;  %2977 = vmatprep.subr.bf16.mxu0 %v2848_v48  ;;  %v2879_v11 = vunpack.c.l.s8.bf16 %v2795_v44  ;;  %v2943_v48 = vunpack.c.l.s8.bf16 %v2827_v59  ;;  %v2940_v47 = vunpack.c.h.s8.bf16 %v2824_v61  ;;  %v2936_v38 = vunpack.c.l.s8.bf16 %v2824_v61 }
 0x495   :  { %3018 = vmatprep.subr.bf16.mxu1 %v2912_v19  ;;  %v2876_v19 = vunpack.c.h.s8.bf16 %v2792_v51 }
 0x497   :  { %2978 = vmatpush1.bf16.msra.mxu0 %v2847_v13  ;;  %v2823_v13 = vld [vmem:[#allocation4 + $0x180] sm:$0xff] }
 0x498   :  { %3019 = vmatpush1.bf16.msra.mxu1 %v2911_v46  ;;  %2979 = vmatprep.subr.bf16.mxu0 %v2844_v16  ;;  %v2875_v46 = vunpack.c.h.s8.bf16 %v2791_v23  ;;  %v2939_v16 = vunpack.c.h.s8.bf16 %v2823_v13 }
 0x499   :  { %3020 = vmatprep.subr.bf16.mxu1 %v2908_v33  ;;  %v2872_v33 = vunpack.c.l.s8.bf16 %v2792_v51 }
 0x49b   :  { %2980 = vmatpush1.bf16.msra.mxu0 %v2843_v14  ;;  %v2822_v14 = vld [vmem:[#allocation4 + $0x178] sm:$0xff] }
 0x49c   :  { %3021 = vmatpush1.bf16.msra.mxu1 %v2907_v45  ;;  %2981 = vmatprep.subr.bf16.mxu0 %v2840_v24  ;;  %v2871_v45 = vunpack.c.l.s8.bf16 %v2791_v23  ;;  %v2935_v24 = vunpack.c.l.s8.bf16 %v2823_v13  ;;  %v2934_v15 = vunpack.c.h.s8.bf16 %v2822_v14 }
 0x49d   :  { %3022 = vmatprep.subr.bf16.mxu1 %v2904_v41  ;;  %v2870_v41 = vunpack.c.h.s8.bf16 %v2790_v8 }
 0x49f   :  { %2982 = vmatpush1.bf16.msra.mxu0 %v2839_v54  ;;  %v2821_v54 = vld [vmem:[#allocation4 + $0x170] sm:$0xff] }
 0x4a0   :  { %3023 = vmatpush1.bf16.msra.mxu1 %v2903_v18  ;;  %2983 = vmatprep.subr.bf16.mxu0 %v2900_v28  ;;  %v7890_v18 = vpack.c.bf16 %v2765_v10, %v2765_v10  ;;  %v7895_v28 = vpack.c.bf16 %v2767_v40, %v2767_v40  ;;  %v2933_v63 = vunpack.c.h.s8.bf16 %v2821_v54  ;;  %v2929_v10 = vunpack.c.l.s8.bf16 %v2821_v54 }
 0x4a1   :  { %3024 = vmatprep.subr.bf16.mxu1 %v2964_v60  ;;  %v2869_v60 = vunpack.c.h.s8.bf16 %v2789_v25 }
 0x4a3   :  { %2984 = vmatpush2.bf16.msra.mxu0 %v2899_v20  ;;  %v2930_v20 = vunpack.c.l.s8.bf16 %v2822_v14 }
 0x4a4   :  { %3025 = vmatpush2.bf16.msra.mxu1 %v2963_v17  ;;  %2985 = vmatprep.subr.bf16.mxu0 %v2896_v55  ;;  %v2786_v17 = vld [vmem:[#allocation4 + $0x58] sm:$0xff] }
 0x4a5   :  { %3026 = vmatprep.subr.bf16.mxu1 %v2960_v6  ;;  %v2818_v55 = vld [vmem:[#allocation4 + $0x158] sm:$0xff]  ;;  %v2862_v53 = vunpack.c.h.s8.bf16 %v2786_v17  ;;  %v2785_v6 = vld [vmem:[#allocation4 + $0x50] sm:$0xff] }
 0x4a6   :  { %v2926_v40 = vunpack.c.h.s8.bf16 %v2818_v55  ;;  %v2861_v52 = vunpack.c.h.s8.bf16 %v2785_v6  ;;  %v2857_v1 = vunpack.c.l.s8.bf16 %v2785_v6 }
 0x4a7   :  { %2986 = vmatpush2.bf16.msra.mxu0 %v2895_v31  ;;  %v2925_v31 = vunpack.c.h.s8.bf16 %v2817_v29 }
 0x4a8   :  { %3027 = vmatpush2.bf16.msra.mxu1 %v2959_v22  ;;  %2987 = vmatprep.subr.bf16.mxu0 %v2892_v34  ;;  %v2858_v22 = vunpack.c.l.s8.bf16 %v2786_v17  ;;  %v2922_v34 = vunpack.c.l.s8.bf16 %v2818_v55 }
 0x4a9   :  { %3028 = vmatprep.subr.bf16.mxu1 %v2956_v62  ;;  %v2782_v62 = vld [vmem:[#allocation4 + $0x38] sm:$0xff] }
 0x4aa   :  { %v2850_v3 = vunpack.c.l.s8.bf16 %v2782_v62 }
 0x4ab   :  { %2988 = vmatpush2.bf16.msra.mxu0 %v2891_v56  ;;  %v2921_v56 = vunpack.c.l.s8.bf16 %v2817_v29 }
 0x4ac   :  { %3029 = vmatpush2.bf16.msra.mxu1 %v2955_v2  ;;  %2989 = vmatprep.subr.bf16.mxu0 %v2888_v36  ;;  %v2854_v2 = vunpack.c.h.s8.bf16 %v2782_v62  ;;  %v2781_v36 = vld [vmem:[#allocation4 + $0x30] sm:$0xff] }
 0x4ad   :  { %3030 = vmatprep.subr.bf16.mxu1 %v2952_v39  ;;  %v2853_v39 = vunpack.c.h.s8.bf16 %v2781_v36 }
 0x4af   :  { %2990 = vmatpush2.bf16.msra.mxu0 %v2887_v5  ;;  %v2914_v5 = vunpack.c.l.s8.bf16 %v2814_v0 }
 0x4b0   :  { %3031 = vmatpush2.bf16.msra.mxu1 %v2951_v43  ;;  %2991 = vmatprep.subr.bf16.mxu0 %v2884_v57  ;;  %v2778_v43 = vld [vmem:[#allocation4 + $0x18] sm:$0xff] }
 0x4b1   :  { %3032 = vmatprep.subr.bf16.mxu1 %v2948_v27  ;;  %v2810_v57 = vld [vmem:[#allocation4 + $0x118] sm:$0xff]  ;;  %v2849_v27 = vunpack.c.l.s8.bf16 %v2781_v36  ;;  %v2846_v59 = vunpack.c.h.s8.bf16 %v2778_v43  ;;  %v2842_v61 = vunpack.c.l.s8.bf16 %v2778_v43 }
 0x4b3   :  { %2992 = vmatpush2.bf16.msra.mxu0 %v2883_v35  ;;  %v2910_v35 = vunpack.c.h.s8.bf16 %v2810_v57 }
 0x4b4   :  { %3033 = vmatpush2.bf16.msra.mxu1 %v2947_v26  ;;  %2993 = vmatprep.subr.bf16.mxu0 %v2880_v21  ;;  %v2777_v26 = vld [vmem:[#allocation4 + $0x10] sm:$0xff] }
 0x4b5   :  { %3034 = vmatprep.subr.bf16.mxu1 %v2944_v4  ;;  %v2809_v21 = vld [vmem:[#allocation4 + $0x110] sm:$0xff]  ;;  %v2845_v4 = vunpack.c.h.s8.bf16 %v2777_v26 }
 0x4b6   :  { %v2909_v51 = vunpack.c.h.s8.bf16 %v2809_v21  ;;  %v2905_v23 = vunpack.c.l.s8.bf16 %v2809_v21 }
 0x4b7   :  { %2994 = vmatpush2.bf16.msra.mxu0 %v2879_v11  ;;  %v2906_v11 = vunpack.c.l.s8.bf16 %v2810_v57 }
 0x4b8   :  { %3035 = vmatpush2.bf16.msra.mxu1 %v2943_v48  ;;  %2995 = vmatprep.subr.bf16.mxu0 %v2876_v19  ;;  %v2806_v48 = vld [vmem:[#allocation4 + $0xf8] sm:$0xff] }
 0x4b9   :  { %3036 = vmatprep.subr.bf16.mxu1 %v2940_v47  ;;  %v2838_v19 = vld [vmem:[#allocation4 + $0x1f8] sm:$0xff]  ;;  %v2841_v47 = vunpack.c.l.s8.bf16 %v2777_v26  ;;  %v2902_v13 = vunpack.c.h.s8.bf16 %v2806_v48  ;;  %v2898_v14 = vunpack.c.l.s8.bf16 %v2806_v48  ;;  %v3157_v26 = vld [vmem:[#allocation20] sm:$0xf] }
 0x4bb   :  { %2996 = vmatpush2.bf16.msra.mxu0 %v2875_v46  ;;  %v2966_v46 = vunpack.c.h.s8.bf16 %v2838_v19 }
 0x4bc   :  { %3037 = vmatpush2.bf16.msra.mxu1 %v2939_v16  ;;  %2997 = vmatprep.subr.bf16.mxu0 %v2872_v33  ;;  %v2805_v16 = vld [vmem:[#allocation4 + $0xf0] sm:$0xff] }
 0x4bd   :  { %3038 = vmatprep.subr.bf16.mxu1 %v2936_v38  ;;  %v2837_v33 = vld [vmem:[#allocation4 + $0x1f0] sm:$0xff]  ;;  %v2901_v38 = vunpack.c.h.s8.bf16 %v2805_v16 }
 0x4be   :  { %v2965_v8 = vunpack.c.h.s8.bf16 %v2837_v33  ;;  %v2961_v25 = vunpack.c.l.s8.bf16 %v2837_v33 }
 0x4bf   :  { %2998 = vmatpush2.bf16.msra.mxu0 %v2871_v45  ;;  %v2962_v45 = vunpack.c.l.s8.bf16 %v2838_v19 }
 0x4c0   :  { %3039 = vmatpush2.bf16.msra.mxu1 %v2935_v24  ;;  %3049 = vmatprep.subr.bf16.mxu0 %v2870_v41  ;;  %v2802_v24 = vld [vmem:[#allocation4 + $0xd8] sm:$0xff] }
 0x4c1   :  { %3090 = vmatprep.subr.bf16.mxu1 %v2934_v15  ;;  %v2834_v41 = vld [vmem:[#allocation4 + $0x1d8] sm:$0xff]  ;;  %v2897_v15 = vunpack.c.l.s8.bf16 %v2805_v16  ;;  %v2894_v54 = vunpack.c.h.s8.bf16 %v2802_v24  ;;  %v2890_v55 = vunpack.c.l.s8.bf16 %v2802_v24 }
 0x4c2   :  { %3000 = vmatmul.mubr.bf16.vlgmr.msra.gmra.mxu0 %v7890_v18 }
 0x4c3   :  { %3041 = vmatmul.mubr.bf16.vlgmr.msra.gmra.mxu1 %v7895_v28  ;;  %3050 = vmatpush1.bf16.msra.mxu0 %v2869_v60  ;;  %v2958_v60 = vunpack.c.h.s8.bf16 %v2834_v41 }
 0x4c4   :  { %3091 = vmatpush1.bf16.msra.mxu1 %v2933_v63  ;;  %3051 = vmatprep.subr.bf16.mxu0 %v2866_v37  ;;  %v2801_v63 = vld [vmem:[#allocation4 + $0xd0] sm:$0xff] }
 0x4c5   :  { %3092 = vmatprep.subr.bf16.mxu1 %v2930_v20  ;;  %3081 = vmatprep.mubr.bf16.mxu0 %v7881_v12  ;;  %v2918_v12 = vunpack.c.h.s8.bf16 %v2814_v0  ;;  %v2833_v37 = vld [vmem:[#allocation4 + $0x1d0] sm:$0xff]  ;;  %v2893_v20 = vunpack.c.h.s8.bf16 %v2801_v63 }
 0x4c6   :  { %3122 = vmatprep.mubr.bf16.mxu1 %v7883_v49  ;;  %v2813_v49 = vld [vmem:[#allocation4 + $0x130] sm:$0xff]  ;;  %v2957_v17 = vunpack.c.h.s8.bf16 %v2833_v37  ;;  %v2953_v6 = vunpack.c.l.s8.bf16 %v2833_v37  ;;  %v3170_v37 = vrot.slane %v3157_v26, %v7567_v30 }
 0x4c7   :  { %3052 = vmatpush1.bf16.msra.mxu0 %v2865_v50  ;;  %v2917_v58 = vunpack.c.h.s8.bf16 %v2813_v49  ;;  %v2913_v44 = vunpack.c.l.s8.bf16 %v2813_v49  ;;  %v2954_v50 = vunpack.c.l.s8.bf16 %v2834_v41 }
 0x4c8   :  { %3093 = vmatpush1.bf16.msra.mxu1 %v2929_v10  ;;  %3053 = vmatprep.subr.bf16.mxu0 %v2862_v53  ;;  %v2798_v10 = vld [vmem:[#allocation4 + $0xb8] sm:$0xff] }
 0x4c9   :  { %3094 = vmatprep.subr.bf16.mxu1 %v2926_v40  ;;  %v2830_v53 = vld [vmem:[#allocation4 + $0x1b8] sm:$0xff]  ;;  %v2889_v40 = vunpack.c.l.s8.bf16 %v2801_v63  ;;  %v2886_v29 = vunpack.c.h.s8.bf16 %v2798_v10  ;;  %v2882_v0 = vunpack.c.l.s8.bf16 %v2798_v10 }
 0x4cb   :  { %3054 = vmatpush1.bf16.msra.mxu0 %v2861_v52  ;;  %v2950_v52 = vunpack.c.h.s8.bf16 %v2830_v53 }
 0x4cc   :  { %3095 = vmatpush1.bf16.msra.mxu1 %v2925_v31  ;;  %3055 = vmatprep.subr.bf16.mxu0 %v2858_v22  ;;  %v2797_v31 = vld [vmem:[#allocation4 + $0xb0] sm:$0xff] }
 0x4cd   :  { %3096 = vmatprep.subr.bf16.mxu1 %v2922_v34  ;;  %v2829_v22 = vld [vmem:[#allocation4 + $0x1b0] sm:$0xff]  ;;  %v2885_v34 = vunpack.c.h.s8.bf16 %v2797_v31 }
 0x4ce   :  { %v2949_v62 = vunpack.c.h.s8.bf16 %v2829_v22  ;;  %v2945_v36 = vunpack.c.l.s8.bf16 %v2829_v22 }
 0x4cf   :  { %3056 = vmatpush1.bf16.msra.mxu0 %v2857_v1  ;;  %v2946_v1 = vunpack.c.l.s8.bf16 %v2830_v53  ;;  %v3174_v53 = vrot.slane %v3157_v26, %v7569_v7 }
 0x4d0   :  { %3097 = vmatpush1.bf16.msra.mxu1 %v2921_v56  ;;  %3057 = vmatprep.subr.bf16.mxu0 %v2854_v2  ;;  %v2794_v56 = vld [vmem:[#allocation4 + $0x98] sm:$0xff] }
 0x4d1   :  { %3098 = vmatprep.subr.bf16.mxu1 %v2918_v12  ;;  %v2826_v2 = vld [vmem:[#allocation4 + $0x198] sm:$0xff]  ;;  %v2881_v12 = vunpack.c.l.s8.bf16 %v2797_v31  ;;  %v2878_v49 = vunpack.c.h.s8.bf16 %v2794_v56  ;;  %v2874_v57 = vunpack.c.l.s8.bf16 %v2794_v56 }
 0x4d3   :  { %3058 = vmatpush1.bf16.msra.mxu0 %v2853_v39  ;;  %v2942_v39 = vunpack.c.h.s8.bf16 %v2826_v2 }
 0x4d4   :  { %3099 = vmatpush1.bf16.msra.mxu1 %v2917_v58  ;;  %3059 = vmatprep.subr.bf16.mxu0 %v2850_v3  ;;  %v2793_v58 = vld [vmem:[#allocation4 + $0x90] sm:$0xff] }
 0x4d5   :  { %3100 = vmatprep.subr.bf16.mxu1 %v2914_v5  ;;  %v2825_v3 = vld [vmem:[#allocation4 + $0x190] sm:$0xff]  ;;  %v2877_v5 = vunpack.c.h.s8.bf16 %v2793_v58 }
 0x4d6   :  { %v2941_v43 = vunpack.c.h.s8.bf16 %v2825_v3 }
 0x4d7   :  { %3060 = vmatpush1.bf16.msra.mxu0 %v2849_v27  ;;  %v2938_v27 = vunpack.c.l.s8.bf16 %v2826_v2  ;;  %v8950_v2 = vld [vmem:[#allocation212_spill] sm:$0xff] }
 0x4d8   :  { %3101 = vmatpush1.bf16.msra.mxu1 %v2913_v44  ;;  %3061 = vmatprep.subr.bf16.mxu0 %v2846_v59  ;;  %v2873_v44 = vunpack.c.l.s8.bf16 %v2793_v58  ;;  %v2937_v59 = vunpack.c.l.s8.bf16 %v2825_v3 }
 0x4d9   :  { %3102 = vmatprep.subr.bf16.mxu1 %v2910_v35  ;;  %v3131_v35 = vld [vmem:[#allocation21] sm:$0xf] }
 0x4da   :  { %v3136_v21 = vrot.slane %v3131_v35, %v7563_v9  ;;  %v3140_v48 = vrot.slane %v3131_v35, %v7565_v42 }
 0x4db   :  { %3062 = vmatpush1.bf16.msra.mxu0 %v2845_v4 }
 0x4dc   :  { %3103 = vmatpush1.bf16.msra.mxu1 %v2909_v51  ;;  %3063 = vmatprep.subr.bf16.mxu0 %v2842_v61 }
 0x4dd   :  { %3104 = vmatprep.subr.bf16.mxu1 %v2906_v11  ;;  %v3162_v11 = vrot.slane %v3157_v26, %v7563_v9 }
 0x4df   :  { %3064 = vmatpush1.bf16.msra.mxu0 %v2841_v47 }
 0x4e0   :  { %3105 = vmatpush1.bf16.msra.mxu1 %v2905_v23  ;;  %3065 = vmatprep.subr.bf16.mxu0 %v2902_v13 }
 0x4e1   :  { %3106 = vmatprep.subr.bf16.mxu1 %v2966_v46  ;;  %v3166_v46 = vrot.slane %v3157_v26, %v7565_v42 }
 0x4e3   :  { %3066 = vmatpush2.bf16.msra.mxu0 %v2901_v38 }
 0x4e4   :  { %3107 = vmatpush2.bf16.msra.mxu1 %v2965_v8  ;;  %3067 = vmatprep.subr.bf16.mxu0 %v2898_v14 }
 0x4e5   :  { %3108 = vmatprep.subr.bf16.mxu1 %v2962_v45 }
 0x4e7   :  { %3068 = vmatpush2.bf16.msra.mxu0 %v2897_v15 }
 0x4e8   :  { %3109 = vmatpush2.bf16.msra.mxu1 %v2961_v25  ;;  %3069 = vmatprep.subr.bf16.mxu0 %v2894_v54  ;;  %v3144_v25 = vrot.slane %v3131_v35, %v7567_v30 }
 0x4e9   :  { %3110 = vmatprep.subr.bf16.mxu1 %v2958_v60 }
 0x4eb   :  { %3070 = vmatpush2.bf16.msra.mxu0 %v2893_v20  ;;  %v3148_v20 = vrot.slane %v3131_v35, %v7569_v7 }
 0x4ec   :  { %3111 = vmatpush2.bf16.msra.mxu1 %v2957_v17  ;;  %3071 = vmatprep.subr.bf16.mxu0 %v2890_v55 }
 0x4ed   :  { %3112 = vmatprep.subr.bf16.mxu1 %v2954_v50 }
 0x4ef   :  { %3072 = vmatpush2.bf16.msra.mxu0 %v2889_v40 }
 0x4f0   :  { %3113 = vmatpush2.bf16.msra.mxu1 %v2953_v6  ;;  %3073 = vmatprep.subr.bf16.mxu0 %v2886_v29 }
 0x4f1   :  { %3114 = vmatprep.subr.bf16.mxu1 %v2950_v52 }
 0x4f3   :  { %3074 = vmatpush2.bf16.msra.mxu0 %v2885_v34 }
 0x4f4   :  { %3115 = vmatpush2.bf16.msra.mxu1 %v2949_v62  ;;  %3075 = vmatprep.subr.bf16.mxu0 %v2882_v0 }
 0x4f5   :  { %3116 = vmatprep.subr.bf16.mxu1 %v2946_v1 }
 0x4f7   :  { %3076 = vmatpush2.bf16.msra.mxu0 %v2881_v12  ;;  %v8951_v12 = vld [vmem:[#allocation210_spill] sm:$0xff] }
 0x4f8   :  { %3117 = vmatpush2.bf16.msra.mxu1 %v2945_v36  ;;  %3077 = vmatprep.subr.bf16.mxu0 %v2878_v49  ;;  %v4767_v36 = vcombine.high %v8951_v12, %v8950_v2  ;;  %v8952_v49 = vld [vmem:[#allocation276_spill] sm:$0xff]  ;;  %v4766_v3 = vcombine.low %v8951_v12, %v8950_v2 }
 0x4f9   :  { %3118 = vmatprep.subr.bf16.mxu1 %v2942_v39  ;;  %v8953_v39 = vld [vmem:[#allocation274_spill] sm:$0xff] }
 0x4fa   :  { %v4831_v58 = vcombine.high %v8953_v39, %v8952_v49 }
 0x4fb   :  { %3078 = vmatpush2.bf16.msra.mxu0 %v2877_v5  ;;  %v4830_v5 = vcombine.low %v8953_v39, %v8952_v49 }
 0x4fc   :  { %3119 = vmatpush2.bf16.msra.mxu1 %v2941_v43  ;;  %3079 = vmatprep.subr.bf16.mxu0 %v2874_v57 }
 0x4fd   :  { %3120 = vmatprep.subr.bf16.mxu1 %v2938_v27 }
 0x4ff   :  { %3080 = vmatpush2.bf16.msra.mxu0 %v2873_v44 }
 0x500   :  { %3121 = vmatpush2.bf16.msra.mxu1 %v2937_v59 }
 0x502   :  { %3082 = vmatmul.mubr.bf16.vlgmr.msra.gmra.mxu0 %v7890_v18 }
 0x503   :  { %3123 = vmatmul.mubr.bf16.vlgmr.msra.gmra.mxu1 %v7895_v28 }
 0x582   :  { %v3001_v4 = vpop.f32.mrf.mxu0 }
 0x583   :  { %v3042_v51 = vpop.f32.mrf.mxu1 }
 0x584   :  { %v3043_v61 = vadd.f32 %v3042_v51, %v3001_v4  ;;  %v3003_v19 = vpop.f32.mrf.mxu0 }
 0x585   :  { %v3044_v47 = vpop.f32.mrf.mxu1 }
 0x586   :  { %v3153_v23 = vmul.f32 %v3136_v21, %v3043_v61  ;;  %v3045_v13 = vadd.f32 %v3044_v47, %v3003_v19  ;;  %v3005_v18 = vpop.f32.mrf.mxu0 }
 0x587   :  { %v3046_v16 = vpop.f32.mrf.mxu1 }
 0x588   :  { %v3179_v28 = vadd.f32 %v3162_v11, %v3153_v23  ;;  %v3154_v33 = vmul.f32 %v3140_v48, %v3045_v13  ;;  %v3006_v38 = vpop.f32.mrf.mxu0 }
 0x589   :  { %v3047_v8 = vpop.f32.mrf.mxu1 }
 0x58a   :  { %v3183_v14 = vmax.f32 %v3179_v28, 0.0  ;;  %v3180_v45 = vadd.f32 %v3166_v46, %v3154_v33 }
 0x58c   :  { %v7907_v24 = vpack.c.bf16 %v3183_v14, %v3183_v14  ;;  %v3184_v41 = vmax.f32 %v3180_v45, 0.0 }
 0x58e   :  { %v7909_v15 = vpack.c.bf16 %v3184_v41, %v3184_v41 }
 0x590   :  { %4017 = vmatprep.mubr.bf16.mxu0 %v7909_v15 }
 0x5c2   :  { %v3083_v54 = vpop.f32.mrf.mxu0 }
 0x5c3   :  { %v3124_v60 = vpop.f32.mrf.mxu1 }
 0x5c4   :  { %v3125_v63 = vadd.f32 %v3124_v60, %v3083_v54  ;;  %v3085_v17 = vpop.f32.mrf.mxu0 }
 0x5c5   :  { %v3126_v55 = vpop.f32.mrf.mxu1 }
 0x5c6   :  { %v3155_v50 = vmul.f32 %v3144_v25, %v3125_v63  ;;  %v3127_v10 = vadd.f32 %v3126_v55, %v3085_v17  ;;  %v3087_v40 = vpop.f32.mrf.mxu0 }
 0x5c7   :  { %v3128_v6 = vpop.f32.mrf.mxu1 }
 0x5c8   :  { %v3181_v29 = vadd.f32 %v3170_v37, %v3155_v50  ;;  %v3156_v52 = vmul.f32 %v3148_v20, %v3127_v10  ;;  %v3088_v31 = vpop.f32.mrf.mxu0 }
 0x5c9   :  { %v3129_v22 = vpop.f32.mrf.mxu1 }
 0x5ca   :  { %v3185_v34 = vmax.f32 %v3181_v29, 0.0  ;;  %v3182_v62 = vadd.f32 %v3174_v53, %v3156_v52 }
 0x5cc   :  { %v7915_v0 = vpack.c.bf16 %v3185_v34, %v3185_v34  ;;  %v3186_v1 = vmax.f32 %v3182_v62, 0.0 }
 0x5ce   :  { %v7917_v56 = vpack.c.bf16 %v3186_v1, %v3186_v1 }
 0x5cf   :  { %5362 = dma.done.wait [#allocation9 + $0x3], 16384 }
 0x5d0   :  { %5363 = vsyncadd [#allocation9 + $0x3], 4294950912  ;;  %v8954_v43 = vld [vmem:[#allocation208_spill] sm:$0xff]  ;;  %v8955_v57 = vld [vmem:[#allocation206_spill] sm:$0xff]  ;;  %4058 = vmatprep.mubr.bf16.mxu1 %v7917_v56  ;;  %3985 = vmatprep.subr.bf16.mxu0 %v4767_v36 }
 0x5d1   :  { %v4763_v27 = vcombine.high %v8955_v57, %v8954_v43  ;;  %v8956_v44 = vld [vmem:[#allocation272_spill] sm:$0xff]  ;;  %v8957_v59 = vld [vmem:[#allocation270_spill] sm:$0xff]  ;;  %4026 = vmatprep.subr.bf16.mxu1 %v4831_v58  ;;  %3986 = vmatpush1.bf16.msra.mxu0 %v4766_v3  ;;  %v4762_v26 = vcombine.low %v8955_v57, %v8954_v43 }
 0x5d2   :  { %v4827_v35 = vcombine.high %v8957_v59, %v8956_v44  ;;  %4027 = vmatpush1.bf16.msra.mxu1 %v4830_v5  ;;  %v4826_v21 = vcombine.low %v8957_v59, %v8956_v44  ;;  %v8958_v4 = vld [vmem:[#allocation204_spill] sm:$0xff]  ;;  %v8959_v51 = vld [vmem:[#allocation202_spill] sm:$0xff] }
 0x5d3   :  { %3987 = vmatprep.subr.bf16.mxu0 %v4763_v27  ;;  %v4759_v61 = vcombine.high %v8959_v51, %v8958_v4  ;;  %v8960_v11 = vld [vmem:[#allocation268_spill] sm:$0xff]  ;;  %v8961_v48 = vld [vmem:[#allocation266_spill] sm:$0xff]  ;;  %v4758_v47 = vcombine.low %v8959_v51, %v8958_v4 }
 0x5d4   :  { %4028 = vmatprep.subr.bf16.mxu1 %v4827_v35  ;;  %v4823_v19 = vcombine.high %v8961_v48, %v8960_v11  ;;  %v4822_v23 = vcombine.low %v8961_v48, %v8960_v11  ;;  %v8962_v13 = vld [vmem:[#allocation200_spill] sm:$0xff]  ;;  %v8963_v46 = vld [vmem:[#allocation198_spill] sm:$0xff] }
 0x5d5   :  { %3988 = vmatpush1.bf16.msra.mxu0 %v4762_v26  ;;  %v4755_v18 = vcombine.high %v8963_v46, %v8962_v13  ;;  %v8964_v16 = vld [vmem:[#allocation264_spill] sm:$0xff]  ;;  %v8965_v28 = vld [vmem:[#allocation262_spill] sm:$0xff]  ;;  %v4754_v38 = vcombine.low %v8963_v46, %v8962_v13 }
 0x5d6   :  { %4029 = vmatpush1.bf16.msra.mxu1 %v4826_v21  ;;  %3989 = vmatprep.subr.bf16.mxu0 %v4759_v61  ;;  %v4819_v33 = vcombine.high %v8965_v28, %v8964_v16  ;;  %v4818_v8 = vcombine.low %v8965_v28, %v8964_v16  ;;  %v8966_v14 = vld [vmem:[#allocation196_spill] sm:$0xff]  ;;  %v8967_v45 = vld [vmem:[#allocation194_spill] sm:$0xff] }
 0x5d7   :  { %4030 = vmatprep.subr.bf16.mxu1 %v4823_v19  ;;  %v4751_v41 = vcombine.high %v8967_v45, %v8966_v14  ;;  %v8968_v25 = vld [vmem:[#allocation260_spill] sm:$0xff]  ;;  %v8969_v54 = vld [vmem:[#allocation258_spill] sm:$0xff]  ;;  %v4750_v63 = vcombine.low %v8967_v45, %v8966_v14 }
 0x5d8   :  { %v4815_v60 = vcombine.high %v8969_v54, %v8968_v25  ;;  %v4814_v37 = vcombine.low %v8969_v54, %v8968_v25  ;;  %v8970_v20 = vld [vmem:[#allocation192_spill] sm:$0xff]  ;;  %v8971_v17 = vld [vmem:[#allocation190_spill] sm:$0xff] }
 0x5d9   :  { %3990 = vmatpush1.bf16.msra.mxu0 %v4758_v47  ;;  %v4747_v55 = vcombine.high %v8971_v17, %v8970_v20  ;;  %v8972_v50 = vld [vmem:[#allocation256_spill] sm:$0xff]  ;;  %v8973_v10 = vld [vmem:[#allocation254_spill] sm:$0xff]  ;;  %v4746_v40 = vcombine.low %v8971_v17, %v8970_v20 }
 0x5da   :  { %4031 = vmatpush1.bf16.msra.mxu1 %v4822_v23  ;;  %3991 = vmatprep.subr.bf16.mxu0 %v4755_v18  ;;  %v4811_v53 = vcombine.high %v8973_v10, %v8972_v50  ;;  %v4810_v6 = vcombine.low %v8973_v10, %v8972_v50  ;;  %v8974_v29 = vld [vmem:[#allocation188_spill] sm:$0xff]  ;;  %v8975_v52 = vld [vmem:[#allocation186_spill] sm:$0xff] }
 0x5db   :  { %4032 = vmatprep.subr.bf16.mxu1 %v4819_v33  ;;  %v4743_v31 = vcombine.high %v8975_v52, %v8974_v29  ;;  %v8976_v22 = vld [vmem:[#allocation252_spill] sm:$0xff]  ;;  %v8977_v34 = vld [vmem:[#allocation250_spill] sm:$0xff]  ;;  %v4742_v1 = vcombine.low %v8975_v52, %v8974_v29 }
 0x5dc   :  { %v4807_v62 = vcombine.high %v8977_v34, %v8976_v22  ;;  %v4806_v2 = vcombine.low %v8977_v34, %v8976_v22  ;;  %v8978_v12 = vld [vmem:[#allocation184_spill] sm:$0xff]  ;;  %v8979_v36 = vld [vmem:[#allocation182_spill] sm:$0xff] }
 0x5dd   :  { %3992 = vmatpush1.bf16.msra.mxu0 %v4754_v38  ;;  %v4739_v49 = vcombine.high %v8979_v36, %v8978_v12  ;;  %v8980_v39 = vld [vmem:[#allocation248_spill] sm:$0xff]  ;;  %v8981_v58 = vld [vmem:[#allocation246_spill] sm:$0xff]  ;;  %v4738_v5 = vcombine.low %v8979_v36, %v8978_v12 }
 0x5de   :  { %4033 = vmatpush1.bf16.msra.mxu1 %v4818_v8  ;;  %3993 = vmatprep.subr.bf16.mxu0 %v4751_v41  ;;  %v4803_v3 = vcombine.high %v8981_v58, %v8980_v39  ;;  %v4802_v43 = vcombine.low %v8981_v58, %v8980_v39  ;;  %v8982_v57 = vld [vmem:[#allocation244_spill] sm:$0xff]  ;;  %v8983_v27 = vld [vmem:[#allocation242_spill] sm:$0xff] }
 0x5df   :  { %4034 = vmatprep.subr.bf16.mxu1 %v4815_v60  ;;  %v4799_v44 = vcombine.high %v8983_v27, %v8982_v57  ;;  %v8984_v59 = vld [vmem:[#allocation308_spill] sm:$0xff]  ;;  %v8985_v35 = vld [vmem:[#allocation306_spill] sm:$0xff]  ;;  %v4798_v21 = vcombine.low %v8983_v27, %v8982_v57 }
 0x5e0   :  { %v4863_v26 = vcombine.high %v8985_v35, %v8984_v59  ;;  %v4862_v4 = vcombine.low %v8985_v35, %v8984_v59  ;;  %v8986_v51 = vld [vmem:[#allocation240_spill] sm:$0xff]  ;;  %v8987_v61 = vld [vmem:[#allocation238_spill] sm:$0xff] }
 0x5e1   :  { %3994 = vmatpush1.bf16.msra.mxu0 %v4750_v63  ;;  %v4795_v11 = vcombine.high %v8987_v61, %v8986_v51  ;;  %v8988_v48 = vld [vmem:[#allocation304_spill] sm:$0xff]  ;;  %v8989_v19 = vld [vmem:[#allocation302_spill] sm:$0xff]  ;;  %v4794_v23 = vcombine.low %v8987_v61, %v8986_v51  ;;  %v9014_v61 = vld [vmem:[#allocation213_spill] sm:$0xff] }
 0x5e2   :  { %4035 = vmatpush1.bf16.msra.mxu1 %v4814_v37  ;;  %3995 = vmatprep.subr.bf16.mxu0 %v4747_v55  ;;  %v4859_v47 = vcombine.high %v8989_v19, %v8988_v48  ;;  %v4858_v13 = vcombine.low %v8989_v19, %v8988_v48  ;;  %v8990_v46 = vld [vmem:[#allocation236_spill] sm:$0xff]  ;;  %v8991_v18 = vld [vmem:[#allocation234_spill] sm:$0xff]  ;;  %v9016_v19 = vld [vmem:[#allocation277_spill] sm:$0xff] }
 0x5e3   :  { %4036 = vmatprep.subr.bf16.mxu1 %v4811_v53  ;;  %v4791_v16 = vcombine.high %v8991_v18, %v8990_v46  ;;  %v8992_v28 = vld [vmem:[#allocation300_spill] sm:$0xff]  ;;  %v8993_v33 = vld [vmem:[#allocation298_spill] sm:$0xff]  ;;  %v4790_v8 = vcombine.low %v8991_v18, %v8990_v46  ;;  %v9018_v18 = vld [vmem:[#allocation209_spill] sm:$0xff] }
 0x5e4   :  { %v4855_v38 = vcombine.high %v8993_v33, %v8992_v28  ;;  %v4854_v14 = vcombine.low %v8993_v33, %v8992_v28  ;;  %v8994_v45 = vld [vmem:[#allocation232_spill] sm:$0xff]  ;;  %v8995_v41 = vld [vmem:[#allocation230_spill] sm:$0xff]  ;;  %v9020_v33 = vld [vmem:[#allocation273_spill] sm:$0xff] }
 0x5e5   :  { %3996 = vmatpush1.bf16.msra.mxu0 %v4746_v40  ;;  %v4787_v25 = vcombine.high %v8995_v41, %v8994_v45  ;;  %v8996_v54 = vld [vmem:[#allocation296_spill] sm:$0xff]  ;;  %v8997_v60 = vld [vmem:[#allocation294_spill] sm:$0xff]  ;;  %v4786_v37 = vcombine.low %v8995_v41, %v8994_v45  ;;  %v9022_v41 = vld [vmem:[#allocation205_spill] sm:$0xff] }
 0x5e6   :  { %4037 = vmatpush1.bf16.msra.mxu1 %v4810_v6  ;;  %3997 = vmatprep.subr.bf16.mxu0 %v4743_v31  ;;  %v4851_v63 = vcombine.high %v8997_v60, %v8996_v54  ;;  %v4850_v20 = vcombine.low %v8997_v60, %v8996_v54  ;;  %v8998_v17 = vld [vmem:[#allocation228_spill] sm:$0xff]  ;;  %v8999_v55 = vld [vmem:[#allocation226_spill] sm:$0xff]  ;;  %v9024_v60 = vld [vmem:[#allocation269_spill] sm:$0xff] }
 0x5e7   :  { %4038 = vmatprep.subr.bf16.mxu1 %v4807_v62  ;;  %v4783_v50 = vcombine.high %v8999_v55, %v8998_v17  ;;  %v9000_v10 = vld [vmem:[#allocation292_spill] sm:$0xff]  ;;  %v9001_v53 = vld [vmem:[#allocation290_spill] sm:$0xff]  ;;  %v4782_v6 = vcombine.low %v8999_v55, %v8998_v17  ;;  %v9026_v55 = vld [vmem:[#allocation201_spill] sm:$0xff] }
 0x5e8   :  { %v4847_v40 = vcombine.high %v9001_v53, %v9000_v10  ;;  %v4846_v29 = vcombine.low %v9001_v53, %v9000_v10  ;;  %v9002_v52 = vld [vmem:[#allocation224_spill] sm:$0xff]  ;;  %v9003_v31 = vld [vmem:[#allocation222_spill] sm:$0xff]  ;;  %v9028_v53 = vld [vmem:[#allocation265_spill] sm:$0xff] }
 0x5e9   :  { %3998 = vmatpush1.bf16.msra.mxu0 %v4742_v1  ;;  %v4779_v22 = vcombine.high %v9003_v31, %v9002_v52  ;;  %v9004_v34 = vld [vmem:[#allocation288_spill] sm:$0xff]  ;;  %v9005_v62 = vld [vmem:[#allocation286_spill] sm:$0xff] }
 0x5ea   :  { %4039 = vmatpush1.bf16.msra.mxu1 %v4806_v2  ;;  %3999 = vmatprep.subr.bf16.mxu0 %v4739_v49  ;;  %v4843_v1 = vcombine.high %v9005_v62, %v9004_v34  ;;  %v4778_v2 = vcombine.low %v9003_v31, %v9002_v52  ;;  %v4842_v12 = vcombine.low %v9005_v62, %v9004_v34  ;;  %v9006_v36 = vld [vmem:[#allocation220_spill] sm:$0xff]  ;;  %v9007_v49 = vld [vmem:[#allocation218_spill] sm:$0xff]  ;;  %v9031_v52 = vld [vmem:[#allocation195_spill] sm:$0xff] }
 0x5eb   :  { %4040 = vmatprep.subr.bf16.mxu1 %v4803_v3  ;;  %v4775_v39 = vcombine.high %v9007_v49, %v9006_v36  ;;  %v9008_v58 = vld [vmem:[#allocation284_spill] sm:$0xff]  ;;  %v9009_v3 = vld [vmem:[#allocation282_spill] sm:$0xff]  ;;  %v9033_v34 = vld [vmem:[#allocation259_spill] sm:$0xff] }
 0x5ec   :  { %v4838_v57 = vcombine.low %v9009_v3, %v9008_v58  ;;  %v9010_v27 = vld [vmem:[#allocation216_spill] sm:$0xff] }
 0x5ed   :  { %4000 = vmatpush1.bf16.msra.mxu0 %v4738_v5  ;;  %v4839_v5 = vcombine.high %v9009_v3, %v9008_v58  ;;  %v9012_v35 = vld [vmem:[#allocation280_spill] sm:$0xff]  ;;  %v9037_v58 = vld [vmem:[#allocation255_spill] sm:$0xff] }
 0x5ee   :  { %4041 = vmatpush1.bf16.msra.mxu1 %v4802_v43  ;;  %4001 = vmatprep.subr.bf16.mxu0 %v4799_v44  ;;  %v4774_v43 = vcombine.low %v9007_v49, %v9006_v36  ;;  %v9011_v44 = vld [vmem:[#allocation214_spill] sm:$0xff]  ;;  %v9035_v36 = vld [vmem:[#allocation191_spill] sm:$0xff] }
 0x5ef   :  { %4042 = vmatprep.subr.bf16.mxu1 %v4863_v26  ;;  %v4771_v59 = vcombine.high %v9011_v44, %v9010_v27  ;;  %v9013_v26 = vld [vmem:[#allocation278_spill] sm:$0xff] }
 0x5f0   :  { %v4834_v51 = vcombine.low %v9013_v26, %v9012_v35 }
 0x5f1   :  { %4002 = vmatpush2.bf16.msra.mxu0 %v4798_v21  ;;  %v4835_v21 = vcombine.high %v9013_v26, %v9012_v35  ;;  %v9041_v35 = vld [vmem:[#allocation251_spill] sm:$0xff] }
 0x5f2   :  { %4043 = vmatpush2.bf16.msra.mxu1 %v4862_v4  ;;  %4003 = vmatprep.subr.bf16.mxu0 %v4795_v11  ;;  %v4770_v4 = vcombine.low %v9011_v44, %v9010_v27  ;;  %v9015_v11 = vld [vmem:[#allocation211_spill] sm:$0xff] }
 0x5f3   :  { %4044 = vmatprep.subr.bf16.mxu1 %v4859_v47  ;;  %v4769_v48 = vcombine.high %v9015_v11, %v9014_v61  ;;  %v9017_v47 = vld [vmem:[#allocation275_spill] sm:$0xff] }
 0x5f4   :  { %v4832_v46 = vcombine.low %v9017_v47, %v9016_v19  ;;  %v9039_v27 = vld [vmem:[#allocation187_spill] sm:$0xff] }
 0x5f5   :  { %4004 = vmatpush2.bf16.msra.mxu0 %v4794_v23  ;;  %v4833_v23 = vcombine.high %v9017_v47, %v9016_v19  ;;  %v9045_v19 = vld [vmem:[#allocation247_spill] sm:$0xff] }
 0x5f6   :  { %4045 = vmatpush2.bf16.msra.mxu1 %v4858_v13  ;;  %4005 = vmatprep.subr.bf16.mxu0 %v4791_v16  ;;  %v4768_v13 = vcombine.low %v9015_v11, %v9014_v61  ;;  %v9019_v16 = vld [vmem:[#allocation207_spill] sm:$0xff] }
 0x5f7   :  { %4046 = vmatprep.subr.bf16.mxu1 %v4855_v38  ;;  %v4765_v28 = vcombine.high %v9019_v16, %v9018_v18  ;;  %v9021_v38 = vld [vmem:[#allocation271_spill] sm:$0xff] }
 0x5f8   :  { %v4828_v45 = vcombine.low %v9021_v38, %v9020_v33  ;;  %v9043_v61 = vld [vmem:[#allocation183_spill] sm:$0xff] }
 0x5f9   :  { %4006 = vmatpush2.bf16.msra.mxu0 %v4790_v8  ;;  %v4829_v8 = vcombine.high %v9021_v38, %v9020_v33  ;;  %v9049_v33 = vld [vmem:[#allocation307_spill] sm:$0xff] }
 0x5fa   :  { %4047 = vmatpush2.bf16.msra.mxu1 %v4854_v14  ;;  %4007 = vmatprep.subr.bf16.mxu0 %v4787_v25  ;;  %v4764_v14 = vcombine.low %v9019_v16, %v9018_v18  ;;  %v9023_v25 = vld [vmem:[#allocation203_spill] sm:$0xff] }
 0x5fb   :  { %4048 = vmatprep.subr.bf16.mxu1 %v4851_v63  ;;  %v4761_v54 = vcombine.high %v9023_v25, %v9022_v41  ;;  %v9025_v63 = vld [vmem:[#allocation267_spill] sm:$0xff] }
 0x5fc   :  { %v4824_v17 = vcombine.low %v9025_v63, %v9024_v60  ;;  %v9047_v18 = vld [vmem:[#allocation243_spill] sm:$0xff] }
 0x5fd   :  { %4008 = vmatpush2.bf16.msra.mxu0 %v4786_v37  ;;  %v4825_v37 = vcombine.high %v9025_v63, %v9024_v60  ;;  %v9053_v60 = vld [vmem:[#allocation303_spill] sm:$0xff] }
 0x5fe   :  { %4049 = vmatpush2.bf16.msra.mxu1 %v4850_v20  ;;  %4009 = vmatprep.subr.bf16.mxu0 %v4783_v50  ;;  %v4760_v20 = vcombine.low %v9023_v25, %v9022_v41  ;;  %v9027_v50 = vld [vmem:[#allocation199_spill] sm:$0xff] }
 0x5ff   :  { %4050 = vmatprep.subr.bf16.mxu1 %v4847_v40  ;;  %v4757_v10 = vcombine.high %v9027_v50, %v9026_v55  ;;  %v9029_v40 = vld [vmem:[#allocation263_spill] sm:$0xff] }
 0x600   :  { %v9051_v41 = vld [vmem:[#allocation239_spill] sm:$0xff] }
 0x601   :  { %4010 = vmatpush2.bf16.msra.mxu0 %v4782_v6  ;;  %v4821_v6 = vcombine.high %v9029_v40, %v9028_v53 }
 0x602   :  { %4051 = vmatpush2.bf16.msra.mxu1 %v4846_v29  ;;  %4011 = vmatprep.subr.bf16.mxu0 %v4779_v22  ;;  %v9030_v29 = vld [vmem:[#allocation197_spill] sm:$0xff] }
 0x603   :  { %4052 = vmatprep.subr.bf16.mxu1 %v4843_v1  ;;  %v4753_v31 = vcombine.high %v9031_v52, %v9030_v29  ;;  %v9032_v22 = vld [vmem:[#allocation261_spill] sm:$0xff]  ;;  %v4752_v1 = vcombine.low %v9031_v52, %v9030_v29  ;;  %v9059_v29 = vld [vmem:[#allocation231_spill] sm:$0xff] }
 0x604   :  { %v4817_v62 = vcombine.high %v9033_v34, %v9032_v22 }
 0x605   :  { %4012 = vmatpush2.bf16.msra.mxu0 %v4778_v2  ;;  %v4816_v2 = vcombine.low %v9033_v34, %v9032_v22  ;;  %v9061_v22 = vld [vmem:[#allocation295_spill] sm:$0xff] }
 0x606   :  { %4053 = vmatpush2.bf16.msra.mxu1 %v4842_v12  ;;  %4013 = vmatprep.subr.bf16.mxu0 %v4775_v39  ;;  %v9034_v12 = vld [vmem:[#allocation193_spill] sm:$0xff] }
 0x607   :  { %4054 = vmatprep.subr.bf16.mxu1 %v4839_v5  ;;  %v4749_v49 = vcombine.high %v9035_v36, %v9034_v12  ;;  %v9036_v39 = vld [vmem:[#allocation257_spill] sm:$0xff]  ;;  %v4748_v5 = vcombine.low %v9035_v36, %v9034_v12  ;;  %v9063_v12 = vld [vmem:[#allocation227_spill] sm:$0xff] }
 0x608   :  { %v4813_v3 = vcombine.high %v9037_v58, %v9036_v39 }
 0x609   :  { %4014 = vmatpush2.bf16.msra.mxu0 %v4774_v43  ;;  %v4812_v43 = vcombine.low %v9037_v58, %v9036_v39  ;;  %v9065_v39 = vld [vmem:[#allocation291_spill] sm:$0xff] }
 0x60a   :  { %4055 = vmatpush2.bf16.msra.mxu1 %v4838_v57  ;;  %4015 = vmatprep.subr.bf16.mxu0 %v4771_v59  ;;  %v9038_v57 = vld [vmem:[#allocation189_spill] sm:$0xff] }
 0x60b   :  { %4056 = vmatprep.subr.bf16.mxu1 %v4835_v21  ;;  %v4745_v44 = vcombine.high %v9039_v27, %v9038_v57  ;;  %v9040_v59 = vld [vmem:[#allocation253_spill] sm:$0xff]  ;;  %v4744_v21 = vcombine.low %v9039_v27, %v9038_v57  ;;  %v9067_v57 = vld [vmem:[#allocation223_spill] sm:$0xff] }
 0x60c   :  { %v4809_v26 = vcombine.high %v9041_v35, %v9040_v59 }
 0x60d   :  { %4016 = vmatpush2.bf16.msra.mxu0 %v4770_v4  ;;  %v4808_v4 = vcombine.low %v9041_v35, %v9040_v59  ;;  %v9069_v59 = vld [vmem:[#allocation287_spill] sm:$0xff] }
 0x60e   :  { %4057 = vmatpush2.bf16.msra.mxu1 %v4834_v51  ;;  %4067 = vmatprep.subr.bf16.mxu0 %v4769_v48  ;;  %v9042_v51 = vld [vmem:[#allocation185_spill] sm:$0xff] }
 0x60f   :  { %4108 = vmatprep.subr.bf16.mxu1 %v4833_v23  ;;  %v4741_v11 = vcombine.high %v9043_v61, %v9042_v51  ;;  %v9044_v48 = vld [vmem:[#allocation249_spill] sm:$0xff]  ;;  %v4740_v23 = vcombine.low %v9043_v61, %v9042_v51  ;;  %v9071_v51 = vld [vmem:[#allocation219_spill] sm:$0xff] }
 0x610   :  { %4018 = vmatmul.mubr.bf16.vlgmr.msra.gmra.mxu0 %v7907_v24  ;;  %v4805_v47 = vcombine.high %v9045_v19, %v9044_v48 }
 0x611   :  { %4059 = vmatmul.mubr.bf16.vlgmr.msra.gmra.mxu1 %v7915_v0  ;;  %4068 = vmatpush1.bf16.msra.mxu0 %v4768_v13  ;;  %v4804_v13 = vcombine.low %v9045_v19, %v9044_v48  ;;  %v9073_v48 = vld [vmem:[#allocation283_spill] sm:$0xff] }
 0x612   :  { %4109 = vmatpush1.bf16.msra.mxu1 %v4832_v46  ;;  %4069 = vmatprep.subr.bf16.mxu0 %v4765_v28  ;;  %v9046_v46 = vld [vmem:[#allocation245_spill] sm:$0xff] }
 0x613   :  { %4110 = vmatprep.subr.bf16.mxu1 %v4829_v8  ;;  %4099 = vmatprep.mubr.bf16.mxu0 %v7909_v15  ;;  %v4756_v15 = vcombine.low %v9027_v50, %v9026_v55  ;;  %v4801_v16 = vcombine.high %v9047_v18, %v9046_v46  ;;  %v9048_v28 = vld [vmem:[#allocation309_spill] sm:$0xff]  ;;  %v4800_v8 = vcombine.low %v9047_v18, %v9046_v46  ;;  %v9055_v55 = vld [vmem:[#allocation235_spill] sm:$0xff] }
 0x614   :  { %4140 = vmatprep.mubr.bf16.mxu1 %v7917_v56  ;;  %v4820_v56 = vcombine.low %v9029_v40, %v9028_v53  ;;  %v4865_v38 = vcombine.high %v9049_v33, %v9048_v28  ;;  %v9057_v53 = vld [vmem:[#allocation299_spill] sm:$0xff] }
 0x615   :  { %4070 = vmatpush1.bf16.msra.mxu0 %v4764_v14  ;;  %v4864_v14 = vcombine.low %v9049_v33, %v9048_v28  ;;  %v9075_v46 = vld [vmem:[#allocation215_spill] sm:$0xff] }
 0x616   :  { %4111 = vmatpush1.bf16.msra.mxu1 %v4828_v45  ;;  %4071 = vmatprep.subr.bf16.mxu0 %v4761_v54  ;;  %v9050_v45 = vld [vmem:[#allocation241_spill] sm:$0xff]  ;;  %v9077_v28 = vld [vmem:[#allocation279_spill] sm:$0xff] }
 0x617   :  { %4112 = vmatprep.subr.bf16.mxu1 %v4825_v37  ;;  %v4797_v25 = vcombine.high %v9051_v41, %v9050_v45  ;;  %v9052_v54 = vld [vmem:[#allocation305_spill] sm:$0xff]  ;;  %v4796_v37 = vcombine.low %v9051_v41, %v9050_v45 }
 0x618   :  { %v4861_v63 = vcombine.high %v9053_v60, %v9052_v54 }
 0x619   :  { %4072 = vmatpush1.bf16.msra.mxu0 %v4760_v20  ;;  %v4860_v20 = vcombine.low %v9053_v60, %v9052_v54 }
 0x61a   :  { %4113 = vmatpush1.bf16.msra.mxu1 %v4824_v17  ;;  %4073 = vmatprep.subr.bf16.mxu0 %v4757_v10  ;;  %v9054_v17 = vld [vmem:[#allocation237_spill] sm:$0xff] }
 0x61b   :  { %4114 = vmatprep.subr.bf16.mxu1 %v4821_v6  ;;  %v4793_v50 = vcombine.high %v9055_v55, %v9054_v17  ;;  %v9056_v10 = vld [vmem:[#allocation301_spill] sm:$0xff]  ;;  %v4792_v6 = vcombine.low %v9055_v55, %v9054_v17 }
 0x61c   :  { %v4857_v40 = vcombine.high %v9057_v53, %v9056_v10 }
 0x61d   :  { %4074 = vmatpush1.bf16.msra.mxu0 %v4756_v15  ;;  %v4856_v15 = vcombine.low %v9057_v53, %v9056_v10 }
 0x61e   :  { %4115 = vmatpush1.bf16.msra.mxu1 %v4820_v56  ;;  %4075 = vmatprep.subr.bf16.mxu0 %v4753_v31  ;;  %v9058_v56 = vld [vmem:[#allocation233_spill] sm:$0xff] }
 0x61f   :  { %4116 = vmatprep.subr.bf16.mxu1 %v4817_v62  ;;  %v4789_v52 = vcombine.high %v9059_v29, %v9058_v56  ;;  %v9060_v31 = vld [vmem:[#allocation297_spill] sm:$0xff]  ;;  %v4788_v62 = vcombine.low %v9059_v29, %v9058_v56 }
 0x620   :  { %v4853_v34 = vcombine.high %v9061_v22, %v9060_v31 }
 0x621   :  { %4076 = vmatpush1.bf16.msra.mxu0 %v4752_v1  ;;  %v4852_v1 = vcombine.low %v9061_v22, %v9060_v31 }
 0x622   :  { %4117 = vmatpush1.bf16.msra.mxu1 %v4816_v2  ;;  %4077 = vmatprep.subr.bf16.mxu0 %v4749_v49  ;;  %v9062_v2 = vld [vmem:[#allocation229_spill] sm:$0xff] }
 0x623   :  { %4118 = vmatprep.subr.bf16.mxu1 %v4813_v3  ;;  %v4785_v36 = vcombine.high %v9063_v12, %v9062_v2  ;;  %v9064_v49 = vld [vmem:[#allocation293_spill] sm:$0xff]  ;;  %v4784_v3 = vcombine.low %v9063_v12, %v9062_v2 }
 0x624   :  { %v4849_v58 = vcombine.high %v9065_v39, %v9064_v49 }
 0x625   :  { %4078 = vmatpush1.bf16.msra.mxu0 %v4748_v5  ;;  %v4848_v5 = vcombine.low %v9065_v39, %v9064_v49 }
 0x626   :  { %4119 = vmatpush1.bf16.msra.mxu1 %v4812_v43  ;;  %4079 = vmatprep.subr.bf16.mxu0 %v4745_v44  ;;  %v9066_v43 = vld [vmem:[#allocation225_spill] sm:$0xff] }
 0x627   :  { %4120 = vmatprep.subr.bf16.mxu1 %v4809_v26  ;;  %v4781_v27 = vcombine.high %v9067_v57, %v9066_v43  ;;  %v9068_v44 = vld [vmem:[#allocation289_spill] sm:$0xff]  ;;  %v4780_v26 = vcombine.low %v9067_v57, %v9066_v43 }
 0x628   :  { %v4845_v35 = vcombine.high %v9069_v59, %v9068_v44 }
 0x629   :  { %4080 = vmatpush1.bf16.msra.mxu0 %v4744_v21  ;;  %v4844_v21 = vcombine.low %v9069_v59, %v9068_v44 }
 0x62a   :  { %4121 = vmatpush1.bf16.msra.mxu1 %v4808_v4  ;;  %4081 = vmatprep.subr.bf16.mxu0 %v4741_v11  ;;  %v9070_v4 = vld [vmem:[#allocation221_spill] sm:$0xff] }
 0x62b   :  { %4122 = vmatprep.subr.bf16.mxu1 %v4805_v47  ;;  %v4777_v61 = vcombine.high %v9071_v51, %v9070_v4  ;;  %v9072_v11 = vld [vmem:[#allocation285_spill] sm:$0xff]  ;;  %v4776_v47 = vcombine.low %v9071_v51, %v9070_v4 }
 0x62c   :  { %v4841_v19 = vcombine.high %v9073_v48, %v9072_v11 }
 0x62d   :  { %4082 = vmatpush1.bf16.msra.mxu0 %v4740_v23  ;;  %v4840_v23 = vcombine.low %v9073_v48, %v9072_v11 }
 0x62e   :  { %4123 = vmatpush1.bf16.msra.mxu1 %v4804_v13  ;;  %4083 = vmatprep.subr.bf16.mxu0 %v4801_v16  ;;  %v9074_v13 = vld [vmem:[#allocation217_spill] sm:$0xff] }
 0x62f   :  { %4124 = vmatprep.subr.bf16.mxu1 %v4865_v38  ;;  %v4773_v18 = vcombine.high %v9075_v46, %v9074_v13  ;;  %v9076_v16 = vld [vmem:[#allocation281_spill] sm:$0xff]  ;;  %v4772_v38 = vcombine.low %v9075_v46, %v9074_v13 }
 0x630   :  { %v4837_v33 = vcombine.high %v9077_v28, %v9076_v16 }
 0x631   :  { %4084 = vmatpush2.bf16.msra.mxu0 %v4800_v8  ;;  %v4836_v8 = vcombine.low %v9077_v28, %v9076_v16 }
 0x632   :  { %4125 = vmatpush2.bf16.msra.mxu1 %v4864_v14  ;;  %4085 = vmatprep.subr.bf16.mxu0 %v4797_v25  ;;  %v3323_v14 = vld [vmem:[#allocation23] sm:$0xf] }
 0x633   :  { %4126 = vmatprep.subr.bf16.mxu1 %v4861_v63  ;;  %v3968_v45 = vrot.slane %v3323_v14, %v7563_v9  ;;  %v3972_v41 = vrot.slane %v3323_v14, %v7565_v42  ;;  %v3976_v9 = vrot.slane %v3323_v14, %v7567_v30  ;;  %v3980_v42 = vrot.slane %v3323_v14, %v7569_v7 }
 0x635   :  { %4086 = vmatpush2.bf16.msra.mxu0 %v4796_v37 }
 0x636   :  { %4127 = vmatpush2.bf16.msra.mxu1 %v4860_v20  ;;  %4087 = vmatprep.subr.bf16.mxu0 %v4793_v50 }
 0x637   :  { %4128 = vmatprep.subr.bf16.mxu1 %v4857_v40 }
 0x639   :  { %4088 = vmatpush2.bf16.msra.mxu0 %v4792_v6 }
 0x63a   :  { %4129 = vmatpush2.bf16.msra.mxu1 %v4856_v15  ;;  %4089 = vmatprep.subr.bf16.mxu0 %v4789_v52 }
 0x63b   :  { %4130 = vmatprep.subr.bf16.mxu1 %v4853_v34 }
 0x63d   :  { %4090 = vmatpush2.bf16.msra.mxu0 %v4788_v62 }
 0x63e   :  { %4131 = vmatpush2.bf16.msra.mxu1 %v4852_v1  ;;  %4091 = vmatprep.subr.bf16.mxu0 %v4785_v36 }
 0x63f   :  { %4132 = vmatprep.subr.bf16.mxu1 %v4849_v58 }
 0x641   :  { %4092 = vmatpush2.bf16.msra.mxu0 %v4784_v3 }
 0x642   :  { %4133 = vmatpush2.bf16.msra.mxu1 %v4848_v5  ;;  %4093 = vmatprep.subr.bf16.mxu0 %v4781_v27 }
 0x643   :  { %4134 = vmatprep.subr.bf16.mxu1 %v4845_v35 }
 0x645   :  { %4094 = vmatpush2.bf16.msra.mxu0 %v4780_v26 }
 0x646   :  { %4135 = vmatpush2.bf16.msra.mxu1 %v4844_v21  ;;  %4095 = vmatprep.subr.bf16.mxu0 %v4777_v61 }
 0x647   :  { %4136 = vmatprep.subr.bf16.mxu1 %v4841_v19 }
 0x649   :  { %4096 = vmatpush2.bf16.msra.mxu0 %v4776_v47 }
 0x64a   :  { %4137 = vmatpush2.bf16.msra.mxu1 %v4840_v23  ;;  %4097 = vmatprep.subr.bf16.mxu0 %v4773_v18 }
 0x64b   :  { %4138 = vmatprep.subr.bf16.mxu1 %v4837_v33 }
 0x64d   :  { %4098 = vmatpush2.bf16.msra.mxu0 %v4772_v38 }
 0x64e   :  { %4139 = vmatpush2.bf16.msra.mxu1 %v4836_v8 }
 0x650   :  { %4100 = vmatmul.mubr.bf16.vlgmr.msra.gmra.mxu0 %v7907_v24 }
 0x651   :  { %4141 = vmatmul.mubr.bf16.vlgmr.msra.gmra.mxu1 %v7915_v0 }
 0x6d0   :  { %v4019_v25 = vpop.f32.mrf.mxu0 }
 0x6d1   :  { %v4060_v54 = vpop.f32.mrf.mxu1  ;;  %v4020_v60 = vadd.f32 %v4019_v25, %v3968_v45 }
 0x6d2   :  { %v4021_v63 = vpop.f32.mrf.mxu0 }
 0x6d3   :  { %v4062_v37 = vpop.f32.mrf.mxu1  ;;  %v4061_v20 = vadd.f32 %v4060_v54, %v4020_v60  ;;  %v4022_v17 = vadd.f32 %v4021_v63, %v3972_v41 }
 0x6d4   :  { %v4023_v55 = vpop.f32.mrf.mxu0 }
 0x6d5   :  { %v4064_v50 = vpop.f32.mrf.mxu1  ;;  %v4149_v10 = vmax.f32 %v4061_v20, 0.0  ;;  %v4063_v53 = vadd.f32 %v4062_v37, %v4022_v17 }
 0x6d6   :  { %v4024_v40 = vpop.f32.mrf.mxu0 }
 0x6d7   :  { %v4065_v24 = vpop.f32.mrf.mxu1  ;;  %v4153_v6 = vpack.c.bf16 %v4149_v10, %v4149_v10  ;;  %v4150_v0 = vmax.f32 %v4063_v53, 0.0 }
 0x6d9   :  { %v4154_v15 = vpack.c.bf16 %v4150_v0, %v4150_v0 }
 0x710   :  { %v4101_v56 = vpop.f32.mrf.mxu0 }
 0x711   :  { %v4142_v29 = vpop.f32.mrf.mxu1  ;;  %v4102_v52 = vadd.f32 %v4101_v56, %v3976_v9 }
 0x712   :  { %v4103_v31 = vpop.f32.mrf.mxu0 }
 0x713   :  { %v4144_v22 = vpop.f32.mrf.mxu1  ;;  %v4143_v34 = vadd.f32 %v4142_v29, %v4102_v52  ;;  %v4104_v62 = vadd.f32 %v4103_v31, %v3980_v42 }
 0x714   :  { %v4105_v1 = vpop.f32.mrf.mxu0 }
 0x715   :  { %v4146_v2 = vpop.f32.mrf.mxu1  ;;  %v4151_v12 = vmax.f32 %v4143_v34, 0.0  ;;  %v4145_v36 = vadd.f32 %v4144_v22, %v4104_v62 }
 0x716   :  { %v4106_v49 = vpop.f32.mrf.mxu0 }
 0x717   :  { %v4147_v39 = vpop.f32.mrf.mxu1  ;;  %v8187_v58 = vpack.c.bf16 %v4151_v12, %v4151_v12  ;;  %v4152_v3 = vmax.f32 %v4145_v36, 0.0 }
 0x719   :  { %v4156_v5 = vpack.c.bf16 %v4152_v3, %v4152_v3 }
 0x71a   :  { %5364 = dma.done.wait [#allocation9 + $0x4], 2048 }
 0x71b   :  { %5365 = vsyncadd [#allocation9 + $0x4], 4294965248  ;;  %4322 = vmatprep.mubr.bf16.mxu0 %v4154_v15  ;;  %v5014_v30 = vld [vmem:[#allocation6 + $0x78] sm:$0xff]   ;;  %v5016_v43 = vld [vmem:[#allocation6 + $0x70] sm:$0xff]   ;;  %vm4330_vm0 = vcmp.lt.s32.totalorder %v7496_v32, 5  ;;  %vm4332_vm1 = vcmask 1040384  }
 0x71c   :  { %v5015_v7 = vld [vmem:[#allocation6 + $0x38] sm:$0xff]   ;;  %4913 = vmatprep.subr.bf16.mxu0 %v5014_v30  ;;  %v5017_v57 = vld [vmem:[#allocation6 + $0x30] sm:$0xff]   ;;  %v5018_v27 = vld [vmem:[#allocation6 + $0x68] sm:$0xff]  }
 0x71d   :  { %4914 = vmatpush3.bf16.msra.mxu0 %v5015_v7  ;;  %v5019_v44 = vld [vmem:[#allocation6 + $0x28] sm:$0xff]   ;;  %v5020_v59 = vld [vmem:[#allocation6 + $0x60] sm:$0xff]   ;;  %v5022_v26 = vld [vmem:[#allocation6 + $0x58] sm:$0xff]  }
 0x71e   :  { %4915 = vmatprep.subr.bf16.mxu0 %v5016_v43  ;;  %v5021_v35 = vld [vmem:[#allocation6 + $0x20] sm:$0xff]   ;;  %v5023_v21 = vld [vmem:[#allocation6 + $0x18] sm:$0xff]   ;;  %v5024_v4 = vld [vmem:[#allocation6 + $0x50] sm:$0xff]  }
 0x71f   :  { %v5025_v51 = vld [vmem:[#allocation6 + $0x10] sm:$0xff]   ;;  %v5026_v61 = vld [vmem:[#allocation6 + $0x48] sm:$0xff]   ;;  %v5028_v48 = vld [vmem:[#allocation6 + $0x40] sm:$0xff]  }
 0x720   :  { %v5027_v11 = vld [vmem:[#allocation6 + $0x8] sm:$0xff]   ;;  %v5029_v19 = vld [vmem:[#allocation6] sm:$0xff]   ;;  %v4193_v23 = vld [vmem:[#allocation24] sm:$0x1] }
 0x721   :  { %4916 = vmatpush3.bf16.msra.mxu0 %v5017_v57 }
 0x722   :  { %4917 = vmatprep.subr.bf16.mxu0 %v5018_v27 }
 0x725   :  { %4918 = vmatpush3.bf16.msra.mxu0 %v5019_v44 }
 0x726   :  { %4919 = vmatprep.subr.bf16.mxu0 %v5020_v59 }
 0x729   :  { %4920 = vmatpush3.bf16.msra.mxu0 %v5021_v35 }
 0x72a   :  { %4921 = vmatprep.subr.bf16.mxu0 %v5022_v26 }
 0x72d   :  { %4922 = vmatpush3.bf16.msra.mxu0 %v5023_v21 }
 0x72e   :  { %4923 = vmatprep.subr.bf16.mxu0 %v5024_v4 }
 0x731   :  { %4924 = vmatpush3.bf16.msra.mxu0 %v5025_v51 }
 0x732   :  { %4925 = vmatprep.subr.bf16.mxu0 %v5026_v61 }
 0x735   :  { %4926 = vmatpush3.bf16.msra.mxu0 %v5027_v11 }
 0x736   :  { %4927 = vmatprep.subr.bf16.mxu0 %v5028_v48 }
 0x739   :  { %4928 = vmatpush3.bf16.msra.mxu0 %v5029_v19 }
 0x73c   :  { %4323 = vmatmul.mubr.bf16.vlgmr.msra.gmra.mxu0 %v4153_v6 }
 0x7fc   :  { %v4929_v47 = vpop.f32.mrf.mxu0 }
 0x7fe   :  { %v4930_v13 = vpop.f32.mrf.mxu0 }
 0x7ff   :  { %v4931_v46 = vadd.f32 %v4930_v13, %v4929_v47 }
 0x800   :  { %v4932_v18 = vpop.f32.mrf.mxu0 }
 0x801   :  { %v4325_v16 = vadd.f32 %v4931_v46, %v4193_v23 }
 0x802   :  { %v4933_v28 = vpop.f32.mrf.mxu0 }
 0x803   :  { %v4331_v33 = vsel %vm4330_vm0, %v4325_v16, -1e+30 }
 0x804   :  { %v4333_v38 = vsel %vm4332_vm1, %v4331_v33, -inf }
 0x805   :  { %4334 = vmax.xlane.f32.xlu0 %v4333_v38 }
 0x88e   :  { %v4335_v8 = vpop.xlane.xlu0 %4334 }
 0x88f   :  { %v4336_v14 = vsub.f32 %v4331_v33, %v4335_v8 }
 0x891   :  { %v4337_v45 = vmul.f32 1.442695, %v4336_v14 }
 0x893   :  { %5030 = vpow2.f32 %v4337_v45 }
 0x8a0   :  { %v5031_v41 = vpop.eup %5030 }
 0x8a1   :  { %v4339_v25 = vsel %vm4332_vm1, %v5031_v41, 0.0 }
 0x8a2   :  { %4340 = vadd.xlane.f32.xlu0 %v4339_v25 }
 0x92b   :  { %v4341_v54 = vpop.xlane.xlu0 %4340 }
 0x92c   :  { %5032 = vrcp.f32 %v4341_v54 }
 0x939   :  { %v5033_v60 = vpop.eup %5032 }
 0x93a   :  { %v8192_v63 = vmul.f32 %v5033_v60, %v5031_v41 }
 0x93b   :  { %5366 = dma.done.wait [#allocation9 + $0x5], 2048 }
 0x93c   :  { %5367 = vsyncadd [#allocation9 + $0x5], 4294965248  ;;  %4507 = vmatprep.mubr.bf16.mxu1 %v4156_v5  ;;  %v5034_v37 = vld [vmem:[#allocation7 + $0x78] sm:$0xff]   ;;  %v5036_v17 = vld [vmem:[#allocation7 + $0x70] sm:$0xff]  }
 0x93d   :  { %v5035_v20 = vld [vmem:[#allocation7 + $0x38] sm:$0xff]   ;;  %4935 = vmatprep.subr.bf16.mxu1 %v5034_v37  ;;  %v5037_v55 = vld [vmem:[#allocation7 + $0x30] sm:$0xff]   ;;  %v5038_v50 = vld [vmem:[#allocation7 + $0x68] sm:$0xff]  }
 0x93e   :  { %4936 = vmatpush3.bf16.msra.mxu1 %v5035_v20  ;;  %v5039_v10 = vld [vmem:[#allocation7 + $0x28] sm:$0xff]   ;;  %v5040_v53 = vld [vmem:[#allocation7 + $0x60] sm:$0xff]   ;;  %v5042_v24 = vld [vmem:[#allocation7 + $0x58] sm:$0xff]  }
 0x93f   :  { %4937 = vmatprep.subr.bf16.mxu1 %v5036_v17  ;;  %v5041_v40 = vld [vmem:[#allocation7 + $0x20] sm:$0xff]   ;;  %v5043_v6 = vld [vmem:[#allocation7 + $0x18] sm:$0xff]   ;;  %v5044_v0 = vld [vmem:[#allocation7 + $0x50] sm:$0xff]  }
 0x940   :  { %v5045_v15 = vld [vmem:[#allocation7 + $0x10] sm:$0xff]   ;;  %v5046_v9 = vld [vmem:[#allocation7 + $0x48] sm:$0xff]   ;;  %v5048_v56 = vld [vmem:[#allocation7 + $0x40] sm:$0xff]  }
 0x941   :  { %v5047_v42 = vld [vmem:[#allocation7 + $0x8] sm:$0xff]   ;;  %v5049_v29 = vld [vmem:[#allocation7] sm:$0xff]   ;;  %v4378_v31 = vld [vmem:[#allocation26] sm:$0x1] }
 0x942   :  { %4938 = vmatpush3.bf16.msra.mxu1 %v5037_v55 }
 0x943   :  { %4939 = vmatprep.subr.bf16.mxu1 %v5038_v50 }
 0x946   :  { %4940 = vmatpush3.bf16.msra.mxu1 %v5039_v10 }
 0x947   :  { %4941 = vmatprep.subr.bf16.mxu1 %v5040_v53 }
 0x94a   :  { %4942 = vmatpush3.bf16.msra.mxu1 %v5041_v40 }
 0x94b   :  { %4943 = vmatprep.subr.bf16.mxu1 %v5042_v24 }
 0x94e   :  { %4944 = vmatpush3.bf16.msra.mxu1 %v5043_v6 }
 0x94f   :  { %4945 = vmatprep.subr.bf16.mxu1 %v5044_v0 }
 0x952   :  { %4946 = vmatpush3.bf16.msra.mxu1 %v5045_v15 }
 0x953   :  { %4947 = vmatprep.subr.bf16.mxu1 %v5046_v9 }
 0x956   :  { %4948 = vmatpush3.bf16.msra.mxu1 %v5047_v42 }
 0x957   :  { %4949 = vmatprep.subr.bf16.mxu1 %v5048_v56 }
 0x95a   :  { %4950 = vmatpush3.bf16.msra.mxu1 %v5049_v29 }
 0x95d   :  { %4508 = vmatmul.mubr.bf16.vlgmr.msra.gmra.mxu1 %v8187_v58 }
 0xa1d   :  { %v4951_v52 = vpop.f32.mrf.mxu1 }
 0xa1f   :  { %v4952_v22 = vpop.f32.mrf.mxu1 }
 0xa20   :  { %v4953_v34 = vadd.f32 %v4952_v22, %v4951_v52 }
 0xa21   :  { %v4954_v62 = vpop.f32.mrf.mxu1 }
 0xa22   :  { %v4510_v1 = vadd.f32 %v4953_v34, %v4378_v31 }
 0xa23   :  { %v4955_v2 = vpop.f32.mrf.mxu1 }
 0xa24   :  { %v4515_v12 = vmax.f32 %v4510_v1, 0.0 }
 0xa25   :  { %5368 = dma.done.wait [#allocation9 + $0x6], 1024 }
 0xa26   :  { %5369 = vsyncadd [#allocation9 + $0x6], 4294966272  ;;  %v5384_v36 = vmov 0.0   ;;  %vm5385_vm2 = vmmov 0   ;;  %v5050_v49 = vld [vmem:[#allocation8 + $0x38] sm:$0xff]   ;;  %v5051_v39 = vld [vmem:[#allocation8 + $0x30] sm:$0xff]   ;;  %v4520_v57 = vpack.c.bf16 %v4515_v12, %v4515_v12 }
 0xa27   :  { %4966 = vmatprep.subr.bf16.mxu0 %v5384_v36  ;;  %4982 = vmatprep.mubr.msk.bf16.mxu0 %vm5385_vm2, %v5384_v36  ;;  %v5052_v58 = vld [vmem:[#allocation8 + $0x28] sm:$0xff]   ;;  %v5053_v3 = vld [vmem:[#allocation8 + $0x20] sm:$0xff]   ;;  %v5054_v5 = vld [vmem:[#allocation8 + $0x18] sm:$0xff]   ;;  %vm4632_vm3 = vcmp.eq.s32.totalorder %v7496_v32, 5  ;;  %v4631_v48 = vsel %vm4330_vm0, %v8192_v63, 0.0 }
 0xa28   :  { %4967 = vmatpush3.bf16.msra.mxu0 %v5050_v49  ;;  %v5055_v30 = vld [vmem:[#allocation8 + $0x10] sm:$0xff]   ;;  %v5056_v7 = vld [vmem:[#allocation8 + $0x8] sm:$0xff]   ;;  %v5057_v43 = vld [vmem:[#allocation8] sm:$0xff]  }
 0xa29   :  { %4968 = vmatprep.subr.bf16.mxu0 %v5384_v36  ;;  %v4537_v27 = vld [vmem:[#allocation27] sm:$0x1] }
 0xa2c   :  { %4969 = vmatpush3.bf16.msra.mxu0 %v5051_v39 }
 0xa2d   :  { %4970 = vmatprep.subr.bf16.mxu0 %v5384_v36 }
 0xa30   :  { %4971 = vmatpush3.bf16.msra.mxu0 %v5052_v58 }
 0xa31   :  { %4972 = vmatprep.subr.bf16.mxu0 %v5384_v36 }
 0xa34   :  { %4973 = vmatpush3.bf16.msra.mxu0 %v5053_v3 }
 0xa35   :  { %4974 = vmatprep.subr.bf16.mxu0 %v5384_v36 }
 0xa38   :  { %4975 = vmatpush3.bf16.msra.mxu0 %v5054_v5 }
 0xa39   :  { %4976 = vmatprep.subr.bf16.mxu0 %v5384_v36 }
 0xa3c   :  { %4977 = vmatpush3.bf16.msra.mxu0 %v5055_v30 }
 0xa3d   :  { %4978 = vmatprep.subr.bf16.mxu0 %v5384_v36 }
 0xa40   :  { %4979 = vmatpush3.bf16.msra.mxu0 %v5056_v7 }
 0xa41   :  { %4980 = vmatprep.subr.bf16.mxu0 %v5384_v36 }
 0xa44   :  { %4981 = vmatpush3.bf16.msra.mxu0 %v5057_v43 }
 0xa47   :  { %4983 = vmatmul.mubr.bf16.vlgmr.msra.gmra.mxu0 %v4520_v57 }
 0xb07   :  { %v4620_v44 = vpop.f32.mrf.mxu0 }
 0xb08   :  { %v4621_v59 = vadd.f32 %v4620_v44, %v4537_v27 }
 0xb09   :  { %v4984_v35 = vpop.f32.mrf.mxu0 }
 0xb0a   :  { %v4626_v26 = vsub.f32 0.0, %v4621_v59 }
 0xb0b   :  { %v4623_v21 = vpop.f32.mrf.mxu0 }
 0xb0c   :  { %v4627_v4 = vmul.f32 1.442695, %v4626_v26 }
 0xb0d   :  { %v4985_v51 = vpop.f32.mrf.mxu0 }
 0xb0e   :  { %5058 = vpow2.f32 %v4627_v4 }
 0xb1b   :  { %v5059_v61 = vpop.eup %5058 }
 0xb1c   :  { %v4629_v11 = vadd.f32 1.0, %v5059_v61 }
 0xb1e   :  { %5060 = vrcp.f32 %v4629_v11 }
 0xb2b   :  { %v5061_v19 = vpop.eup %5060 }
 0xb2c   :  { %v4633_v47 = vsel %vm4632_vm3, %v5061_v19, 0.0 }
 0xb2d   :  { %v4634_v23 = vadd.f32 %v4633_v47, %v4631_v48 }
 0xb2f   :  { %4635 = vst [vmem:[%s8222_s20] sm:$0x1] %v4634_v23 }
 0xb30   :  { %4640 = vsyncpa [#allocation11], 1 }
 0xb31   :  { %4641 = vsyncpa [#allocation13], 1 }
 0xb32   :  { %4642 = vsyncpa [#allocation16], 1 }
 0xb33   :  { %4643 = vsyncpa [#allocation19], 1 }
 0xb34   :  { %4644 = vsyncpa [#allocation22], 1 }
 0xb35   :  { %4645 = vsyncpa [#allocation25], 1 }
 0xb36   :  { %4646 = vsyncpa [#allocation28], 1 }
 0xb37   :  { %4647 = vsyncmov [#allocation9] }
 0xb3a   :  { %s4648_s4 = vpop.sfrf %4647 }
 0xb3b   :  { %p4906_p0 = scmp.ne.s32.totalorder %s4648_s4, 0 }
 0xb3d   :  { %4652 = shalt.err (%p4906_p0)  }
 0xb3e   :  { %4654 = vsyncmov [#allocation9 + $0x1] }
 0xb41   :  { %s4655_s9 = vpop.sfrf %4654 }
 0xb42   :  { %p4907_p1 = scmp.ne.s32.totalorder %s4655_s9, 0 }
 0xb44   :  { %4659 = shalt.err (%p4907_p1)  }
 0xb45   :  { %4661 = vsyncmov [#allocation9 + $0x2] }
 0xb48   :  { %s4662_s13 = vpop.sfrf %4661 }
 0xb49   :  { %p4908_p2 = scmp.ne.s32.totalorder %s4662_s13, 0 }
 0xb4b   :  { %4666 = shalt.err (%p4908_p2)  }
 0xb4c   :  { %4668 = vsyncmov [#allocation9 + $0x3] }
 0xb4f   :  { %s4669_s20 = vpop.sfrf %4668 }
 0xb50   :  { %p4909_p3 = scmp.ne.s32.totalorder %s4669_s20, 0 }
 0xb52   :  { %4673 = shalt.err (%p4909_p3)  }
 0xb53   :  { %4675 = vsyncmov [#allocation9 + $0x4] }
 0xb56   :  { %s4676_s29 = vpop.sfrf %4675 }
 0xb57   :  { %p4910_p4 = scmp.ne.s32.totalorder %s4676_s29, 0 }
 0xb59   :  { %4680 = shalt.err (%p4910_p4)  }
 0xb5a   :  { %4682 = vsyncmov [#allocation9 + $0x5] }
 0xb5d   :  { %s4683_s11 = vpop.sfrf %4682 }
 0xb5e   :  { %p4911_p5 = scmp.ne.s32.totalorder %s4683_s11, 0 }
 0xb60   :  { %4687 = shalt.err (%p4911_p5)  }
 0xb61   :  { %4689 = vsyncmov [#allocation9 + $0x6] }
 0xb64   :  { %s4690_s19 = vpop.sfrf %4689 }
 0xb65   :  { %p4912_p6 = scmp.ne.s32.totalorder %s4690_s19, 0 }
 0xb67   :  { %4694 = shalt.err (%p4912_p6)  }

</bundles_post_ra>
